<compile_context>
chip_gen: v7x
topology: tpu7x:2x2x1
jax: 0.10.0
libtpu: 0.0.40
codegen_flags: <defaults>
</compile_context>

<pallas_src>
import functools

import jax
import jax.numpy as jnp
from jax.experimental import pallas as pl
from jax.experimental.pallas import tpu as pltpu

_EPS = 1e-12  # F.normalize default eps


def _cab_kernel(fmap_ref, ctx_ref, ctxT_ref, mask_ref,
                g_fmap_ref, g_ctx_row_ref, g_ctx_col_ref,
                wqT_ref, wk_ref, wvT_ref, woutT_ref,
                g_ff_ref, w1T_ref, b1_ref, w2T_ref, b2_ref,
                y_ref, amap_ref, *, heads):
    f32, bf16 = jnp.float32, jnp.bfloat16

    x = fmap_ref[0].astype(f32)       # (dim, tq)   channels x query pixels (native layout)
    ctx = ctx_ref[0].astype(f32)      # (n, dim_context)
    ctxT = ctxT_ref[0].astype(f32)    # (dim_context, n)
    dim, tq = x.shape
    n = ctx.shape[0]

    # --- ChannelRMSNorm(fmap): L2 over channels (sublane axis) * sqrt(dim) * gamma.
    #     sqrt(dim) is folded into gamma; rsqrt(max(ss, eps^2)) == 1/max(||x||, eps).
    inv_f = jax.lax.rsqrt(jnp.maximum(jnp.sum(x * x, axis=0, keepdims=True), _EPS * _EPS))
    xn = (x * inv_f * g_fmap_ref[...]).astype(bf16)                              # (dim, tq)

    # --- RMSNorm(context), in both orientations (k wants (n,dh), v wants (dh,n)):
    inv_c = jax.lax.rsqrt(jnp.maximum(jnp.sum(ctx * ctx, axis=-1, keepdims=True), _EPS * _EPS))
    cn = (ctx * inv_c * g_ctx_row_ref[...]).astype(bf16)                         # (n, dim_context)
    inv_ct = jax.lax.rsqrt(jnp.maximum(jnp.sum(ctxT * ctxT, axis=0, keepdims=True), _EPS * _EPS))
    cnT = (ctxT * inv_ct * g_ctx_col_ref[...]).astype(bf16)                      # (dim_context, n)

    neg_big = -jnp.finfo(f32).max
    mask_b = jnp.broadcast_to(mask_ref[0], (n, tq)) > 0.0                        # hoisted out of head loop

    # --- per-head attention; attn_scale folded into wq; logits kept (n, tq) so the
    #     attention-map stores are lane-dense.  All dots are plain (M,K)@(K,N).
    attn_outT = jnp.zeros((dim, tq), f32)
    for h in range(heads):
        qT = jnp.dot(wqT_ref[h], xn, preferred_element_type=f32).astype(bf16)    # (dh, tq)
        k = jnp.dot(cn, wk_ref[h], preferred_element_type=f32).astype(bf16)      # (n, dh)
        vT = jnp.dot(wvT_ref[h], cnT, preferred_element_type=f32).astype(bf16)   # (dh, n)

        sim = jnp.dot(k, qT, preferred_element_type=f32)                         # (n, tq)
        sim = jnp.where(mask_b, sim, neg_big)
        m = jnp.max(sim, axis=0, keepdims=True)                                  # (1, tq)
        e = jnp.exp(sim - m)
        attn = e * pl.reciprocal(jnp.sum(e, axis=0, keepdims=True), approx=True)
        amap_ref[0, h] = attn.astype(amap_ref.dtype)                             # lane-dense store

        oT = jnp.dot(vT, attn.astype(bf16), preferred_element_type=f32)          # (dh, tq)
        attn_outT = attn_outT + jnp.dot(woutT_ref[h], oT.astype(bf16),
                                        preferred_element_type=f32)              # (dim, tq)
        # TODO(synk): for larger dim_head, stage oT into a (dim_inner, tq) scratch and do one
        # K=dim_inner output projection instead of `heads` K=dim_head matmuls.

    x1 = attn_outT + x                                                           # residual 1

    # --- FeedForward (channel_first): ChannelRMSNorm -> 1x1 conv -> GELU -> 1x1 conv
    inv_1 = jax.lax.rsqrt(jnp.maximum(jnp.sum(x1 * x1, axis=0, keepdims=True), _EPS * _EPS))
    x1n = (x1 * inv_1 * g_ff_ref[...]).astype(bf16)                              # (dim, tq)
    h1 = jnp.dot(w1T_ref[...], x1n, preferred_element_type=f32) + b1_ref[...]    # (dim_hidden, tq)
    # TODO(synk): nn.GELU() is erf-exact; tanh approximation used for Mosaic-safe lowering.
    h1 = jax.nn.gelu(h1, approximate=True).astype(bf16)
    h2 = jnp.dot(w2T_ref[...], h1, preferred_element_type=f32) + b2_ref[...]     # (dim, tq)
    y_ref[0] = (h2 + x1).astype(y_ref.dtype)                                     # residual 2


def _pick_tq(xy, requested=None):
    if requested is not None and xy % requested == 0:
        return requested
    for tq in (512, 256, 128):
        if xy % tq == 0:
            return tq
    return xy  # single full-extent tile fallback (always a legal block)


def cross_attention_block(fmap, context, mask, params, *, heads, dim_head, tq=None):
    """fmap: (b, dim, x, y); context: (b, n, dim_context); mask: (b, n) bool.
    Returns (out (b, dim, x, y), att_map (b, heads*n, x, y))."""
    b, dim, xs, ys = fmap.shape
    _, n, dim_context = context.shape
    xy = xs * ys
    dim_inner = heads * dim_head
    dim_hidden = params["w1"].shape[1]
    tq = _pick_tq(xy, tq)
    num_tq = xy // tq

    f32, bf16 = jnp.float32, jnp.bfloat16
    attn_scale = float(dim_head) ** -0.5

    # Host-side, one-time layout plumbing: activations stay channels-first
    # (pixels land on lanes); per-head, pre-transposed bf16 weights; folded scales.
    fmap3 = fmap.reshape(b, dim, xy)
    ctxT = jnp.transpose(context, (0, 2, 1))
    mask3 = mask.astype(f32).reshape(b, n, 1)

    g_fmap = (params["gamma_fmap"].reshape(dim, 1) * dim ** 0.5).astype(f32)
    g_ctx_row = (params["gamma_ctx"].reshape(1, dim_context) * dim_context ** 0.5).astype(f32)
    g_ctx_col = (params["gamma_ctx"].reshape(dim_context, 1) * dim_context ** 0.5).astype(f32)
    g_ff = (params["gamma_ff"].reshape(dim, 1) * dim ** 0.5).astype(f32)

    wq = params["wq"] * attn_scale
    wqT = jnp.transpose(wq.reshape(dim, heads, dim_head), (1, 2, 0)).astype(bf16)        # (H, dh, dim)
    wk = jnp.transpose(params["wkv"][:, :dim_inner].reshape(dim_context, heads, dim_head),
                       (1, 0, 2)).astype(bf16)                                            # (H, dimc, dh)
    wvT = jnp.transpose(params["wkv"][:, dim_inner:].reshape(dim_context, heads, dim_head),
                        (1, 2, 0)).astype(bf16)                                           # (H, dh, dimc)
    woutT = jnp.transpose(params["wout"].reshape(heads, dim_head, dim), (0, 2, 1)).astype(bf16)  # (H, dim, dh)
    w1T = params["w1"].T.astype(bf16)                                                     # (dim_hidden, dim)
    w2T = params["w2"].T.astype(bf16)                                                     # (dim, dim_hidden)
    b1 = params["b1"].reshape(dim_hidden, 1).astype(f32)
    b2 = params["b2"].reshape(dim, 1).astype(f32)

    kernel = functools.partial(_cab_kernel, heads=heads)

    def resident():  # whole array resident in VMEM: one copy, no per-step DMA, no double-buffer
        return pl.BlockSpec(memory_space=pltpu.MemorySpace.VMEM)

    y3, amap = pl.pallas_call(
        kernel,
        out_shape=(
            jax.ShapeDtypeStruct((b, dim, xy), fmap.dtype),
            jax.ShapeDtypeStruct((b, heads, n, xy), jnp.float32),
        ),
        grid_spec=pltpu.PrefetchScalarGridSpec(
            num_scalar_prefetch=0,
            grid=(b, num_tq),
            in_specs=[
                pl.BlockSpec((1, dim, tq), lambda bi, ti: (bi, 0, ti)),
                pl.BlockSpec((1, n, dim_context), lambda bi, ti: (bi, 0, 0)),
                pl.BlockSpec((1, dim_context, n), lambda bi, ti: (bi, 0, 0)),
                pl.BlockSpec((1, n, 1), lambda bi, ti: (bi, 0, 0)),
                resident(),   # g_fmap
                resident(),   # g_ctx_row
                resident(),   # g_ctx_col
                resident(),   # wqT
                resident(),   # wk
                resident(),   # wvT
                resident(),   # woutT
                resident(),   # g_ff
                resident(),   # w1T
                resident(),   # b1
                resident(),   # w2T
                resident(),   # b2
            ],
            out_specs=(
                pl.BlockSpec((1, dim, tq), lambda bi, ti: (bi, 0, ti)),
                pl.BlockSpec((1, heads, n, tq), lambda bi, ti: (bi, 0, 0, ti)),
            ),
        ),
        compiler_params=pltpu.CompilerParams(
            dimension_semantics=("parallel", "parallel"),
            # Sized so double-buffered activation tiles + resident weights fit v7x's
            # 64 MiB VMEM with headroom; well within v5e/v6e's 128 MiB.
            vmem_limit_bytes=48 * 1024 * 1024,
        ),
    )(fmap3, context, ctxT, mask3,
      g_fmap, g_ctx_row, g_ctx_col, wqT, wk, wvT, woutT,
      g_ff, w1T, b1, w2T, b2)

    y_out = y3.reshape(b, dim, xs, ys)
    att_map = amap.reshape(b, heads * n, xs, ys)   # kernel layout == module layout; no transpose
    return y_out, att_map


def cross_attention_block_ref(fmap, context, mask, p, *, heads, dim_head):
    """Pure-JAX reference mirroring the PyTorch module (f32, HIGHEST precision)."""
    hp = jax.lax.Precision.HIGHEST
    b, dim, xs, ys = fmap.shape
    _, n, dim_context = context.shape
    dim_inner = heads * dim_head

    def l2norm(t):
        return t / jnp.maximum(jnp.sqrt(jnp.sum(t * t, axis=-1, keepdims=True)), _EPS)

    f = jnp.transpose(fmap, (0, 2, 3, 1)).reshape(b, xs * ys, dim)
    fn = l2norm(f) * (dim ** 0.5) * p["gamma_fmap"]
    cn = l2norm(context) * (dim_context ** 0.5) * p["gamma_ctx"]
    q = jnp.einsum("bnd,de->bne", fn, p["wq"], precision=hp)
    kv = jnp.einsum("bnd,de->bne", cn, p["wkv"], precision=hp)
    k, v = kv[..., :dim_inner], kv[..., dim_inner:]
    qh = q.reshape(b, xs * ys, heads, dim_head).transpose(0, 2, 1, 3)
    kh = k.reshape(b, n, heads, dim_head).transpose(0, 2, 1, 3)
    vh = v.reshape(b, n, heads, dim_head).transpose(0, 2, 1, 3)
    sim = jnp.einsum("bhid,bhjd->bhij", qh, kh, precision=hp) * (dim_head ** -0.5)
    sim = jnp.where(mask[:, None, None, :], sim, -jnp.finfo(sim.dtype).max)
    attn = jax.nn.softmax(sim, axis=-1)
    out = jnp.einsum("bhij,bhjd->bhid", attn, vh, precision=hp)
    out = out.transpose(0, 2, 1, 3).reshape(b, xs * ys, dim_inner)
    attn_out = jnp.einsum("bnd,de->bne", out, p["wout"], precision=hp)
    x1 = attn_out + f
    x1n = l2norm(x1) * (dim ** 0.5) * p["gamma_ff"]
    h1 = jnp.einsum("bnd,de->bne", x1n, p["w1"], precision=hp) + p["b1"]
    h1 = jax.nn.gelu(h1, approximate=True)
    h2 = jnp.einsum("bnd,de->bne", h1, p["w2"], precision=hp) + p["b2"]
    yv = h2 + x1
    y_out = jnp.transpose(yv.reshape(b, xs, ys, dim), (0, 3, 1, 2))
    att_map = jnp.transpose(attn, (0, 1, 3, 2)).reshape(b, heads * n, xs, ys)
    return y_out, att_map


if __name__ == "__main__":
    key = jax.random.PRNGKey(0)
    ks = jax.random.split(key, 10)

    # small but lane-dense shapes: xy = 256 -> two 128-pixel query tiles per batch
    b, dim, dim_context = 2, 128, 128
    heads, dim_head, ff_mult = 4, 32, 4
    xs = ys = 16
    n = 16
    dim_inner = heads * dim_head
    dim_hidden = dim * ff_mult

    fmap = jax.random.normal(ks[0], (b, dim, xs, ys), dtype=jnp.float32)
    context = jax.random.normal(ks[1], (b, n, dim_context), dtype=jnp.float32)
    mask = jax.random.uniform(ks[2], (b, n)) > 0.3
    mask = mask.at[:, 0].set(True)   # keep at least one valid context token per batch

    params = dict(
        gamma_fmap=jnp.ones((dim,), jnp.float32),        # nn.Parameter(torch.ones(...))
        gamma_ctx=jnp.ones((dim_context,), jnp.float32),
        gamma_ff=jnp.ones((dim,), jnp.float32),
        wq=jax.random.normal(ks[3], (dim, dim_inner), jnp.float32) / dim ** 0.5,
        wkv=jax.random.normal(ks[4], (dim_context, 2 * dim_inner), jnp.float32) / dim_context ** 0.5,
        wout=jax.random.normal(ks[5], (dim_inner, dim), jnp.float32) / dim_inner ** 0.5,
        w1=jax.random.normal(ks[6], (dim, dim_hidden), jnp.float32) / dim ** 0.5,
        b1=0.1 * jax.random.normal(ks[7], (dim_hidden,), jnp.float32),
        w2=jax.random.normal(ks[8], (dim_hidden, dim), jnp.float32) / dim_hidden ** 0.5,
        b2=0.1 * jax.random.normal(ks[9], (dim,), jnp.float32),
    )

    y_out, att_map = cross_attention_block(fmap, context, mask, params,
                                           heads=heads, dim_head=dim_head, tq=128)
    y_out = jax.block_until_ready(y_out)
    att_map = jax.block_until_ready(att_map)

    y_ref, amap_ref = cross_attention_block_ref(fmap, context, mask, params,
                                                heads=heads, dim_head=dim_head)

    assert y_out.shape == (b, dim, xs, ys)
    assert att_map.shape == (b, heads * n, xs, ys)
    # bf16 MXU operands in the kernel vs an f32 HIGHEST-precision reference -> looser y tolerance.
    assert jnp.allclose(y_out, y_ref, atol=5e-2, rtol=5e-2), (
        "output mismatch: max abs diff %e" % float(jnp.max(jnp.abs(y_out - y_ref))))
    assert jnp.allclose(att_map, amap_ref, atol=2e-2, rtol=2e-2), (
        "attn-map mismatch: max abs diff %e" % float(jnp.max(jnp.abs(att_map - amap_ref))))

    print("KERNEL_OK")
</pallas_src>

<mosaic_0001>
module attributes {stable_mosaic.version = 11 : i64} {
  func.func @_cab_kernel(%arg0: i32, %arg1: i32, %arg2: memref<1x128x128xf32, #tpu.memory_space<vmem>>, %arg3: memref<1x16x128xf32, #tpu.memory_space<vmem>>, %arg4: memref<1x128x16xf32, #tpu.memory_space<vmem>>, %arg5: memref<1x16x1xf32, #tpu.memory_space<vmem>>, %arg6: memref<128x1xf32, #tpu.memory_space<vmem>>, %arg7: memref<1x128xf32, #tpu.memory_space<vmem>>, %arg8: memref<128x1xf32, #tpu.memory_space<vmem>>, %arg9: memref<4x32x128xbf16, #tpu.memory_space<vmem>>, %arg10: memref<4x128x32xbf16, #tpu.memory_space<vmem>>, %arg11: memref<4x32x128xbf16, #tpu.memory_space<vmem>>, %arg12: memref<4x128x32xbf16, #tpu.memory_space<vmem>>, %arg13: memref<128x1xf32, #tpu.memory_space<vmem>>, %arg14: memref<512x128xbf16, #tpu.memory_space<vmem>>, %arg15: memref<512x1xf32, #tpu.memory_space<vmem>>, %arg16: memref<128x512xbf16, #tpu.memory_space<vmem>>, %arg17: memref<128x1xf32, #tpu.memory_space<vmem>>, %arg18: memref<1x128x128xf32, #tpu.memory_space<vmem>>, %arg19: memref<1x4x16x128xf32, #tpu.memory_space<vmem>>) attributes {dimension_semantics = [#tpu.dimension_semantics<parallel>, #tpu.dimension_semantics<parallel>], iteration_bounds = array<i64: 2, 2>, scalar_prefetch = 0 : i64, scratch_operands = 0 : i64, tpu.core_type = #tpu.core_type<tc>, window_params = [{transform_indices = @transform_0, window_bounds = array<i64: 1, 128, 128>}, {transform_indices = @transform_1, window_bounds = array<i64: 1, 16, 128>}, {transform_indices = @transform_2, window_bounds = array<i64: 1, 128, 16>}, {transform_indices = @transform_3, window_bounds = array<i64: 1, 16, 1>}, {pipeline_mode = #tpu.pipeline_mode<synchronous>, transform_indices = @transform_4, window_bounds = array<i64: 128, 1>}, {pipeline_mode = #tpu.pipeline_mode<synchronous>, transform_indices = @transform_5, window_bounds = array<i64: 1, 128>}, {pipeline_mode = #tpu.pipeline_mode<synchronous>, transform_indices = @transform_6, window_bounds = array<i64: 128, 1>}, {pipeline_mode = #tpu.pipeline_mode<synchronous>, transform_indices = @transform_7, window_bounds = array<i64: 4, 32, 128>}, {pipeline_mode = #tpu.pipeline_mode<synchronous>, transform_indices = @transform_8, window_bounds = array<i64: 4, 128, 32>}, {pipeline_mode = #tpu.pipeline_mode<synchronous>, transform_indices = @transform_9, window_bounds = array<i64: 4, 32, 128>}, {pipeline_mode = #tpu.pipeline_mode<synchronous>, transform_indices = @transform_10, window_bounds = array<i64: 4, 128, 32>}, {pipeline_mode = #tpu.pipeline_mode<synchronous>, transform_indices = @transform_11, window_bounds = array<i64: 128, 1>}, {pipeline_mode = #tpu.pipeline_mode<synchronous>, transform_indices = @transform_12, window_bounds = array<i64: 512, 128>}, {pipeline_mode = #tpu.pipeline_mode<synchronous>, transform_indices = @transform_13, window_bounds = array<i64: 512, 1>}, {pipeline_mode = #tpu.pipeline_mode<synchronous>, transform_indices = @transform_14, window_bounds = array<i64: 128, 512>}, {pipeline_mode = #tpu.pipeline_mode<synchronous>, transform_indices = @transform_15, window_bounds = array<i64: 128, 1>}, {transform_indices = @transform_16, window_bounds = array<i64: 1, 128, 128>}, {transform_indices = @transform_17, window_bounds = array<i64: 1, 4, 16, 128>}]} {
    %c0 = arith.constant 0 : index
    %c0_0 = arith.constant 0 : index
    %c0_1 = arith.constant 0 : index
    %0 = vector.load %arg2[%c0, %c0_0, %c0_1] : memref<1x128x128xf32, #tpu.memory_space<vmem>>, vector<1x128x128xf32>
    %1 = vector.shape_cast %0 : vector<1x128x128xf32> to vector<128x128xf32>
    %c0_2 = arith.constant 0 : index
    %c0_3 = arith.constant 0 : index
    %c0_4 = arith.constant 0 : index
    %2 = vector.load %arg3[%c0_2, %c0_3, %c0_4] : memref<1x16x128xf32, #tpu.memory_space<vmem>>, vector<1x16x128xf32>
    %3 = vector.shape_cast %2 : vector<1x16x128xf32> to vector<16x128xf32>
    %c0_5 = arith.constant 0 : index
    %c0_6 = arith.constant 0 : index
    %c0_7 = arith.constant 0 : index
    %4 = vector.load %arg4[%c0_5, %c0_6, %c0_7] : memref<1x128x16xf32, #tpu.memory_space<vmem>>, vector<1x128x16xf32>
    %5 = vector.shape_cast %4 : vector<1x128x16xf32> to vector<128x16xf32>
    %6 = arith.mulf %1, %1 : vector<128x128xf32>
    %cst = arith.constant dense<0.000000e+00> : vector<128xf32>
    %7 = vector.multi_reduction <add>, %6, %cst [0] : vector<128x128xf32> to vector<128xf32>
    %8 = vector.shape_cast %7 : vector<128xf32> to vector<1x128xf32>
    %cst_8 = arith.constant 1.000000e-24 : f32
    %9 = vector.broadcast %cst_8 : f32 to vector<1x128xf32>
    %10 = arith.maximumf %8, %9 : vector<1x128xf32>
    %11 = math.rsqrt %10 : vector<1x128xf32>
    %12 = vector.broadcast %11 : vector<1x128xf32> to vector<128x128xf32>
    %13 = arith.mulf %1, %12 : vector<128x128xf32>
    %c0_9 = arith.constant 0 : index
    %c0_10 = arith.constant 0 : index
    %14 = vector.load %arg6[%c0_9, %c0_10] : memref<128x1xf32, #tpu.memory_space<vmem>>, vector<128x1xf32>
    %15 = vector.broadcast %14 : vector<128x1xf32> to vector<128x128xf32>
    %16 = arith.mulf %13, %15 : vector<128x128xf32>
    %17 = arith.truncf %16 : vector<128x128xf32> to vector<128x128xbf16>
    %18 = arith.mulf %3, %3 : vector<16x128xf32>
    %cst_11 = arith.constant dense<0.000000e+00> : vector<16xf32>
    %19 = vector.multi_reduction <add>, %18, %cst_11 [1] : vector<16x128xf32> to vector<16xf32>
    %20 = vector.shape_cast %19 : vector<16xf32> to vector<16x1xf32>
    %cst_12 = arith.constant 1.000000e-24 : f32
    %21 = vector.broadcast %cst_12 : f32 to vector<16x1xf32>
    %22 = arith.maximumf %20, %21 : vector<16x1xf32>
    %23 = math.rsqrt %22 : vector<16x1xf32>
    %24 = vector.broadcast %23 : vector<16x1xf32> to vector<16x128xf32>
    %25 = arith.mulf %3, %24 : vector<16x128xf32>
    %c0_13 = arith.constant 0 : index
    %c0_14 = arith.constant 0 : index
    %26 = vector.load %arg7[%c0_13, %c0_14] : memref<1x128xf32, #tpu.memory_space<vmem>>, vector<1x128xf32>
    %27 = vector.broadcast %26 : vector<1x128xf32> to vector<16x128xf32>
    %28 = arith.mulf %25, %27 : vector<16x128xf32>
    %29 = arith.truncf %28 : vector<16x128xf32> to vector<16x128xbf16>
    %30 = arith.mulf %5, %5 : vector<128x16xf32>
    %cst_15 = arith.constant dense<0.000000e+00> : vector<16xf32>
    %31 = vector.multi_reduction <add>, %30, %cst_15 [0] : vector<128x16xf32> to vector<16xf32>
    %32 = vector.shape_cast %31 : vector<16xf32> to vector<1x16xf32>
    %cst_16 = arith.constant 1.000000e-24 : f32
    %33 = vector.broadcast %cst_16 : f32 to vector<1x16xf32>
    %34 = arith.maximumf %32, %33 : vector<1x16xf32>
    %35 = math.rsqrt %34 : vector<1x16xf32>
    %36 = vector.broadcast %35 : vector<1x16xf32> to vector<128x16xf32>
    %37 = arith.mulf %5, %36 : vector<128x16xf32>
    %c0_17 = arith.constant 0 : index
    %c0_18 = arith.constant 0 : index
    %38 = vector.load %arg8[%c0_17, %c0_18] : memref<128x1xf32, #tpu.memory_space<vmem>>, vector<128x1xf32>
    %39 = vector.broadcast %38 : vector<128x1xf32> to vector<128x16xf32>
    %40 = arith.mulf %37, %39 : vector<128x16xf32>
    %41 = arith.truncf %40 : vector<128x16xf32> to vector<128x16xbf16>
    %c0_19 = arith.constant 0 : index
    %c0_20 = arith.constant 0 : index
    %c0_21 = arith.constant 0 : index
    %42 = vector.load %arg5[%c0_19, %c0_20, %c0_21] : memref<1x16x1xf32, #tpu.memory_space<vmem>>, vector<1x16x1xf32>
    %43 = vector.shape_cast %42 : vector<1x16x1xf32> to vector<16x1xf32>
    %44 = vector.shape_cast %43 : vector<16x1xf32> to vector<16x1xf32>
    %45 = vector.broadcast %44 : vector<16x1xf32> to vector<16x128xf32>
    %cst_22 = arith.constant 0.000000e+00 : f32
    %46 = vector.broadcast %cst_22 : f32 to vector<16x128xf32>
    %47 = arith.cmpf ogt, %45, %46 : vector<16x128xf32>
    %cst_23 = arith.constant 0.000000e+00 : f32
    %48 = vector.broadcast %cst_23 : f32 to vector<128x128xf32>
    %c0_24 = arith.constant 0 : index
    %c0_25 = arith.constant 0 : index
    %c0_26 = arith.constant 0 : index
    %49 = vector.load %arg9[%c0_24, %c0_25, %c0_26] : memref<4x32x128xbf16, #tpu.memory_space<vmem>>, vector<1x32x128xbf16>
    %50 = vector.shape_cast %49 : vector<1x32x128xbf16> to vector<32x128xbf16>
    %cst_27 = arith.constant dense<0.000000e+00> : vector<32x128xf32>
    %51 = tpu.matmul %50, %17, %cst_27 {dimension_numbers = #tpu.dot_dimension_numbers<[1], [0], [0], [1], [0, 0, 1, 1], [], []>} : vector<32x128xbf16>, vector<128x128xbf16>, vector<32x128xf32> -> vector<32x128xf32>
    %52 = arith.truncf %51 : vector<32x128xf32> to vector<32x128xbf16>
    %c0_28 = arith.constant 0 : index
    %c0_29 = arith.constant 0 : index
    %c0_30 = arith.constant 0 : index
    %53 = vector.load %arg10[%c0_28, %c0_29, %c0_30] : memref<4x128x32xbf16, #tpu.memory_space<vmem>>, vector<1x128x32xbf16>
    %54 = vector.shape_cast %53 : vector<1x128x32xbf16> to vector<128x32xbf16>
    %cst_31 = arith.constant dense<0.000000e+00> : vector<16x32xf32>
    %55 = tpu.matmul %29, %54, %cst_31 {dimension_numbers = #tpu.dot_dimension_numbers<[1], [0], [0], [1], [0, 0, 1, 1], [], []>} : vector<16x128xbf16>, vector<128x32xbf16>, vector<16x32xf32> -> vector<16x32xf32>
    %56 = arith.truncf %55 : vector<16x32xf32> to vector<16x32xbf16>
    %c0_32 = arith.constant 0 : index
    %c0_33 = arith.constant 0 : index
    %c0_34 = arith.constant 0 : index
    %57 = vector.load %arg11[%c0_32, %c0_33, %c0_34] : memref<4x32x128xbf16, #tpu.memory_space<vmem>>, vector<1x32x128xbf16>
    %58 = vector.shape_cast %57 : vector<1x32x128xbf16> to vector<32x128xbf16>
    %cst_35 = arith.constant dense<0.000000e+00> : vector<32x16xf32>
    %59 = tpu.matmul %58, %41, %cst_35 {dimension_numbers = #tpu.dot_dimension_numbers<[1], [0], [0], [1], [0, 0, 1, 1], [], []>} : vector<32x128xbf16>, vector<128x16xbf16>, vector<32x16xf32> -> vector<32x16xf32>
    %60 = arith.truncf %59 : vector<32x16xf32> to vector<32x16xbf16>
    %cst_36 = arith.constant dense<0.000000e+00> : vector<16x128xf32>
    %61 = tpu.matmul %56, %52, %cst_36 {dimension_numbers = #tpu.dot_dimension_numbers<[1], [0], [0], [1], [0, 0, 1, 1], [], []>} : vector<16x32xbf16>, vector<32x128xbf16>, vector<16x128xf32> -> vector<16x128xf32>
    %cst_37 = arith.constant -3.40282347E+38 : f32
    %62 = vector.broadcast %cst_37 : f32 to vector<16x128xf32>
    %63 = arith.select %47, %61, %62 : vector<16x128xi1>, vector<16x128xf32>
    %cst_38 = arith.constant dense<0xFF800000> : vector<128xf32>
    %64 = vector.multi_reduction <maximumf>, %63, %cst_38 [0] : vector<16x128xf32> to vector<128xf32>
    %65 = vector.shape_cast %64 : vector<128xf32> to vector<1x128xf32>
    %66 = vector.broadcast %65 : vector<1x128xf32> to vector<16x128xf32>
    %67 = arith.subf %63, %66 : vector<16x128xf32>
    %68 = math.exp %67 : vector<16x128xf32>
    %cst_39 = arith.constant dense<0.000000e+00> : vector<128xf32>
    %69 = vector.multi_reduction <add>, %68, %cst_39 [0] : vector<16x128xf32> to vector<128xf32>
    %70 = vector.shape_cast %69 : vector<128xf32> to vector<1x128xf32>
    %71 = tpu.reciprocal %70 {approx = true} : vector<1x128xf32> -> vector<1x128xf32>
    %72 = vector.broadcast %71 : vector<1x128xf32> to vector<16x128xf32>
    %73 = arith.mulf %68, %72 : vector<16x128xf32>
    %c0_40 = arith.constant 0 : index
    %c0_41 = arith.constant 0 : index
    %c0_42 = arith.constant 0 : index
    %c0_43 = arith.constant 0 : index
    %74 = vector.load %arg19[%c0_40, %c0_41, %c0_42, %c0_43] : memref<1x4x16x128xf32, #tpu.memory_space<vmem>>, vector<1x1x16x128xf32>
    %75 = vector.shape_cast %74 : vector<1x1x16x128xf32> to vector<16x128xf32>
    %76 = vector.shape_cast %73 : vector<16x128xf32> to vector<1x1x16x128xf32>
    tpu.vector_store %arg19[%c0_40, %c0_41, %c0_42, %c0_43], %76 {strides = array<i32>} : memref<1x4x16x128xf32, #tpu.memory_space<vmem>>, vector<1x1x16x128xf32>,
    %77 = arith.truncf %73 : vector<16x128xf32> to vector<16x128xbf16>
    %cst_44 = arith.constant dense<0.000000e+00> : vector<32x128xf32>
    %78 = tpu.matmul %60, %77, %cst_44 {dimension_numbers = #tpu.dot_dimension_numbers<[1], [0], [0], [1], [0, 0, 1, 1], [], []>} : vector<32x16xbf16>, vector<16x128xbf16>, vector<32x128xf32> -> vector<32x128xf32>
    %c0_45 = arith.constant 0 : index
    %c0_46 = arith.constant 0 : index
    %c0_47 = arith.constant 0 : index
    %79 = vector.load %arg12[%c0_45, %c0_46, %c0_47] : memref<4x128x32xbf16, #tpu.memory_space<vmem>>, vector<1x128x32xbf16>
    %80 = vector.shape_cast %79 : vector<1x128x32xbf16> to vector<128x32xbf16>
    %81 = arith.truncf %78 : vector<32x128xf32> to vector<32x128xbf16>
    %cst_48 = arith.constant dense<0.000000e+00> : vector<128x128xf32>
    %82 = tpu.matmul %80, %81, %cst_48 {dimension_numbers = #tpu.dot_dimension_numbers<[1], [0], [0], [1], [0, 0, 1, 1], [], []>} : vector<128x32xbf16>, vector<32x128xbf16>, vector<128x128xf32> -> vector<128x128xf32>
    %83 = arith.addf %48, %82 : vector<128x128xf32>
    %c1 = arith.constant 1 : index
    %c0_49 = arith.constant 0 : index
    %c0_50 = arith.constant 0 : index
    %84 = vector.load %arg9[%c1, %c0_49, %c0_50] : memref<4x32x128xbf16, #tpu.memory_space<vmem>>, vector<1x32x128xbf16>
    %85 = vector.shape_cast %84 : vector<1x32x128xbf16> to vector<32x128xbf16>
    %cst_51 = arith.constant dense<0.000000e+00> : vector<32x128xf32>
    %86 = tpu.matmul %85, %17, %cst_51 {dimension_numbers = #tpu.dot_dimension_numbers<[1], [0], [0], [1], [0, 0, 1, 1], [], []>} : vector<32x128xbf16>, vector<128x128xbf16>, vector<32x128xf32> -> vector<32x128xf32>
    %87 = arith.truncf %86 : vector<32x128xf32> to vector<32x128xbf16>
    %c1_52 = arith.constant 1 : index
    %c0_53 = arith.constant 0 : index
    %c0_54 = arith.constant 0 : index
    %88 = vector.load %arg10[%c1_52, %c0_53, %c0_54] : memref<4x128x32xbf16, #tpu.memory_space<vmem>>, vector<1x128x32xbf16>
    %89 = vector.shape_cast %88 : vector<1x128x32xbf16> to vector<128x32xbf16>
    %cst_55 = arith.constant dense<0.000000e+00> : vector<16x32xf32>
    %90 = tpu.matmul %29, %89, %cst_55 {dimension_numbers = #tpu.dot_dimension_numbers<[1], [0], [0], [1], [0, 0, 1, 1], [], []>} : vector<16x128xbf16>, vector<128x32xbf16>, vector<16x32xf32> -> vector<16x32xf32>
    %91 = arith.truncf %90 : vector<16x32xf32> to vector<16x32xbf16>
    %c1_56 = arith.constant 1 : index
    %c0_57 = arith.constant 0 : index
    %c0_58 = arith.constant 0 : index
    %92 = vector.load %arg11[%c1_56, %c0_57, %c0_58] : memref<4x32x128xbf16, #tpu.memory_space<vmem>>, vector<1x32x128xbf16>
    %93 = vector.shape_cast %92 : vector<1x32x128xbf16> to vector<32x128xbf16>
    %cst_59 = arith.constant dense<0.000000e+00> : vector<32x16xf32>
    %94 = tpu.matmul %93, %41, %cst_59 {dimension_numbers = #tpu.dot_dimension_numbers<[1], [0], [0], [1], [0, 0, 1, 1], [], []>} : vector<32x128xbf16>, vector<128x16xbf16>, vector<32x16xf32> -> vector<32x16xf32>
    %95 = arith.truncf %94 : vector<32x16xf32> to vector<32x16xbf16>
    %cst_60 = arith.constant dense<0.000000e+00> : vector<16x128xf32>
    %96 = tpu.matmul %91, %87, %cst_60 {dimension_numbers = #tpu.dot_dimension_numbers<[1], [0], [0], [1], [0, 0, 1, 1], [], []>} : vector<16x32xbf16>, vector<32x128xbf16>, vector<16x128xf32> -> vector<16x128xf32>
    %cst_61 = arith.constant -3.40282347E+38 : f32
    %97 = vector.broadcast %cst_61 : f32 to vector<16x128xf32>
    %98 = arith.select %47, %96, %97 : vector<16x128xi1>, vector<16x128xf32>
    %cst_62 = arith.constant dense<0xFF800000> : vector<128xf32>
    %99 = vector.multi_reduction <maximumf>, %98, %cst_62 [0] : vector<16x128xf32> to vector<128xf32>
    %100 = vector.shape_cast %99 : vector<128xf32> to vector<1x128xf32>
    %101 = vector.broadcast %100 : vector<1x128xf32> to vector<16x128xf32>
    %102 = arith.subf %98, %101 : vector<16x128xf32>
    %103 = math.exp %102 : vector<16x128xf32>
    %cst_63 = arith.constant dense<0.000000e+00> : vector<128xf32>
    %104 = vector.multi_reduction <add>, %103, %cst_63 [0] : vector<16x128xf32> to vector<128xf32>
    %105 = vector.shape_cast %104 : vector<128xf32> to vector<1x128xf32>
    %106 = tpu.reciprocal %105 {approx = true} : vector<1x128xf32> -> vector<1x128xf32>
    %107 = vector.broadcast %106 : vector<1x128xf32> to vector<16x128xf32>
    %108 = arith.mulf %103, %107 : vector<16x128xf32>
    %c0_64 = arith.constant 0 : index
    %c1_65 = arith.constant 1 : index
    %c0_66 = arith.constant 0 : index
    %c0_67 = arith.constant 0 : index
    %109 = vector.load %arg19[%c0_64, %c1_65, %c0_66, %c0_67] : memref<1x4x16x128xf32, #tpu.memory_space<vmem>>, vector<1x1x16x128xf32>
    %110 = vector.shape_cast %109 : vector<1x1x16x128xf32> to vector<16x128xf32>
    %111 = vector.shape_cast %108 : vector<16x128xf32> to vector<1x1x16x128xf32>
    tpu.vector_store %arg19[%c0_64, %c1_65, %c0_66, %c0_67], %111 {strides = array<i32>} : memref<1x4x16x128xf32, #tpu.memory_space<vmem>>, vector<1x1x16x128xf32>,
    %112 = arith.truncf %108 : vector<16x128xf32> to vector<16x128xbf16>
    %cst_68 = arith.constant dense<0.000000e+00> : vector<32x128xf32>
    %113 = tpu.matmul %95, %112, %cst_68 {dimension_numbers = #tpu.dot_dimension_numbers<[1], [0], [0], [1], [0, 0, 1, 1], [], []>} : vector<32x16xbf16>, vector<16x128xbf16>, vector<32x128xf32> -> vector<32x128xf32>
    %c1_69 = arith.constant 1 : index
    %c0_70 = arith.constant 0 : index
    %c0_71 = arith.constant 0 : index
    %114 = vector.load %arg12[%c1_69, %c0_70, %c0_71] : memref<4x128x32xbf16, #tpu.memory_space<vmem>>, vector<1x128x32xbf16>
    %115 = vector.shape_cast %114 : vector<1x128x32xbf16> to vector<128x32xbf16>
    %116 = arith.truncf %113 : vector<32x128xf32> to vector<32x128xbf16>
    %cst_72 = arith.constant dense<0.000000e+00> : vector<128x128xf32>
    %117 = tpu.matmul %115, %116, %cst_72 {dimension_numbers = #tpu.dot_dimension_numbers<[1], [0], [0], [1], [0, 0, 1, 1], [], []>} : vector<128x32xbf16>, vector<32x128xbf16>, vector<128x128xf32> -> vector<128x128xf32>
    %118 = arith.addf %83, %117 : vector<128x128xf32>
    %c2 = arith.constant 2 : index
    %c0_73 = arith.constant 0 : index
    %c0_74 = arith.constant 0 : index
    %119 = vector.load %arg9[%c2, %c0_73, %c0_74] : memref<4x32x128xbf16, #tpu.memory_space<vmem>>, vector<1x32x128xbf16>
    %120 = vector.shape_cast %119 : vector<1x32x128xbf16> to vector<32x128xbf16>
    %cst_75 = arith.constant dense<0.000000e+00> : vector<32x128xf32>
    %121 = tpu.matmul %120, %17, %cst_75 {dimension_numbers = #tpu.dot_dimension_numbers<[1], [0], [0], [1], [0, 0, 1, 1], [], []>} : vector<32x128xbf16>, vector<128x128xbf16>, vector<32x128xf32> -> vector<32x128xf32>
    %122 = arith.truncf %121 : vector<32x128xf32> to vector<32x128xbf16>
    %c2_76 = arith.constant 2 : index
    %c0_77 = arith.constant 0 : index
    %c0_78 = arith.constant 0 : index
    %123 = vector.load %arg10[%c2_76, %c0_77, %c0_78] : memref<4x128x32xbf16, #tpu.memory_space<vmem>>, vector<1x128x32xbf16>
    %124 = vector.shape_cast %123 : vector<1x128x32xbf16> to vector<128x32xbf16>
    %cst_79 = arith.constant dense<0.000000e+00> : vector<16x32xf32>
    %125 = tpu.matmul %29, %124, %cst_79 {dimension_numbers = #tpu.dot_dimension_numbers<[1], [0], [0], [1], [0, 0, 1, 1], [], []>} : vector<16x128xbf16>, vector<128x32xbf16>, vector<16x32xf32> -> vector<16x32xf32>
    %126 = arith.truncf %125 : vector<16x32xf32> to vector<16x32xbf16>
    %c2_80 = arith.constant 2 : index
    %c0_81 = arith.constant 0 : index
    %c0_82 = arith.constant 0 : index
    %127 = vector.load %arg11[%c2_80, %c0_81, %c0_82] : memref<4x32x128xbf16, #tpu.memory_space<vmem>>, vector<1x32x128xbf16>
    %128 = vector.shape_cast %127 : vector<1x32x128xbf16> to vector<32x128xbf16>
    %cst_83 = arith.constant dense<0.000000e+00> : vector<32x16xf32>
    %129 = tpu.matmul %128, %41, %cst_83 {dimension_numbers = #tpu.dot_dimension_numbers<[1], [0], [0], [1], [0, 0, 1, 1], [], []>} : vector<32x128xbf16>, vector<128x16xbf16>, vector<32x16xf32> -> vector<32x16xf32>
    %130 = arith.truncf %129 : vector<32x16xf32> to vector<32x16xbf16>
    %cst_84 = arith.constant dense<0.000000e+00> : vector<16x128xf32>
    %131 = tpu.matmul %126, %122, %cst_84 {dimension_numbers = #tpu.dot_dimension_numbers<[1], [0], [0], [1], [0, 0, 1, 1], [], []>} : vector<16x32xbf16>, vector<32x128xbf16>, vector<16x128xf32> -> vector<16x128xf32>
    %cst_85 = arith.constant -3.40282347E+38 : f32
    %132 = vector.broadcast %cst_85 : f32 to vector<16x128xf32>
    %133 = arith.select %47, %131, %132 : vector<16x128xi1>, vector<16x128xf32>
    %cst_86 = arith.constant dense<0xFF800000> : vector<128xf32>
    %134 = vector.multi_reduction <maximumf>, %133, %cst_86 [0] : vector<16x128xf32> to vector<128xf32>
    %135 = vector.shape_cast %134 : vector<128xf32> to vector<1x128xf32>
    %136 = vector.broadcast %135 : vector<1x128xf32> to vector<16x128xf32>
    %137 = arith.subf %133, %136 : vector<16x128xf32>
    %138 = math.exp %137 : vector<16x128xf32>
    %cst_87 = arith.constant dense<0.000000e+00> : vector<128xf32>
    %139 = vector.multi_reduction <add>, %138, %cst_87 [0] : vector<16x128xf32> to vector<128xf32>
    %140 = vector.shape_cast %139 : vector<128xf32> to vector<1x128xf32>
    %141 = tpu.reciprocal %140 {approx = true} : vector<1x128xf32> -> vector<1x128xf32>
    %142 = vector.broadcast %141 : vector<1x128xf32> to vector<16x128xf32>
    %143 = arith.mulf %138, %142 : vector<16x128xf32>
    %c0_88 = arith.constant 0 : index
    %c2_89 = arith.constant 2 : index
    %c0_90 = arith.constant 0 : index
    %c0_91 = arith.constant 0 : index
    %144 = vector.load %arg19[%c0_88, %c2_89, %c0_90, %c0_91] : memref<1x4x16x128xf32, #tpu.memory_space<vmem>>, vector<1x1x16x128xf32>
    %145 = vector.shape_cast %144 : vector<1x1x16x128xf32> to vector<16x128xf32>
    %146 = vector.shape_cast %143 : vector<16x128xf32> to vector<1x1x16x128xf32>
    tpu.vector_store %arg19[%c0_88, %c2_89, %c0_90, %c0_91], %146 {strides = array<i32>} : memref<1x4x16x128xf32, #tpu.memory_space<vmem>>, vector<1x1x16x128xf32>,
    %147 = arith.truncf %143 : vector<16x128xf32> to vector<16x128xbf16>
    %cst_92 = arith.constant dense<0.000000e+00> : vector<32x128xf32>
    %148 = tpu.matmul %130, %147, %cst_92 {dimension_numbers = #tpu.dot_dimension_numbers<[1], [0], [0], [1], [0, 0, 1, 1], [], []>} : vector<32x16xbf16>, vector<16x128xbf16>, vector<32x128xf32> -> vector<32x128xf32>
    %c2_93 = arith.constant 2 : index
    %c0_94 = arith.constant 0 : index
    %c0_95 = arith.constant 0 : index
    %149 = vector.load %arg12[%c2_93, %c0_94, %c0_95] : memref<4x128x32xbf16, #tpu.memory_space<vmem>>, vector<1x128x32xbf16>
    %150 = vector.shape_cast %149 : vector<1x128x32xbf16> to vector<128x32xbf16>
    %151 = arith.truncf %148 : vector<32x128xf32> to vector<32x128xbf16>
    %cst_96 = arith.constant dense<0.000000e+00> : vector<128x128xf32>
    %152 = tpu.matmul %150, %151, %cst_96 {dimension_numbers = #tpu.dot_dimension_numbers<[1], [0], [0], [1], [0, 0, 1, 1], [], []>} : vector<128x32xbf16>, vector<32x128xbf16>, vector<128x128xf32> -> vector<128x128xf32>
    %153 = arith.addf %118, %152 : vector<128x128xf32>
    %c3 = arith.constant 3 : index
    %c0_97 = arith.constant 0 : index
    %c0_98 = arith.constant 0 : index
    %154 = vector.load %arg9[%c3, %c0_97, %c0_98] : memref<4x32x128xbf16, #tpu.memory_space<vmem>>, vector<1x32x128xbf16>
    %155 = vector.shape_cast %154 : vector<1x32x128xbf16> to vector<32x128xbf16>
    %cst_99 = arith.constant dense<0.000000e+00> : vector<32x128xf32>
    %156 = tpu.matmul %155, %17, %cst_99 {dimension_numbers = #tpu.dot_dimension_numbers<[1], [0], [0], [1], [0, 0, 1, 1], [], []>} : vector<32x128xbf16>, vector<128x128xbf16>, vector<32x128xf32> -> vector<32x128xf32>
    %157 = arith.truncf %156 : vector<32x128xf32> to vector<32x128xbf16>
    %c3_100 = arith.constant 3 : index
    %c0_101 = arith.constant 0 : index
    %c0_102 = arith.constant 0 : index
    %158 = vector.load %arg10[%c3_100, %c0_101, %c0_102] : memref<4x128x32xbf16, #tpu.memory_space<vmem>>, vector<1x128x32xbf16>
    %159 = vector.shape_cast %158 : vector<1x128x32xbf16> to vector<128x32xbf16>
    %cst_103 = arith.constant dense<0.000000e+00> : vector<16x32xf32>
    %160 = tpu.matmul %29, %159, %cst_103 {dimension_numbers = #tpu.dot_dimension_numbers<[1], [0], [0], [1], [0, 0, 1, 1], [], []>} : vector<16x128xbf16>, vector<128x32xbf16>, vector<16x32xf32> -> vector<16x32xf32>
    %161 = arith.truncf %160 : vector<16x32xf32> to vector<16x32xbf16>
    %c3_104 = arith.constant 3 : index
    %c0_105 = arith.constant 0 : index
    %c0_106 = arith.constant 0 : index
    %162 = vector.load %arg11[%c3_104, %c0_105, %c0_106] : memref<4x32x128xbf16, #tpu.memory_space<vmem>>, vector<1x32x128xbf16>
    %163 = vector.shape_cast %162 : vector<1x32x128xbf16> to vector<32x128xbf16>
    %cst_107 = arith.constant dense<0.000000e+00> : vector<32x16xf32>
    %164 = tpu.matmul %163, %41, %cst_107 {dimension_numbers = #tpu.dot_dimension_numbers<[1], [0], [0], [1], [0, 0, 1, 1], [], []>} : vector<32x128xbf16>, vector<128x16xbf16>, vector<32x16xf32> -> vector<32x16xf32>
    %165 = arith.truncf %164 : vector<32x16xf32> to vector<32x16xbf16>
    %cst_108 = arith.constant dense<0.000000e+00> : vector<16x128xf32>
    %166 = tpu.matmul %161, %157, %cst_108 {dimension_numbers = #tpu.dot_dimension_numbers<[1], [0], [0], [1], [0, 0, 1, 1], [], []>} : vector<16x32xbf16>, vector<32x128xbf16>, vector<16x128xf32> -> vector<16x128xf32>
    %cst_109 = arith.constant -3.40282347E+38 : f32
    %167 = vector.broadcast %cst_109 : f32 to vector<16x128xf32>
    %168 = arith.select %47, %166, %167 : vector<16x128xi1>, vector<16x128xf32>
    %cst_110 = arith.constant dense<0xFF800000> : vector<128xf32>
    %169 = vector.multi_reduction <maximumf>, %168, %cst_110 [0] : vector<16x128xf32> to vector<128xf32>
    %170 = vector.shape_cast %169 : vector<128xf32> to vector<1x128xf32>
    %171 = vector.broadcast %170 : vector<1x128xf32> to vector<16x128xf32>
    %172 = arith.subf %168, %171 : vector<16x128xf32>
    %173 = math.exp %172 : vector<16x128xf32>
    %cst_111 = arith.constant dense<0.000000e+00> : vector<128xf32>
    %174 = vector.multi_reduction <add>, %173, %cst_111 [0] : vector<16x128xf32> to vector<128xf32>
    %175 = vector.shape_cast %174 : vector<128xf32> to vector<1x128xf32>
    %176 = tpu.reciprocal %175 {approx = true} : vector<1x128xf32> -> vector<1x128xf32>
    %177 = vector.broadcast %176 : vector<1x128xf32> to vector<16x128xf32>
    %178 = arith.mulf %173, %177 : vector<16x128xf32>
    %c0_112 = arith.constant 0 : index
    %c3_113 = arith.constant 3 : index
    %c0_114 = arith.constant 0 : index
    %c0_115 = arith.constant 0 : index
    %179 = vector.load %arg19[%c0_112, %c3_113, %c0_114, %c0_115] : memref<1x4x16x128xf32, #tpu.memory_space<vmem>>, vector<1x1x16x128xf32>
    %180 = vector.shape_cast %179 : vector<1x1x16x128xf32> to vector<16x128xf32>
    %181 = vector.shape_cast %178 : vector<16x128xf32> to vector<1x1x16x128xf32>
    tpu.vector_store %arg19[%c0_112, %c3_113, %c0_114, %c0_115], %181 {strides = array<i32>} : memref<1x4x16x128xf32, #tpu.memory_space<vmem>>, vector<1x1x16x128xf32>,
    %182 = arith.truncf %178 : vector<16x128xf32> to vector<16x128xbf16>
    %cst_116 = arith.constant dense<0.000000e+00> : vector<32x128xf32>
    %183 = tpu.matmul %165, %182, %cst_116 {dimension_numbers = #tpu.dot_dimension_numbers<[1], [0], [0], [1], [0, 0, 1, 1], [], []>} : vector<32x16xbf16>, vector<16x128xbf16>, vector<32x128xf32> -> vector<32x128xf32>
    %c3_117 = arith.constant 3 : index
    %c0_118 = arith.constant 0 : index
    %c0_119 = arith.constant 0 : index
    %184 = vector.load %arg12[%c3_117, %c0_118, %c0_119] : memref<4x128x32xbf16, #tpu.memory_space<vmem>>, vector<1x128x32xbf16>
    %185 = vector.shape_cast %184 : vector<1x128x32xbf16> to vector<128x32xbf16>
    %186 = arith.truncf %183 : vector<32x128xf32> to vector<32x128xbf16>
    %cst_120 = arith.constant dense<0.000000e+00> : vector<128x128xf32>
    %187 = tpu.matmul %185, %186, %cst_120 {dimension_numbers = #tpu.dot_dimension_numbers<[1], [0], [0], [1], [0, 0, 1, 1], [], []>} : vector<128x32xbf16>, vector<32x128xbf16>, vector<128x128xf32> -> vector<128x128xf32>
    %188 = arith.addf %153, %187 : vector<128x128xf32>
    %189 = arith.addf %188, %1 : vector<128x128xf32>
    %190 = arith.mulf %189, %189 : vector<128x128xf32>
    %cst_121 = arith.constant dense<0.000000e+00> : vector<128xf32>
    %191 = vector.multi_reduction <add>, %190, %cst_121 [0] : vector<128x128xf32> to vector<128xf32>
    %192 = vector.shape_cast %191 : vector<128xf32> to vector<1x128xf32>
    %cst_122 = arith.constant 1.000000e-24 : f32
    %193 = vector.broadcast %cst_122 : f32 to vector<1x128xf32>
    %194 = arith.maximumf %192, %193 : vector<1x128xf32>
    %195 = math.rsqrt %194 : vector<1x128xf32>
    %196 = vector.broadcast %195 : vector<1x128xf32> to vector<128x128xf32>
    %197 = arith.mulf %189, %196 : vector<128x128xf32>
    %c0_123 = arith.constant 0 : index
    %c0_124 = arith.constant 0 : index
    %198 = vector.load %arg13[%c0_123, %c0_124] : memref<128x1xf32, #tpu.memory_space<vmem>>, vector<128x1xf32>
    %199 = vector.broadcast %198 : vector<128x1xf32> to vector<128x128xf32>
    %200 = arith.mulf %197, %199 : vector<128x128xf32>
    %201 = arith.truncf %200 : vector<128x128xf32> to vector<128x128xbf16>
    %c0_125 = arith.constant 0 : index
    %c0_126 = arith.constant 0 : index
    %202 = vector.load %arg14[%c0_125, %c0_126] : memref<512x128xbf16, #tpu.memory_space<vmem>>, vector<512x128xbf16>
    %cst_127 = arith.constant dense<0.000000e+00> : vector<512x128xf32>
    %203 = tpu.matmul %202, %201, %cst_127 {dimension_numbers = #tpu.dot_dimension_numbers<[1], [0], [0], [1], [0, 0, 1, 1], [], []>} : vector<512x128xbf16>, vector<128x128xbf16>, vector<512x128xf32> -> vector<512x128xf32>
    %c0_128 = arith.constant 0 : index
    %c0_129 = arith.constant 0 : index
    %204 = vector.load %arg15[%c0_128, %c0_129] : memref<512x1xf32, #tpu.memory_space<vmem>>, vector<512x1xf32>
    %205 = vector.broadcast %204 : vector<512x1xf32> to vector<512x128xf32>
    %206 = arith.addf %203, %205 : vector<512x128xf32>
    %207 = arith.mulf %206, %206 : vector<512x128xf32>
    %208 = arith.mulf %206, %207 : vector<512x128xf32>
    %cst_130 = arith.constant 4.471500e-02 : f32
    %209 = vector.broadcast %cst_130 : f32 to vector<512x128xf32>
    %210 = arith.mulf %209, %208 : vector<512x128xf32>
    %211 = arith.addf %206, %210 : vector<512x128xf32>
    %cst_131 = arith.constant 0.797884583 : f32
    %212 = vector.broadcast %cst_131 : f32 to vector<512x128xf32>
    %213 = arith.mulf %212, %211 : vector<512x128xf32>
    %214 = math.tanh %213 : vector<512x128xf32>
    %cst_132 = arith.constant 1.000000e+00 : f32
    %215 = vector.broadcast %cst_132 : f32 to vector<512x128xf32>
    %216 = arith.addf %215, %214 : vector<512x128xf32>
    %cst_133 = arith.constant 5.000000e-01 : f32
    %217 = vector.broadcast %cst_133 : f32 to vector<512x128xf32>
    %218 = arith.mulf %217, %216 : vector<512x128xf32>
    %219 = arith.mulf %206, %218 : vector<512x128xf32>
    %220 = arith.truncf %219 : vector<512x128xf32> to vector<512x128xbf16>
    %c0_134 = arith.constant 0 : index
    %c0_135 = arith.constant 0 : index
    %221 = vector.load %arg16[%c0_134, %c0_135] : memref<128x512xbf16, #tpu.memory_space<vmem>>, vector<128x512xbf16>
    %cst_136 = arith.constant dense<0.000000e+00> : vector<128x128xf32>
    %222 = tpu.matmul %221, %220, %cst_136 {dimension_numbers = #tpu.dot_dimension_numbers<[1], [0], [0], [1], [0, 0, 1, 1], [], []>} : vector<128x512xbf16>, vector<512x128xbf16>, vector<128x128xf32> -> vector<128x128xf32>
    %c0_137 = arith.constant 0 : index
    %c0_138 = arith.constant 0 : index
    %223 = vector.load %arg17[%c0_137, %c0_138] : memref<128x1xf32, #tpu.memory_space<vmem>>, vector<128x1xf32>
    %224 = vector.broadcast %223 : vector<128x1xf32> to vector<128x128xf32>
    %225 = arith.addf %222, %224 : vector<128x128xf32>
    %226 = arith.addf %225, %189 : vector<128x128xf32>
    %c0_139 = arith.constant 0 : index
    %c0_140 = arith.constant 0 : index
    %c0_141 = arith.constant 0 : index
    %227 = vector.load %arg18[%c0_139, %c0_140, %c0_141] : memref<1x128x128xf32, #tpu.memory_space<vmem>>, vector<1x128x128xf32>
    %228 = vector.shape_cast %227 : vector<1x128x128xf32> to vector<128x128xf32>
    %229 = vector.shape_cast %226 : vector<128x128xf32> to vector<1x128x128xf32>
    tpu.vector_store %arg18[%c0_139, %c0_140, %c0_141], %229 {strides = array<i32>} : memref<1x128x128xf32, #tpu.memory_space<vmem>>, vector<1x128x128xf32>,
    return
  }
  func.func @transform_0(%arg0: i32, %arg1: i32) -> (i32, i32, i32) {
    %c0_i32 = arith.constant 0 : i32
    %c0_i32_0 = arith.constant 0 : i32
    return %arg0, %c0_i32, %arg1 : i32, i32, i32
  }
  func.func @transform_1(%arg0: i32, %arg1: i32) -> (i32, i32, i32) {
    %c0_i32 = arith.constant 0 : i32
    %c0_i32_0 = arith.constant 0 : i32
    %c0_i32_1 = arith.constant 0 : i32
    return %arg0, %c0_i32, %c0_i32_0 : i32, i32, i32
  }
  func.func @transform_2(%arg0: i32, %arg1: i32) -> (i32, i32, i32) {
    %c0_i32 = arith.constant 0 : i32
    %c0_i32_0 = arith.constant 0 : i32
    %c0_i32_1 = arith.constant 0 : i32
    return %arg0, %c0_i32, %c0_i32_0 : i32, i32, i32
  }
  func.func @transform_3(%arg0: i32, %arg1: i32) -> (i32, i32, i32) {
    %c0_i32 = arith.constant 0 : i32
    %c0_i32_0 = arith.constant 0 : i32
    %c0_i32_1 = arith.constant 0 : i32
    return %arg0, %c0_i32, %c0_i32_0 : i32, i32, i32
  }
  func.func @transform_4(%arg0: i32, %arg1: i32) -> (i32, i32) {
    %c0_i32 = arith.constant 0 : i32
    %c0_i32_0 = arith.constant 0 : i32
    %c0_i32_1 = arith.constant 0 : i32
    return %c0_i32, %c0_i32_0 : i32, i32
  }
  func.func @transform_5(%arg0: i32, %arg1: i32) -> (i32, i32) {
    %c0_i32 = arith.constant 0 : i32
    %c0_i32_0 = arith.constant 0 : i32
    %c0_i32_1 = arith.constant 0 : i32
    return %c0_i32, %c0_i32_0 : i32, i32
  }
  func.func @transform_6(%arg0: i32, %arg1: i32) -> (i32, i32) {
    %c0_i32 = arith.constant 0 : i32
    %c0_i32_0 = arith.constant 0 : i32
    %c0_i32_1 = arith.constant 0 : i32
    return %c0_i32, %c0_i32_0 : i32, i32
  }
  func.func @transform_7(%arg0: i32, %arg1: i32) -> (i32, i32, i32) {
    %c0_i32 = arith.constant 0 : i32
    %c0_i32_0 = arith.constant 0 : i32
    %c0_i32_1 = arith.constant 0 : i32
    %c0_i32_2 = arith.constant 0 : i32
    return %c0_i32, %c0_i32_0, %c0_i32_1 : i32, i32, i32
  }
  func.func @transform_8(%arg0: i32, %arg1: i32) -> (i32, i32, i32) {
    %c0_i32 = arith.constant 0 : i32
    %c0_i32_0 = arith.constant 0 : i32
    %c0_i32_1 = arith.constant 0 : i32
    %c0_i32_2 = arith.constant 0 : i32
    return %c0_i32, %c0_i32_0, %c0_i32_1 : i32, i32, i32
  }
  func.func @transform_9(%arg0: i32, %arg1: i32) -> (i32, i32, i32) {
    %c0_i32 = arith.constant 0 : i32
    %c0_i32_0 = arith.constant 0 : i32
    %c0_i32_1 = arith.constant 0 : i32
    %c0_i32_2 = arith.constant 0 : i32
    return %c0_i32, %c0_i32_0, %c0_i32_1 : i32, i32, i32
  }
  func.func @transform_10(%arg0: i32, %arg1: i32) -> (i32, i32, i32) {
    %c0_i32 = arith.constant 0 : i32
    %c0_i32_0 = arith.constant 0 : i32
    %c0_i32_1 = arith.constant 0 : i32
    %c0_i32_2 = arith.constant 0 : i32
    return %c0_i32, %c0_i32_0, %c0_i32_1 : i32, i32, i32
  }
  func.func @transform_11(%arg0: i32, %arg1: i32) -> (i32, i32) {
    %c0_i32 = arith.constant 0 : i32
    %c0_i32_0 = arith.constant 0 : i32
    %c0_i32_1 = arith.constant 0 : i32
    return %c0_i32, %c0_i32_0 : i32, i32
  }
  func.func @transform_12(%arg0: i32, %arg1: i32) -> (i32, i32) {
    %c0_i32 = arith.constant 0 : i32
    %c0_i32_0 = arith.constant 0 : i32
    %c0_i32_1 = arith.constant 0 : i32
    return %c0_i32, %c0_i32_0 : i32, i32
  }
  func.func @transform_13(%arg0: i32, %arg1: i32) -> (i32, i32) {
    %c0_i32 = arith.constant 0 : i32
    %c0_i32_0 = arith.constant 0 : i32
    %c0_i32_1 = arith.constant 0 : i32
    return %c0_i32, %c0_i32_0 : i32, i32
  }
  func.func @transform_14(%arg0: i32, %arg1: i32) -> (i32, i32) {
    %c0_i32 = arith.constant 0 : i32
    %c0_i32_0 = arith.constant 0 : i32
    %c0_i32_1 = arith.constant 0 : i32
    return %c0_i32, %c0_i32_0 : i32, i32
  }
  func.func @transform_15(%arg0: i32, %arg1: i32) -> (i32, i32) {
    %c0_i32 = arith.constant 0 : i32
    %c0_i32_0 = arith.constant 0 : i32
    %c0_i32_1 = arith.constant 0 : i32
    return %c0_i32, %c0_i32_0 : i32, i32
  }
  func.func @transform_16(%arg0: i32, %arg1: i32) -> (i32, i32, i32) {
    %c0_i32 = arith.constant 0 : i32
    %c0_i32_0 = arith.constant 0 : i32
    return %arg0, %c0_i32, %arg1 : i32, i32, i32
  }
  func.func @transform_17(%arg0: i32, %arg1: i32) -> (i32, i32, i32, i32) {
    %c0_i32 = arith.constant 0 : i32
    %c0_i32_0 = arith.constant 0 : i32
    %c0_i32_1 = arith.constant 0 : i32
    return %arg0, %c0_i32, %c0_i32_0, %arg1 : i32, i32, i32, i32
  }
}

</mosaic_0001>

<bundles_post_ra>
// kernel: tpu_custom_call.1
= control target key start
LH: loop header
LB: loop body
LE: loop exit
PB: predicated region body
PF: predicated region fallthrough
CT: control target
= control target key end

     0   :  { %s10309_s0 = inlined_call_operand.vmem [shape: f32[2,128,256], index: 0, kind: input, shape index: {}]   ;;  %s10310_s1 = inlined_call_operand.vmem [shape: f32[2,16,128], index: 1, kind: input, shape index: {}]   ;;  %s10311_s2 = inlined_call_operand.vmem [shape: f32[2,128,16], index: 2, kind: input, shape index: {}]   ;;  %s10312_s3 = inlined_call_operand.vmem [shape: f32[2,16,1], index: 3, kind: input, shape index: {}]   ;;  %s10313_s4 = inlined_call_operand.vmem [shape: f32[128,1], index: 4, kind: input, shape index: {}]   ;;  %s10314_s5 = inlined_call_operand.vmem [shape: f32[1,128], index: 5, kind: input, shape index: {}]   ;;  %s10315_s6 = inlined_call_operand.vmem [shape: f32[128,1], index: 6, kind: input, shape index: {}]   ;;  %s10316_s7 = inlined_call_operand.vmem [shape: bf16[4,32,128], index: 7, kind: input, shape index: {}]   ;;  %s10317_s8 = inlined_call_operand.vmem [shape: bf16[4,128,32], index: 8, kind: input, shape index: {}]   ;;  %s10318_s9 = inlined_call_operand.vmem [shape: bf16[4,32,128], index: 9, kind: input, shape index: {}]   ;;  %s10319_s10 = inlined_call_operand.vmem [shape: bf16[4,128,32], index: 10, kind: input, shape index: {}]   ;;  %s10320_s11 = inlined_call_operand.vmem [shape: f32[128,1], index: 11, kind: input, shape index: {}]   ;;  %s10321_s12 = inlined_call_operand.vmem [shape: bf16[512,128], index: 12, kind: input, shape index: {}]   ;;  %s10322_s13 = inlined_call_operand.vmem [shape: f32[512,1], index: 13, kind: input, shape index: {}]   ;;  %s10323_s14 = inlined_call_operand.vmem [shape: bf16[128,512], index: 14, kind: input, shape index: {}]   ;;  %s10324_s15 = inlined_call_operand.vmem [shape: f32[128,1], index: 15, kind: input, shape index: {}]   ;;  %s10325_s16 = inlined_call_operand.hbm [shape: f32[2,128,256], index: 16, kind: output, shape index: {0}]   ;;  %s10326_s17 = inlined_call_operand.hbm [shape: f32[2,4,16,256], index: 17, kind: output, shape index: {1}]  }
   0x1   :  { %10363 = sst [smem:[#allocation55_spill]] %s10309_s0 }
   0x2   :  { %10364 = sst [smem:[#allocation56_spill]] %s10310_s1 }
   0x3   :  { %10365 = sst [smem:[#allocation57_spill]] %s10311_s2 }
   0x4   :  { %10366 = sst [smem:[#allocation58_spill]] %s10313_s4 }
   0x5   :  { %10367 = sst [smem:[#allocation59_spill]] %s10323_s14 }
   0x6   :  { %10368 = sst [smem:[#allocation60_spill]] %s10325_s16 }
   0x7   :  { %10369 = sst [smem:[#allocation61_spill]] %s10326_s17 }
   0x8   :  { %23 = vsyncpa [#allocation4], 0 }
   0x9   :  { %25 = vsyncpa [#allocation4 + $0x1], 0 }
   0xa   :  { %26 = vsyncpa [#allocation6], 0 }
   0xb   :  { %28 = vsyncpa [#allocation6 + $0x1], 0  ;;  %s7686_s24 = smov 0   ;;  %s7688_s25 = smov 0  }
   0xc   :  { %s7690_s26 = smov 0   ;;  %s7692_s27 = smov 0  }
   0xd   :  { %s7694_s28 = smov 0   ;;  %s7696_s29 = smov 0  }
   0xe   :  { %s7698_s0 = smov 0   ;;  %s7700_s30 = smov 0  }
   0xf LB: > { %10370 = sst [smem:[#allocation9_spill]] %s7558_s24  ;;  %s5834_s18 = sadd.s32 4294967295, %s7586_s30   ;;  %s7586_s30 = sphi %s7700_s30, %s34_s30   ;;  %s7582_s0 = sphi %s7698_s0, %s10476_s0   ;;  %s7578_s29 = sphi %s7696_s29, %s10475_s29   ;;  %s7574_s28 = sphi %s7694_s28, %s10474_s28   ;;  %s7570_s27 = sphi %s7692_s27, %s10480_s27   ;;  %s7566_s26 = sphi %s7690_s26, %s10479_s26   ;;  %s7562_s25 = sphi %s7688_s25, %s10478_s25   ;;  %s7558_s24 = sphi %s7686_s24, %s10477_s24  }
  0x10   : > { %10371 = sst [smem:[#allocation10_spill]] %s7570_s27  ;;  %s5835_s19 = sadd.s32 4294967294, %s7586_s30  }
  0x11   : > { %10372 = sst [smem:[#allocation11_spill]] %s7578_s29  ;;  %s43_s1 = sadd.s32 1, %s7578_s29 }
  0x12   : > { %10373 = sst [smem:[#allocation12_spill]] %s7582_s0  ;;  %p44_p0 = scmp.ge.s32.totalorder %s43_s1, 2 }
  0x13   : > { %s46_s20 = sadd.s32 1, %s7582_s0  ;;  %p62_p1 = scmp.ne.s32.totalorder %s7566_s26, %s7562_s25 }
  0x14   : > { %p63_p2 = scmp.eq.s32.totalorder %s7586_s30, 0  ;;  %s10482_s1 = smov (%p44_p0, %s43_s1), 0 }
  0x15   : > { %10374 = sst [smem:[#allocation13_spill]] %s10482_s1  ;;  %s10484_s20 = smov (!%p44_p0, %s46_s20), %s7582_s0 }
  0x16   : > { %s51_s21 = ssub.s32 %s7578_s29, %s10482_s1  ;;  %p7738_p3 = por %p63_p2, %p62_p1 }
  0x17   : > { %p48_p4 = scmp.ge.s32.totalorder %s10484_s20, 2  ;;  %p424_p5 = scmp.eq.s32.totalorder %s5834_s18, 3 }
  0x18   : > { %p429_p6 = scmp.ne.s32.totalorder %s7562_s25, %s7558_s24  ;;  %p430_p7 = scmp.eq.s32.totalorder %s5835_s19, 3 }
  0x19   : > { %s10486_s20 = smov (%p48_p4, %s10484_s20), 0  ;;  %p7746_p8 = por %p424_p5, %p62_p1 }
  0x1a   : > { %10376 = sst [smem:[#allocation14_spill]] %s10486_s20  ;;  %p7750_p9 = por %p430_p7, %p429_p6 }
  0x1b   : > { %s10377_s23 = scalar_select %p7746_p8, 1, 0 }
  0x1c   : > { %s10379_s16 = scalar_select %p7750_p9, 1, 0 }
  0x1d   : > { %10378 = sst [smem:[#allocation15_spill]] %s10377_s23  ;;  %s50_s1 = ssub.s32 %s7582_s0, %s10486_s20 }
  0x1e   : > { %10380 = sst [smem:[#allocation16_spill]] %s10379_s16  ;;  %s52_s17 = sor.u32 %s51_s21, %s50_s1 }
  0x1f   : > { %s55_s27 = sadd.s32 1, %s7566_s26  ;;  %p53_p10 = scmp.eq.s32.totalorder %s52_s17, 0 }
  0x20   : > { %p5837_p11 = scmp.ge.s32.totalorder %s7586_s30, 4 }
  0x21   : > { %s7758_s14 = scalar_select %p53_p10, %s7566_s26, %s55_s27  }
  0x22   : > { %510 = sbr.rel (%p5837_p11) target bundleno = 59 (0x3b), region = 64 }
  0x23   : > { %10381 = sst [smem:[#allocation17_spill]] %s7758_s14 }
  0x29   : > { %513 = sbr.rel (!%p7738_p3) target bundleno = 59 (0x3b), region = 68  ;;  %s515_s18 = sand.u32 (%p7738_p3), 1, %s7566_s26  }
  0x2a   : > { %s5839_s19 = sshll.u32 (%p7738_p3), %s7582_s0, 5  ;;  %s5838_s24 = sshll.u32 (%p7738_p3), %s515_s18, 7 }
  0x2b   : > { %s519_s23 = sadd.s32 (%p7738_p3), %s7578_s29, %s5839_s19  ;;  %s10382_s21 = sld [smem:[#allocation55_spill]] (%p7738_p3) }
  0x2c   : > { %s5840_s16 = sshll.u32 (%p7738_p3), %s519_s23, 3  ;;  %s517_s27 = scalar_lea.vmem (%p7738_p3), [#allocation2], %s5838_s24 }
  0x31   : > { %s7769_s17 = scalar_lea.vmem %s10382_s21, %s5840_s16 }
  0x32   : > { %v579_v0 = vld [vmem:[%s7769_s17] sm:$0xff]  ;;  %v581_v1 = vld [vmem:[%s7769_s17 + $0x10] sm:$0xff] }
  0x33   : > { %v583_v2 = vld [vmem:[%s7769_s17 + $0x20] sm:$0xff]  ;;  %580 = vst [vmem:[%s517_s27] sm:$0xff] %v579_v0  ;;  %582 = vst [vmem:[%s517_s27 + $0x8] sm:$0xff] %v581_v1  ;;  %v585_v3 = vld [vmem:[%s7769_s17 + $0x30] sm:$0xff] }
  0x34   : > { %584 = vst [vmem:[%s517_s27 + $0x10] sm:$0xff] %v583_v2  ;;  %v587_v4 = vld [vmem:[%s7769_s17 + $0x40] sm:$0xff]  ;;  %v589_v5 = vld [vmem:[%s7769_s17 + $0x50] sm:$0xff]  ;;  %586 = vst [vmem:[%s517_s27 + $0x18] sm:$0xff] %v585_v3 }
  0x35   : > { %588 = vst [vmem:[%s517_s27 + $0x20] sm:$0xff] %v587_v4  ;;  %590 = vst [vmem:[%s517_s27 + $0x28] sm:$0xff] %v589_v5  ;;  %v591_v6 = vld [vmem:[%s7769_s17 + $0x60] sm:$0xff]  ;;  %v593_v7 = vld [vmem:[%s7769_s17 + $0x70] sm:$0xff] }
  0x36   : > { %v595_v8 = vld [vmem:[%s7769_s17 + $0x80] sm:$0xff]  ;;  %592 = vst [vmem:[%s517_s27 + $0x30] sm:$0xff] %v591_v6  ;;  %594 = vst [vmem:[%s517_s27 + $0x38] sm:$0xff] %v593_v7  ;;  %v597_v9 = vld [vmem:[%s7769_s17 + $0x90] sm:$0xff] }
  0x37   : > { %596 = vst [vmem:[%s517_s27 + $0x40] sm:$0xff] %v595_v8  ;;  %v599_v10 = vld [vmem:[%s7769_s17 + $0xa0] sm:$0xff]  ;;  %v601_v11 = vld [vmem:[%s7769_s17 + $0xb0] sm:$0xff]  ;;  %598 = vst [vmem:[%s517_s27 + $0x48] sm:$0xff] %v597_v9 }
  0x38   : > { %600 = vst [vmem:[%s517_s27 + $0x50] sm:$0xff] %v599_v10  ;;  %602 = vst [vmem:[%s517_s27 + $0x58] sm:$0xff] %v601_v11  ;;  %v603_v12 = vld [vmem:[%s7769_s17 + $0xc0] sm:$0xff]  ;;  %v605_v13 = vld [vmem:[%s7769_s17 + $0xd0] sm:$0xff] }
  0x39   : > { %v607_v14 = vld [vmem:[%s7769_s17 + $0xe0] sm:$0xff]  ;;  %604 = vst [vmem:[%s517_s27 + $0x60] sm:$0xff] %v603_v12  ;;  %606 = vst [vmem:[%s517_s27 + $0x68] sm:$0xff] %v605_v13  ;;  %v609_v15 = vld [vmem:[%s7769_s17 + $0xf0] sm:$0xff] }
  0x3a   : > { %608 = vst [vmem:[%s517_s27 + $0x70] sm:$0xff] %v607_v14  ;;  %610 = vst [vmem:[%s517_s27 + $0x78] sm:$0xff] %v609_v15 }
  0x3b PF: > { %p5841_p12 = scmp.ge.s32.totalorder %s7586_s30, 1  ;;  %p639_p13 = scmp.lt.s32.totalorder %s7586_s30, 5 }
  0x3d   : > { %p640_p0 = pnand %p5841_p12, %p639_p13 }
  0x3f   : > { %643 = sbr.rel (%p640_p0) target bundleno = 3821 (0xeed), region = 118 }
  0x46   : > { %s10383_s4 = sld [smem:[#allocation58_spill]]  ;;  %p717_p1 = scmp.lt.s32.totalorder %s7574_s28, 1  ;;  %v7588_v17 = vmov 0   ;;  %v7589_v38 = vmov 0.0   ;;  %v7113_v41 = vld [vmem:[%s10317_s8] sm:$0xff]   ;;  %v7114_v46 = vld [vmem:[%s10317_s8 + $0x8] sm:$0xff]  }
  0x47   : > { %7111 = vset.pattern.permute.xlu0 %v7588_v17  ;;  %7112 = vset.pattern.permute.xlu1 %v7588_v17  ;;  %s10384_s21 = sld [smem:[#allocation56_spill]]  ;;  %s7809_s27 = sand.u32 1, %s7562_s25   ;;  %v7115_v51 = vld [vmem:[%s10317_s8 + $0x10] sm:$0xff]   ;;  %v7116_v57 = vld [vmem:[%s10317_s8 + $0x18] sm:$0xff]   ;;  %v1037_v59 = vld [vmem:[%s10315_s6 + $0x8] sm:$0xff]  ;;  %vm7590_vm0 = vmmov 0  }
  0x48   : > { %s7794_s20 = scalar_select %p717_p1, %s7574_s28, 1  ;;  %6545 = vmatprep.subr.bf16.mxu1 %v7589_v38  ;;  %v7117_v62 = vld [vmem:[%s10317_s8 + $0x20] sm:$0xff]   ;;  %v1039_v1 = vld [vmem:[%s10315_s6 + $0x18] sm:$0xff]  ;;  %v7118_v4 = vld [vmem:[%s10317_s8 + $0x28] sm:$0xff]   ;;  %6561 = vmatprep.mubr.msk.bf16.mxu1 %vm7590_vm0, %v7589_v38  ;;  %vm980_vm1 = vcmask 130048   ;;  %vm1410_vm2 = vcmask 261120  }
  0x49   : > { %s10337_s16 = sshll.u32 %s7809_s27, 7  ;;  %6546 = vmatpush3.bf16.msra.mxu1 %v7113_v41  ;;  %v1041_v7 = vld [vmem:[%s10315_s6 + $0x28] sm:$0xff]  ;;  %v7119_v10 = vld [vmem:[%s10317_s8 + $0x30] sm:$0xff]   ;;  %v1043_v13 = vld [vmem:[%s10315_s6 + $0x38] sm:$0xff]  ;;  %s10386_s2 = sld [smem:[#allocation57_spill]] }
  0x4a   : > { %s10338_s18 = sshll.u32 %s7794_s20, 4  ;;  %s7814_s24 = scalar_lea.vmem [#allocation2], %s10337_s16  ;;  %6547 = vmatprep.subr.bf16.mxu1 %v7589_v38  ;;  %v7121_v41 = vld [vmem:[%s10316_s7] sm:$0xff]  }
  0x4b   : > { %v7817_v21 = vld [vmem:[%s7814_s24] sm:$0xff]  ;;  %v7820_v22 = vld [vmem:[%s7814_s24 + $0x8] sm:$0xff]  ;;  %v735_v26 = vld [vmem:[%s7814_s24 + $0x10] sm:$0xff]  ;;  %s6175_s0 = sshll.u32 %s7794_s20, 7  ;;  %6541 = vmatprep.mubr.bf16.mxu0 %v7121_v41  ;;  %s6170_s14 = sshll.u32 %s7574_s28, 4 }
  0x4c   : > { %v822_v16 = vld [vmem:[%s10383_s4] sm:$0xff]  ;;  %v823_v18 = vld [vmem:[%s10383_s4 + $0x8] sm:$0xff]  ;;  %v824_v23 = vld [vmem:[%s10383_s4 + $0x10] sm:$0xff]  ;;  %v767_v24 = vmul.f32 %v7817_v21, %v7817_v21  ;;  %v768_v25 = vmul.f32 %v7820_v22, %v7820_v22  ;;  %v769_v28 = vmul.f32 %v735_v26, %v735_v26  ;;  %s10448_s19 = sld [smem:[#allocation61_spill]] }
  0x4d   : > { %840 = vperm.xlu0 %7111, %v822_v16   ;;  %s7805_s17 = scalar_lea.vmem %s10384_s21, %s10338_s18  ;;  %v825_v27 = vld [vmem:[%s10383_s4 + $0x18] sm:$0xff]  ;;  %v827_v32 = vld [vmem:[%s10383_s4 + $0x28] sm:$0xff]  ;;  %v737_v36 = vld [vmem:[%s7814_s24 + $0x20] sm:$0xff]  ;;  %6548 = vmatpush3.bf16.msra.mxu1 %v7114_v46  ;;  %s10385_s21 = sshll.u32 %s7794_s20, 4 }
  0x4e   : > { %v750_v19 = vld [vmem:[%s7805_s17 + $0x8] sm:$0xff]  ;;  %v783_v29 = vadd.f32 %v768_v25, %v767_v24  ;;  %v749_v30 = vld [vmem:[%s7805_s17] sm:$0xff]  ;;  %v736_v31 = vld [vmem:[%s7814_s24 + $0x18] sm:$0xff]  ;;  %v771_v39 = vmul.f32 %v737_v36, %v737_v36  ;;  %6549 = vmatprep.subr.bf16.mxu1 %v7589_v38  ;;  %s7981_s29 = scalar_lea.vmem %s10312_s3, %s10385_s21  ;;  %s7591_s21 = smov [#allocation5]  }
  0x4f   : > { %v943_v20 = vmul.f32 %v750_v19, %v750_v19  ;;  %v942_v33 = vmul.f32 %v749_v30, %v749_v30  ;;  %v770_v34 = vmul.f32 %v736_v31, %v736_v31  ;;  %v829_v37 = vld [vmem:[%s10383_s4 + $0x38] sm:$0xff]  ;;  %v738_v42 = vld [vmem:[%s7814_s24 + $0x28] sm:$0xff]  ;;  %v739_v47 = vld [vmem:[%s7814_s24 + $0x30] sm:$0xff]  ;;  %s7994_s1 = scalar_lea.vmem %s10386_s2, %s6175_s0  ;;  %s5844_s0 = sshll.u32 %s7809_s27, 6 }
  0x50   : > { %v784_v35 = vadd.f32 %v783_v29, %v769_v28  ;;  %v831_v43 = vld [vmem:[%s10383_s4 + $0x48] sm:$0xff]  ;;  %v772_v44 = vmul.f32 %v738_v42, %v738_v42  ;;  %v833_v48 = vld [vmem:[%s10383_s4 + $0x58] sm:$0xff]  ;;  %v773_v49 = vmul.f32 %v739_v47, %v739_v47  ;;  %v741_v58 = vld [vmem:[%s7814_s24 + $0x40] sm:$0xff]  ;;  %s8617_s18 = scalar_lea.vmem [#allocation5], %s5844_s0  ;;  %s10446_s0 = sld [smem:[#allocation10_spill]] }
  0x51   : > { %845 = vperm.xlu0 %7111, %v823_v18   ;;  %946 = vadd.xlane.f32.xlu1 %v943_v20  ;;  %v740_v52 = vld [vmem:[%s7814_s24 + $0x38] sm:$0xff]  ;;  %v835_v53 = vld [vmem:[%s10383_s4 + $0x68] sm:$0xff]  ;;  %v775_v60 = vmul.f32 %v741_v58, %v741_v58  ;;  %v826_v0 = vld [vmem:[%s10383_s4 + $0x20] sm:$0xff]  ;;  %s5681_s20 = sshll.u32 %s8617_s18, 4  ;;  %s10133_s20 = int_to_ptr.vmem [resolvable:$true] %s5681_s20 }
  0x52   : > { %v785_v40 = vadd.f32 %v784_v35, %v770_v34  ;;  %6550 = vmatpush3.bf16.msra.mxu1 %v7115_v51  ;;  %v837_v54 = vld [vmem:[%s10383_s4 + $0x78] sm:$0xff]  ;;  %v774_v55 = vmul.f32 %v740_v52, %v740_v52  ;;  %v7882_v63 = vld [vmem:[%s7814_s24 + $0x48] sm:$0xff]  ;;  %v828_v5 = vld [vmem:[%s10383_s4 + $0x30] sm:$0xff] }
  0x53   : > { %6551 = vmatprep.subr.bf16.mxu1 %v7589_v38  ;;  %v776_v2 = vmul.f32 %v7882_v63, %v7882_v63  ;;  %v7900_v6 = vld [vmem:[%s7814_s24 + $0x50] sm:$0xff]  ;;  %v830_v11 = vld [vmem:[%s10383_s4 + $0x40] sm:$0xff]  ;;  %v7915_v12 = vld [vmem:[%s7814_s24 + $0x58] sm:$0xff] }
  0x54   : > { %v786_v45 = vadd.f32 %v785_v40, %v771_v39  ;;  %v777_v8 = vmul.f32 %v7900_v6, %v7900_v6  ;;  %v778_v14 = vmul.f32 %v7915_v12, %v7915_v12  ;;  %v7120_v16 = vld [vmem:[%s10317_s8 + $0x38] sm:$0xff]   ;;  %v832_v17 = vld [vmem:[%s10383_s4 + $0x50] sm:$0xff]  ;;  %v7930_v18 = vld [vmem:[%s7814_s24 + $0x60] sm:$0xff] }
  0x55   : > { %v1045_v19 = vld [vmem:[%s10315_s6 + $0x48] sm:$0xff]  ;;  %v779_v20 = vmul.f32 %v7930_v18, %v7930_v18  ;;  %v834_v24 = vld [vmem:[%s10383_s4 + $0x60] sm:$0xff]  ;;  %v1047_v26 = vld [vmem:[%s10315_s6 + $0x58] sm:$0xff] }
  0x56   : > { %v787_v50 = vadd.f32 %v786_v45, %v772_v44  ;;  %6552 = vmatpush3.bf16.msra.mxu1 %v7116_v57  ;;  %v7944_v25 = vld [vmem:[%s7814_s24 + $0x68] sm:$0xff]  ;;  %v836_v29 = vld [vmem:[%s10383_s4 + $0x70] sm:$0xff]  ;;  %v7963_v34 = vld [vmem:[%s7814_s24 + $0x78] sm:$0xff]  ;;  %s10403_s4 = sld [smem:[#allocation59_spill]] }
  0x57   : > { %6553 = vmatprep.subr.bf16.mxu1 %v7589_v38  ;;  %v7955_v30 = vld [vmem:[%s7814_s24 + $0x70] sm:$0xff]  ;;  %v1049_v31 = vld [vmem:[%s10315_s6 + $0x68] sm:$0xff]  ;;  %v1036_v35 = vld [vmem:[%s10315_s6] sm:$0xff] }
  0x58   : > { %v788_v56 = vadd.f32 %v787_v50, %v773_v49  ;;  %v1051_v36 = vld [vmem:[%s10315_s6 + $0x78] sm:$0xff]  ;;  %v1038_v40 = vld [vmem:[%s10315_s6 + $0x10] sm:$0xff]  ;;  %v1157_v42 = vld [vmem:[%s7981_s29 + $0x8] sm:$0xff] }
  0x59   : > { %v1040_v44 = vld [vmem:[%s10315_s6 + $0x20] sm:$0xff]  ;;  %v3474_v45 = vld [vmem:[%s10320_s11 + $0x8] sm:$0xff]  ;;  %v1042_v47 = vld [vmem:[%s10315_s6 + $0x30] sm:$0xff] }
  0x5a   : > { %v789_v61 = vadd.f32 %v788_v56, %v774_v55  ;;  %6554 = vmatpush3.bf16.msra.mxu1 %v7117_v62  ;;  %v3476_v49 = vld [vmem:[%s10320_s11 + $0x18] sm:$0xff]  ;;  %v8009_v51 = vld [vmem:[%s7994_s1 + $0x8] sm:$0xff]  ;;  %v1044_v52 = vld [vmem:[%s10315_s6 + $0x40] sm:$0xff] }
  0x5b   : > { %6555 = vmatprep.subr.bf16.mxu1 %v7589_v38  ;;  %v8018_v55 = vld [vmem:[%s7994_s1 + $0x10] sm:$0xff]  ;;  %v965_v57 = vmul.f32 %v8009_v51, %v8009_v51  ;;  %v3477_v41 = vld [vmem:[%s10320_s11 + $0x20] sm:$0xff] }
  0x5c   : > { %v790_v3 = vadd.f32 %v789_v61, %v775_v60  ;;  %v1046_v58 = vld [vmem:[%s10315_s6 + $0x50] sm:$0xff]  ;;  %v3480_v60 = vld [vmem:[%s10320_s11 + $0x38] sm:$0xff]  ;;  %v966_v62 = vmul.f32 %v8018_v55, %v8018_v55 }
  0x5e   : > { %6556 = vmatpush3.bf16.msra.mxu1 %v7118_v4  ;;  %v791_v9 = vadd.f32 %v790_v3, %v776_v2  ;;  %v1048_v2 = vld [vmem:[%s10315_s6 + $0x60] sm:$0xff]  ;;  %v3482_v4 = vld [vmem:[%s10320_s11 + $0x48] sm:$0xff] }
  0x5f   : > { %6557 = vmatprep.subr.bf16.mxu1 %v7589_v38  ;;  %v8041_v3 = vld [vmem:[%s7994_s1 + $0x20] sm:$0xff] }
  0x60   : > { %v792_v15 = vadd.f32 %v791_v9, %v777_v8  ;;  %v984_v9 = vsel %vm980_vm1, %v966_v62, 0.0 }
  0x62   : > { %850 = vperm.xlu1 %7112, %v824_v23   ;;  %6558 = vmatpush3.bf16.msra.mxu1 %v7119_v10  ;;  %v793_v23 = vadd.f32 %v792_v15, %v778_v14  ;;  %v1050_v10 = vld [vmem:[%s10315_s6 + $0x70] sm:$0xff] }
  0x63   : > { %6559 = vmatprep.subr.bf16.mxu1 %v7589_v38 }
  0x64   : > { %v794_v28 = vadd.f32 %v793_v23, %v779_v20  ;;  %v3486_v23 = vld [vmem:[%s10320_s11 + $0x68] sm:$0xff] }
  0x66   : > { %855 = vperm.xlu1 %7112, %v825_v27   ;;  %6560 = vmatpush3.bf16.msra.mxu1 %v7120_v16  ;;  %v780_v27 = vmul.f32 %v7944_v25, %v7944_v25 }
  0x67   : > { %6585 = vmatprep.subr.bf16.mxu1 %v7589_v38 }
  0x6a   : > { %865 = vperm.xlu1 %7112, %v827_v32   ;;  %v781_v32 = vmul.f32 %v7955_v30, %v7955_v30 }
  0x6e   : > { %875 = vperm.xlu1 %7112, %v829_v37   ;;  %v782_v37 = vmul.f32 %v7963_v34, %v7963_v34 }
  0x70   : > { %944 = vadd.xlane.f32.xlu0 %v942_v33  ;;  %v795_v33 = vadd.f32 %v794_v28, %v780_v27  ;;  %v3473_v27 = vld [vmem:[%s10320_s11] sm:$0xff] }
  0x72   : > { %885 = vperm.xlu1 %7112, %v831_v43   ;;  %v796_v39 = vadd.f32 %v795_v33, %v781_v32  ;;  %v3488_v32 = vld [vmem:[%s10320_s11 + $0x78] sm:$0xff] }
  0x74   : > { %v797_v43 = vadd.f32 %v796_v39, %v782_v37  ;;  %v8084_v37 = vld [vmem:[%s7994_s1 + $0x38] sm:$0xff]  ;;  %v3674_v39 = vld [vmem:[%s10322_s13 + $0x88] sm:$0xff] }
  0x76   : > { %895 = vperm.xlu1 %7112, %v833_v48   ;;  %v798_v46 = vrot.slane %v797_v43, 4  ;;  %v8003_v48 = vld [vmem:[%s7994_s1] sm:$0xff] }
  0x77   : > { %v964_v56 = vmul.f32 %v8003_v48, %v8003_v48 }
  0x78   : > { %v799_v50 = vadd.f32 %v798_v46, %v797_v43 }
  0x7a   : > { %905 = vperm.xlu1 %7112, %v835_v53   ;;  %v3478_v53 = vld [vmem:[%s10320_s11 + $0x28] sm:$0xff] }
  0x7e   : > { %915 = vperm.xlu1 %7112, %v837_v54   ;;  %v800_v54 = vrot.slane %v799_v50, 2 }
  0x80   : > { %v801_v61 = vadd.f32 %v800_v54, %v799_v50 }
  0x82   : > { %1059 = vperm.xlu1 %7112, %v1037_v59   ;;  %v8028_v59 = vld [vmem:[%s7994_s1 + $0x18] sm:$0xff] }
  0x86   : > { %860 = vperm.xlu0 %7111, %v826_v0   ;;  %1069 = vperm.xlu1 %7112, %v1039_v1   ;;  %v981_v0 = vsel %vm980_vm1, %v964_v56, 0.0  ;;  %v982_v1 = vsel %vm980_vm1, %v965_v57, 0.0  ;;  %v3676_v56 = vld [vmem:[%s10322_s13 + $0x98] sm:$0xff] }
  0x87   : > { %v983_v8 = vadd.f32 %v982_v1, %v981_v0  ;;  %v8126_v1 = vld [vmem:[%s7994_s1 + $0x50] sm:$0xff] }
  0x89   : > { %v985_v15 = vadd.f32 %v984_v9, %v983_v8  ;;  %v974_v8 = vmul.f32 %v8126_v1, %v8126_v1 }
  0x8a   : > { %870 = vperm.xlu0 %7111, %v828_v5   ;;  %1079 = vperm.xlu1 %7112, %v1041_v7   ;;  %v802_v5 = vrot.slane %v801_v61, 1  ;;  %v967_v7 = vmul.f32 %v8028_v59, %v8028_v59 }
  0x8c   : > { %v803_v14 = vadd.f32 %v802_v5, %v801_v61  ;;  %v986_v16 = vsel %vm980_vm1, %v967_v7, 0.0  ;;  %v3481_v61 = vld [vmem:[%s10320_s11 + $0x40] sm:$0xff]  ;;  %v3483_v7 = vld [vmem:[%s10320_s11 + $0x50] sm:$0xff] }
  0x8e   : > { %880 = vperm.xlu0 %7111, %v830_v11   ;;  %1089 = vperm.xlu1 %7112, %v1043_v13   ;;  %v968_v11 = vmul.f32 %v8041_v3, %v8041_v3  ;;  %v3484_v13 = vld [vmem:[%s10320_s11 + $0x58] sm:$0xff] }
  0x90   : > { %v988_v20 = vsel %vm980_vm1, %v968_v11, 0.0 }
  0x92   : > { %890 = vperm.xlu0 %7111, %v832_v17   ;;  %1099 = vperm.xlu1 %7112, %v1045_v19   ;;  %v1156_v17 = vld [vmem:[%s7981_s29] sm:$0xff]  ;;  %v8060_v19 = vld [vmem:[%s7994_s1 + $0x28] sm:$0xff] }
  0x93   : > { %v969_v28 = vmul.f32 %v8060_v19, %v8060_v19 }
  0x96   : > { %900 = vperm.xlu0 %7111, %v834_v24   ;;  %1109 = vperm.xlu1 %7112, %v1047_v26   ;;  %v804_v24 = vmax.f32 %v803_v14, 1e-24  ;;  %v987_v26 = vadd.f32 %v986_v16, %v985_v15  ;;  %v3485_v15 = vld [vmem:[%s10320_s11 + $0x60] sm:$0xff] }
  0x98   : > { %7273 = vrsqrt.f32 %v804_v24  ;;  %v3662_v24 = vld [vmem:[%s10322_s13 + $0x28] sm:$0xff] }
  0x9a   : > { %910 = vperm.xlu0 %7111, %v836_v29   ;;  %1119 = vperm.xlu1 %7112, %v1049_v31   ;;  %v8072_v29 = vld [vmem:[%s7994_s1 + $0x30] sm:$0xff]  ;;  %v989_v31 = vadd.f32 %v988_v20, %v987_v26  ;;  %v8154_v20 = vld [vmem:[%s7994_s1 + $0x60] sm:$0xff] }
  0x9b   : > { %v970_v33 = vmul.f32 %v8072_v29, %v8072_v29  ;;  %v976_v26 = vmul.f32 %v8154_v20, %v8154_v20 }
  0x9d   : > { %v992_v43 = vsel %vm980_vm1, %v970_v33, 0.0 }
  0x9e   : > { %1054 = vperm.xlu0 %7111, %v1036_v35   ;;  %1129 = vperm.xlu1 %7112, %v1051_v36   ;;  %v990_v35 = vsel %vm980_vm1, %v969_v28, 0.0  ;;  %v3475_v36 = vld [vmem:[%s10320_s11 + $0x10] sm:$0xff]  ;;  %v8163_v28 = vld [vmem:[%s7994_s1 + $0x68] sm:$0xff] }
  0x9f   : > { %v977_v33 = vmul.f32 %v8163_v28, %v8163_v28 }
  0xa2   : > { %1064 = vperm.xlu0 %7111, %v1038_v40   ;;  %1165 = vperm.xlu1 %7112, %v1157_v42   ;;  %v991_v40 = vadd.f32 %v990_v35, %v989_v31  ;;  %v971_v42 = vmul.f32 %v8084_v37, %v8084_v37  ;;  %v3487_v31 = vld [vmem:[%s10320_s11 + $0x70] sm:$0xff]  ;;  %v1004_v35 = vsel %vm980_vm1, %v976_v26, 0.0  ;;  %v3668_v26 = vld [vmem:[%s10322_s13 + $0x58] sm:$0xff] }
  0xa4   : > { %v993_v46 = vadd.f32 %v992_v43, %v991_v40  ;;  %v994_v50 = vsel %vm980_vm1, %v971_v42, 0.0  ;;  %v3673_v40 = vld [vmem:[%s10322_s13 + $0x80] sm:$0xff] }
  0xa6   : > { %1074 = vperm.xlu0 %7111, %v1040_v44   ;;  %3496 = vperm.xlu1 %7112, %v3474_v45   ;;  %v8096_v44 = vld [vmem:[%s7994_s1 + $0x40] sm:$0xff]  ;;  %v3658_v45 = vld [vmem:[%s10322_s13 + $0x8] sm:$0xff]  ;;  %v995_v57 = vadd.f32 %v994_v50, %v993_v46  ;;  %v3664_v46 = vld [vmem:[%s10322_s13 + $0x38] sm:$0xff] }
  0xa7   : > { %v7435_v50 = vld [vmem:[%s7814_s24 + $0x10] sm:$0xff] }
  0xaa   : > { %1084 = vperm.xlu0 %7111, %v1042_v47   ;;  %3506 = vperm.xlu1 %7112, %v3476_v49   ;;  %v3479_v47 = vld [vmem:[%s10320_s11 + $0x30] sm:$0xff]  ;;  %v972_v49 = vmul.f32 %v8096_v44, %v8096_v44 }
  0xac   : > { %v996_v0 = vsel %vm980_vm1, %v972_v49, 0.0  ;;  %v3657_v49 = vld [vmem:[%s10322_s13] sm:$0xff] }
  0xae   : > { %1094 = vperm.xlu0 %7111, %v1044_v52   ;;  %3516 = vperm.xlu1 %7112, %v3478_v53   ;;  %v8107_v52 = vpop.eup %7273  ;;  %v8110_v53 = vld [vmem:[%s7994_s1 + $0x48] sm:$0xff] }
  0xaf   : > { %v973_v62 = vmul.f32 %v8110_v53, %v8110_v53 }
  0xb1   : > { %v998_v9 = vsel %vm980_vm1, %v973_v62, 0.0  ;;  %v7436_v62 = vld [vmem:[%s7814_s24 + $0x18] sm:$0xff] }
  0xb2   : > { %1104 = vperm.xlu0 %7111, %v1046_v58   ;;  %3526 = vperm.xlu1 %7112, %v3480_v60   ;;  %v806_v58 = vmul.f32 %v8107_v52, %v7817_v21  ;;  %v807_v60 = vmul.f32 %v8107_v52, %v7820_v22  ;;  %v3660_v21 = vld [vmem:[%s10322_s13 + $0x18] sm:$0xff] }
  0xb6   : > { %1114 = vperm.xlu0 %7111, %v1048_v2   ;;  %3536 = vperm.xlu1 %7112, %v3482_v4   ;;  %v997_v4 = vadd.f32 %v996_v0, %v995_v57  ;;  %v809_v0 = vmul.f32 %v7436_v62, %v8107_v52  ;;  %v7438_v62 = vld [vmem:[%s7814_s24 + $0x20] sm:$0xff] }
  0xb8   : > { %v999_v14 = vadd.f32 %v998_v9, %v997_v4  ;;  %v3659_v9 = vld [vmem:[%s10322_s13 + $0x10] sm:$0xff] }
  0xba   : > { %1124 = vperm.xlu0 %7111, %v1050_v10   ;;  %3546 = vperm.xlu1 %7112, %v3484_v13   ;;  %v8138_v10 = vld [vmem:[%s7994_s1 + $0x58] sm:$0xff]  ;;  %v3678_v13 = vld [vmem:[%s10322_s13 + $0xa8] sm:$0xff] }
  0xbb   : > { %v975_v16 = vmul.f32 %v8138_v10, %v8138_v10 }
  0xbe   : > { %1160 = vperm.xlu0 %7111, %v1156_v17   ;;  %3556 = vperm.xlu1 %7112, %v3486_v23   ;;  %v1000_v17 = vsel %vm980_vm1, %v974_v8, 0.0  ;;  %v3666_v8 = vld [vmem:[%s10322_s13 + $0x48] sm:$0xff] }
  0xbf   : > { %v1001_v23 = vadd.f32 %v1000_v17, %v999_v14  ;;  %v3677_v17 = vld [vmem:[%s10322_s13 + $0xa0] sm:$0xff] }
  0xc2   : > { %3491 = vperm.xlu0 %7111, %v3473_v27   ;;  %3566 = vperm.xlu1 %7112, %v3488_v32   ;;  %v1002_v27 = vsel %vm980_vm1, %v975_v16, 0.0  ;;  %v3684_v16 = vld [vmem:[%s10322_s13 + $0xd8] sm:$0xff] }
  0xc3   : > { %v1003_v32 = vadd.f32 %v1002_v27, %v1001_v23  ;;  %v3661_v27 = vld [vmem:[%s10322_s13 + $0x20] sm:$0xff] }
  0xc6   : > { %3501 = vperm.xlu0 %7111, %v3475_v36   ;;  %3808 = vperm.xlu1 %7112, %v3674_v39   ;;  %v3680_v36 = vld [vmem:[%s10322_s13 + $0xb8] sm:$0xff]  ;;  %v8175_v39 = vld [vmem:[%s7994_s1 + $0x70] sm:$0xff] }
  0xc7   : > { %v978_v43 = vmul.f32 %v8175_v39, %v8175_v39 }
  0xca   : > { %3511 = vperm.xlu0 %7111, %v3477_v41   ;;  %3728 = vperm.xlu1 %7112, %v3658_v45   ;;  %v1005_v41 = vadd.f32 %v1004_v35, %v1003_v32  ;;  %v1006_v45 = vsel %vm980_vm1, %v977_v33, 0.0  ;;  %v3686_v33 = vld [vmem:[%s10322_s13 + $0xe8] sm:$0xff]  ;;  %v3679_v35 = vld [vmem:[%s10322_s13 + $0xb0] sm:$0xff] }
  0xcc   : > { %v841_v54 = vpop.permute.xlu0 %840 }
  0xcd   : > { %v918_v22 = vmul.f32 %v841_v54, %v806_v58  ;;  %v808_v54 = vmul.f32 %v7435_v50, %v8107_v52  ;;  %v3688_v50 = vld [vmem:[%s10322_s13 + $0xf8] sm:$0xff] }
  0xce   : > { %3521 = vperm.xlu0 %7111, %v3479_v47   ;;  %3818 = vperm.xlu1 %7112, %v3676_v56   ;;  %v8187_v47 = vld [vmem:[%s7994_s1 + $0x78] sm:$0xff]  ;;  %v1007_v56 = vadd.f32 %v1006_v45, %v1005_v41  ;;  %v3670_v41 = vld [vmem:[%s10322_s13 + $0x68] sm:$0xff]  ;;  %v3663_v45 = vld [vmem:[%s10322_s13 + $0x30] sm:$0xff]  ;;  %s7460_s1 = scalar_lea.vmem %s10133_s20, 1024 }
  0xcf   : > { %v979_v58 = vmul.f32 %v8187_v47, %v8187_v47  ;;  %p7461_p2 = scmp.ne.s32.totalorder %s10133_s20, %s7460_s1 }
  0xd0   : > { %v846_v2 = vpop.permute.xlu0 %845 }
  0xd1   : > { %v919_v5 = vmul.f32 %v846_v2, %v807_v60  ;;  %v1008_v60 = vsel %vm980_vm1, %v978_v43, 0.0  ;;  %v3675_v2 = vld [vmem:[%s10322_s13 + $0x90] sm:$0xff]  ;;  %p7462_p3 = pnand %p7461_p2, %p7746_p8 }
  0xd2   : > { %3531 = vperm.xlu0 %7111, %v3481_v61   ;;  %3738 = vperm.xlu1 %7112, %v3660_v21   ;;  %v3682_v61 = vld [vmem:[%s10322_s13 + $0xc8] sm:$0xff]  ;;  %v1009_v4 = vadd.f32 %v1008_v60, %v1007_v56 }
  0xd3   : > { %v8140_v11 = vpack.c.bf16 %v919_v5, %v918_v22  ;;  %v1010_v5 = vsel %vm980_vm1, %v979_v58, 0.0  ;;  %v7437_v58 = vld [vmem:[%s7814_s24 + $0x28] sm:$0xff]  ;;  %p7463_p4 = pneg %p7462_p3 }
  0xd4   : > { %v1011_v14 = vadd.f32 %v1010_v5, %v1009_v4  ;;  %v811_v60 = vmul.f32 %v7437_v58, %v8107_v52  ;;  %v817_v58 = vmul.f32 %v8107_v52, %v7915_v12 }
  0xd5   : > { %6525 = vmatprep.subr.bf16.mxu0 %v8140_v11 }
  0xd6   : > { %3541 = vperm.xlu0 %7111, %v3483_v7   ;;  %6526 = vmatpush3.bf16.msra.mxu0 %v8140_v11  ;;  %v1012_v23 = vrot.slane %v1011_v14, 4 }
  0xd7   : > { %3828 = vperm.xlu1 %7112, %v3678_v13  }
  0xda   : > { %3551 = vperm.xlu0 %7111, %v3485_v15  }
  0xdb   : > { %3748 = vperm.xlu1 %7112, %v3662_v24  }
  0xde   : > { %3561 = vperm.xlu0 %7111, %v3487_v31   ;;  %v947_v42 = vpop.xlane.xlu1 %946  ;;  %v1013_v31 = vadd.f32 %v1012_v23, %v1011_v14  ;;  %v3706_v14 = vld [vmem:[%s10322_s13 + $0x188] sm:$0xff] }
  0xdf   : > { %3838 = vperm.xlu1 %7112, %v3680_v36   ;;  %v949_v36 = vmax.f32 %v947_v42, 1e-24 }
  0xe1   : > { %7275 = vrsqrt.f32 %v949_v36 }
  0xe2   : > { %3803 = vperm.xlu0 %7111, %v3673_v40   ;;  %v851_v57 = vpop.permute.xlu1 %850  ;;  %v1014_v40 = vrot.slane %v1013_v31, 2 }
  0xe3   : > { %3758 = vperm.xlu1 %7112, %v3664_v46   ;;  %v920_v21 = vmul.f32 %v851_v57, %v808_v54  ;;  %v3681_v54 = vld [vmem:[%s10322_s13 + $0xc0] sm:$0xff] }
  0xe4   : > { %v1015_v46 = vadd.f32 %v1014_v40, %v1013_v31  ;;  %v815_v31 = vmul.f32 %v8107_v52, %v7882_v63  ;;  %v5851_v63 = vld [vmem:[%s10314_s5] ss:$0 sm:$0xff] }
  0xe6   : > { %3723 = vperm.xlu0 %7111, %v3657_v49   ;;  %v856_v22 = vpop.permute.xlu1 %855  ;;  %v1016_v56 = vrot.slane %v1015_v46, 1 }
  0xe7   : > { %3848 = vperm.xlu1 %7112, %v3682_v61   ;;  %v921_v7 = vmul.f32 %v856_v22, %v809_v0  ;;  %v3672_v61 = vld [vmem:[%s10322_s13 + $0x78] sm:$0xff]  ;;  %v810_v0 = vmul.f32 %v7438_v62, %v8107_v52 }
  0xe9   : > { %v8212_v13 = vpack.c.bf16 %v921_v7, %v920_v21  ;;  %v1017_v21 = vadd.f32 %v1016_v56, %v1015_v46  ;;  %v7439_v7 = vld [vmem:[%s7814_s24 + $0x38] sm:$0xff]  ;;  %v3690_v46 = vld [vmem:[%s10322_s13 + $0x108] sm:$0xff] }
  0xea   : > { %3813 = vperm.xlu0 %7111, %v3675_v2   ;;  %v866_v15 = vpop.permute.xlu1 %865  ;;  %v3665_v2 = vld [vmem:[%s10322_s13 + $0x40] sm:$0xff] }
  0xeb   : > { %3768 = vperm.xlu1 %7112, %v3666_v8   ;;  %6527 = vmatprep.subr.bf16.mxu0 %v8212_v13  ;;  %v7276_v22 = vpop.eup %7275  ;;  %v923_v5 = vmul.f32 %v866_v15, %v811_v60  ;;  %v813_v8 = vmul.f32 %v7439_v7, %v8107_v52  ;;  %v1018_v15 = vmax.f32 %v1017_v21, 1e-24  ;;  %v819_v7 = vmul.f32 %v8107_v52, %v7944_v25  ;;  %v3669_v25 = vld [vmem:[%s10322_s13 + $0x60] sm:$0xff] }
  0xec   : > { %6528 = vmatpush3.bf16.msra.mxu0 %v8212_v13 }
  0xee   : > { %3733 = vperm.xlu0 %7111, %v3659_v9   ;;  %v876_v24 = vpop.permute.xlu1 %875 }
  0xef   : > { %3858 = vperm.xlu1 %7112, %v3684_v16   ;;  %v7440_v16 = vld [vmem:[%s7814_s24 + $0x30] sm:$0xff] }
  0xf2   : > { %3823 = vperm.xlu0 %7111, %v3677_v17   ;;  %v8228_v32 = vpop.permute.xlu1 %885  ;;  %v812_v17 = vmul.f32 %v7440_v16, %v8107_v52  ;;  %v818_v16 = vmul.f32 %v8107_v52, %v7930_v18 }
  0xf3   : > { %3778 = vperm.xlu1 %7112, %v3668_v26   ;;  %v3683_v26 = vld [vmem:[%s10322_s13 + $0xd0] sm:$0xff] }
  0xf6   : > { %3743 = vperm.xlu0 %7111, %v3661_v27   ;;  %v8239_v43 = vpop.permute.xlu1 %895 }
  0xf7   : > { %3868 = vperm.xlu1 %7112, %v3686_v33  }
  0xfa   : > { %3833 = vperm.xlu0 %7111, %v3679_v35   ;;  %v8250_v57 = vpop.permute.xlu1 %905  ;;  %v7441_v35 = vld [vmem:[%s7805_s17 + $0x8] sm:$0xff] }
  0xfb   : > { %3788 = vperm.xlu1 %7112, %v3670_v41   ;;  %v953_v36 = vmul.f32 %v7441_v35, %v7276_v22  ;;  %v925_v41 = vmul.f32 %v876_v24, %v813_v8  ;;  %v3667_v24 = vld [vmem:[%s10322_s13 + $0x50] sm:$0xff]  ;;  %v816_v22 = vmul.f32 %v8107_v52, %v7900_v6  ;;  %v931_v18 = vmul.f32 %v8250_v57, %v819_v7  ;;  %v3710_v35 = vld [vmem:[%s10322_s13 + $0x1a8] sm:$0xff] }
  0xfd   : > { %v945_v49 = vpop.xlane.xlu0 %944 }
  0xfe   : > { %v948_v42 = vmax.f32 %v945_v49, 1e-24  ;;  %3753 = vperm.xlu0 %7111, %v3663_v45   ;;  %v8269_v23 = vpop.permute.xlu1 %915  ;;  %v7442_v49 = vld [vmem:[%s7814_s24 + $0x40] sm:$0xff] }
  0xff   : > { %3878 = vperm.xlu1 %7112, %v3688_v50   ;;  %v7443_v50 = vld [vmem:[%s7805_s17] sm:$0xff]  ;;  %s5678_s17 = sadd.s32 %s10446_s0, %s6170_s14  ;;  %s7464_s14 = sshll.u32 %s7591_s21, 4  ;;  %s7465_s14 = int_to_ptr.vmem [resolvable:$false] %s7464_s14 }
 0x100   : > { %7277 = vrsqrt.f32 %v948_v42  ;;  %v814_v42 = vmul.f32 %v7442_v49, %v8107_v52  ;;  %s6171_s16 = sshll.u32 %s5678_s17, 7  ;;  %s7466_s2 = scalar_lea.vmem %s7465_s14, 2048 }
 0x101   : > { %7279 = vrsqrt.f32 %v1018_v15  ;;  %p7467_p5 = scmp.lt.s32.totalorder %s10133_s20, %s7465_s14  ;;  %p7468_p6 = scmp.lt.s32.totalorder %s7466_s2, %s7460_s1 }
 0x102   : > { %3843 = vperm.xlu0 %7111, %v3681_v54   ;;  %v1060_v60 = vpop.permute.xlu1 %1059 }
 0x103   : > { %3798 = vperm.xlu1 %7112, %v3672_v61   ;;  %p7469_p7 = por %p7468_p6, %p7467_p5 }
 0x105   : > { %v861_v4 = vpop.permute.xlu0 %860  ;;  %p7470_p10 = pnand %p7469_p7, %p7463_p4 }
 0x106   : > { %v922_v9 = vmul.f32 %v861_v4, %v810_v0  ;;  %3763 = vperm.xlu0 %7111, %v3665_v2   ;;  %v962_v0 = vmul.f32 %v5851_v63, %v953_v36  ;;  %v927_v2 = vmul.f32 %v8228_v32, %v815_v31  ;;  %v3708_v4 = vld [vmem:[%s10322_s13 + $0x198] sm:$0xff]  ;;  %v820_v36 = vmul.f32 %v8107_v52, %v7955_v30  ;;  %v3694_v30 = vld [vmem:[%s10322_s13 + $0x128] sm:$0xff] }
 0x107   : > { %3968 = vperm.xlu1 %7112, %v3706_v14   ;;  %v3692_v14 = vld [vmem:[%s10322_s13 + $0x118] sm:$0xff] }
 0x108   : > { %v8274_v27 = vpack.c.bf16 %v923_v5, %v922_v9  ;;  %v3685_v5 = vld [vmem:[%s10322_s13 + $0xe0] sm:$0xff]  ;;  %v929_v9 = vmul.f32 %v8239_v43, %v817_v58  ;;  %v7122_v58 = vld [vmem:[%s10316_s7 + $0x8] sm:$0xff]  }
 0x109   : > { %v871_v33 = vpop.permute.xlu0 %870 }
 0x10a   : > { %v7278_v40 = vpop.eup %7277  ;;  %v924_v45 = vmul.f32 %v871_v33, %v812_v17  ;;  %3853 = vperm.xlu0 %7111, %v3683_v26   ;;  %6529 = vmatprep.subr.bf16.mxu0 %v8274_v27  ;;  %v1070_v17 = vpop.permute.xlu1 %1069  ;;  %v821_v26 = vmul.f32 %v8107_v52, %v7963_v34  ;;  %v3687_v34 = vld [vmem:[%s10322_s13 + $0xf0] sm:$0xff] }
 0x10b   : > { %6530 = vmatpush3.bf16.msra.mxu0 %v8274_v27  ;;  %v952_v54 = vmul.f32 %v7443_v50, %v7278_v40  ;;  %3888 = vperm.xlu1 %7112, %v3690_v46   ;;  %v8332_v31 = vpop.eup %7279 }
 0x10c   : > { %v8293_v56 = vpack.c.bf16 %v925_v41, %v924_v45  ;;  %v1021_v57 = vmul.f32 %v8332_v31, %v8009_v51  ;;  %v933_v46 = vmul.f32 %v8269_v23, %v821_v26  ;;  %v1020_v52 = vmul.f32 %v8332_v31, %v8003_v48  ;;  %v3671_v51 = vld [vmem:[%s10322_s13 + $0x70] sm:$0xff]  ;;  %v3712_v48 = vld [vmem:[%s10322_s13 + $0x1b8] sm:$0xff] }
 0x10d   : > { %v881_v61 = vpop.permute.xlu0 %880  ;;  %v961_v62 = vmul.f32 %v5851_v63, %v952_v54  ;;  %v1023_v23 = vmul.f32 %v8332_v31, %v8028_v59  ;;  %v1022_v54 = vmul.f32 %v8332_v31, %v8018_v55  ;;  %v3705_v59 = vld [vmem:[%s10322_s13 + $0x180] sm:$0xff]  ;;  %v1025_v55 = vmul.f32 %v8332_v31, %v8060_v19 }
 0x10e   : > { %v926_v21 = vmul.f32 %v881_v61, %v814_v42  ;;  %3773 = vperm.xlu0 %7111, %v3667_v24   ;;  %6531 = vmatprep.subr.bf16.mxu0 %v8293_v56  ;;  %v1080_v41 = vpop.permute.xlu1 %1079  ;;  %v1133_v24 = vmul.f32 %v1060_v60, %v1021_v57  ;;  %v7123_v60 = vld [vmem:[%s10318_s9] sm:$0xff]   ;;  %v1027_v7 = vmul.f32 %v8332_v31, %v8084_v37 }
 0x10f   : > { %6532 = vmatpush3.bf16.msra.mxu0 %v8293_v56  ;;  %v8305_v12 = vpack.c.bf16 %v962_v0, %v961_v62  ;;  %3978 = vperm.xlu1 %7112, %v3708_v4   ;;  %v3696_v4 = vld [vmem:[%s10322_s13 + $0x138] sm:$0xff] }
 0x110   : > { %v8310_v32 = vpack.c.bf16 %v927_v2, %v926_v21  ;;  %v1135_v2 = vmul.f32 %v1070_v17, %v1023_v23  ;;  %v3707_v17 = vld [vmem:[%s10322_s13 + $0x190] sm:$0xff] }
 0x111   : > { %6562 = vmatmul.mubr.bf16.vlgmr.msra.gmra.mrb[0].mxu1 %v8305_v12  ;;  %v891_v8 = vpop.permute.xlu0 %890 }
 0x112   : > { %v928_v6 = vmul.f32 %v891_v8, %v816_v22  ;;  %3863 = vperm.xlu0 %7111, %v3685_v5   ;;  %6533 = vmatprep.subr.bf16.mxu0 %v8310_v32  ;;  %v1090_v61 = vpop.permute.xlu1 %1089  ;;  %v1024_v22 = vmul.f32 %v8332_v31, %v8041_v3  ;;  %v3689_v5 = vld [vmem:[%s10322_s13 + $0x100] sm:$0xff]  ;;  %v3714_v3 = vld [vmem:[%s10322_s13 + $0x1c8] sm:$0xff] }
 0x113   : > { %6534 = vmatpush3.bf16.msra.mxu0 %v8310_v32  ;;  %6589 = vmatprep.mubr.msk.bf16.mxu1 %vm7590_vm0, %v7589_v38 }
 0x114   : > { %v8328_v43 = vpack.c.bf16 %v929_v9, %v928_v6  ;;  %3898 = vperm.xlu1 %7112, %v3692_v14   ;;  %v1137_v6 = vmul.f32 %v1080_v41, %v1025_v55  ;;  %v3711_v55 = vld [vmem:[%s10322_s13 + $0x1b0] sm:$0xff] }
 0x115   : > { %v901_v15 = vpop.permute.xlu0 %900 }
 0x116   : > { %v930_v33 = vmul.f32 %v901_v15, %v818_v16  ;;  %3783 = vperm.xlu0 %7111, %v3669_v25   ;;  %6535 = vmatprep.subr.bf16.mxu0 %v8328_v43  ;;  %v1100_v8 = vpop.permute.xlu1 %1099  ;;  %v1026_v16 = vmul.f32 %v8332_v31, %v8072_v29  ;;  %v1029_v25 = vmul.f32 %v8332_v31, %v8110_v53  ;;  %v3698_v29 = vld [vmem:[%s10322_s13 + $0x148] sm:$0xff] }
 0x117   : > { %6536 = vmatpush3.bf16.msra.mxu0 %v8328_v43  ;;  %v1139_v15 = vmul.f32 %v1090_v61, %v1027_v7  ;;  %v7124_v7 = vld [vmem:[%s10318_s9 + $0x8] sm:$0xff]  }
 0x118   : > { %v8345_v40 = vpack.c.bf16 %v931_v18, %v930_v33  ;;  %3988 = vperm.xlu1 %7112, %v3710_v35   ;;  %v1028_v33 = vmul.f32 %v8332_v31, %v8096_v44  ;;  %v1141_v41 = vmul.f32 %v1100_v8, %v1029_v25  ;;  %v3716_v44 = vld [vmem:[%s10322_s13 + $0x1d8] sm:$0xff]  ;;  %v7125_v8 = vld [vmem:[%s10317_s8 + $0x40] sm:$0xff]  }
 0x119   : > { %v911_v45 = vpop.permute.xlu0 %910  ;;  %v5165_v25 = vld [vmem:[%s10324_s15 + $0x18] sm:$0xff] }
 0x11a   : > { %v932_v49 = vmul.f32 %v911_v45, %v820_v36  ;;  %3873 = vperm.xlu0 %7111, %v3687_v34   ;;  %6537 = vmatprep.subr.bf16.mxu0 %v8345_v40  ;;  %v1110_v35 = vpop.permute.xlu1 %1109  ;;  %v3691_v36 = vld [vmem:[%s10322_s13 + $0x110] sm:$0xff]  ;;  %v1031_v34 = vmul.f32 %v8332_v31, %v8138_v10  ;;  %v1033_v10 = vmul.f32 %v8332_v31, %v8163_v28 }
 0x11b   : > { %6538 = vmatpush3.bf16.msra.mxu0 %v8345_v40 }
 0x11c   : > { %v8360_v42 = vpack.c.bf16 %v933_v46, %v932_v49  ;;  %3908 = vperm.xlu1 %7112, %v3694_v30   ;;  %v1030_v46 = vmul.f32 %v8332_v31, %v8126_v1  ;;  %v3709_v49 = vld [vmem:[%s10322_s13 + $0x1a0] sm:$0xff]  ;;  %v1143_v23 = vmul.f32 %v1110_v35, %v1031_v34  ;;  %v3700_v1 = vld [vmem:[%s10322_s13 + $0x158] sm:$0xff]  ;;  %v7130_v34 = vld [vmem:[%s10317_s8 + $0x68] sm:$0xff]  }
 0x11d   : > { %v1055_v63 = vpop.permute.xlu0 %1054  ;;  %v5169_v35 = vld [vmem:[%s10324_s15 + $0x38] sm:$0xff] }
 0x11e   : > { %v1132_v50 = vmul.f32 %v1055_v63, %v1020_v52  ;;  %3793 = vperm.xlu0 %7111, %v3671_v51   ;;  %6539 = vmatprep.subr.bf16.mxu0 %v8360_v42  ;;  %v1120_v52 = vpop.permute.xlu1 %1119 }
 0x11f   : > { %6540 = vmatpush3.bf16.msra.mxu0 %v8360_v42 }
 0x120   : > { %v8380_v62 = vpack.c.bf16 %v1133_v24, %v1132_v50  ;;  %3998 = vperm.xlu1 %7112, %v3712_v48   ;;  %v1032_v24 = vmul.f32 %v8332_v31, %v8154_v20  ;;  %v3693_v50 = vld [vmem:[%s10322_s13 + $0x120] sm:$0xff]  ;;  %v1035_v48 = vmul.f32 %v8332_v31, %v8187_v47  ;;  %v3718_v20 = vld [vmem:[%s10322_s13 + $0x1e8] sm:$0xff] }
 0x121   : > { %v1065_v0 = vpop.permute.xlu0 %1064 }
 0x122   : > { %v1134_v21 = vmul.f32 %v1065_v0, %v1022_v54  ;;  %3963 = vperm.xlu0 %7111, %v3705_v59   ;;  %6542 = vmatmul.mubr.bf16.vlgmr.msra.gmra.mrb[0].mxu0 %v7122_v58  ;;  %v1145_v58 = vmul.f32 %v1120_v52, %v1033_v10  ;;  %v1034_v59 = vmul.f32 %v8332_v31, %v8175_v39  ;;  %v3702_v39 = vld [vmem:[%s10322_s13 + $0x168] sm:$0xff]  ;;  %v3695_v31 = vld [vmem:[%s10322_s13 + $0x130] sm:$0xff]  ;;  %v5162_v52 = vld [vmem:[%s10324_s15] sm:$0xff] }
 0x123   : > { %6565 = vmatprep.subr.bf16.mxu0 %v8380_v62  ;;  %6581 = vmatprep.mubr.bf16.mxu0 %v7123_v60  ;;  %v1130_v60 = vpop.permute.xlu1 %1129  ;;  %v5175_v10 = vld [vmem:[%s10324_s15 + $0x68] sm:$0xff] }
 0x124   : > { %v8393_v19 = vpack.c.bf16 %v1135_v2, %v1134_v21  ;;  %6566 = vmatpush3.bf16.msra.mxu0 %v8380_v62  ;;  %3918 = vperm.xlu1 %7112, %v3696_v4   ;;  %v1147_v2 = vmul.f32 %v1130_v60, %v1035_v48  ;;  %v5174_v48 = vld [vmem:[%s10324_s15 + $0x60] sm:$0xff] }
 0x125   : > { %v1075_v9 = vpop.permute.xlu0 %1074 }
 0x126   : > { %v1136_v14 = vmul.f32 %v1075_v9, %v1024_v22  ;;  %3883 = vperm.xlu0 %7111, %v3689_v5   ;;  %6567 = vmatprep.subr.bf16.mxu0 %v8393_v19  ;;  %v3720_v22 = vld [vmem:[%s10322_s13 + $0x1f8] sm:$0xff]  ;;  %v3713_v5 = vld [vmem:[%s10322_s13 + $0x1c0] sm:$0xff] }
 0x127   : > { %v3704_v9 = vld [vmem:[%s10322_s13 + $0x178] sm:$0xff] }
 0x128   : > { %v8407_v37 = vpack.c.bf16 %v1137_v6, %v1136_v14  ;;  %6568 = vmatpush3.bf16.msra.mxu0 %v8393_v19  ;;  %4008 = vperm.xlu1 %7112, %v3714_v3   ;;  %v3697_v6 = vld [vmem:[%s10322_s13 + $0x140] sm:$0xff]  ;;  %v7126_v14 = vld [vmem:[%s10317_s8 + $0x48] sm:$0xff]  }
 0x129   : > { %v1085_v26 = vpop.permute.xlu0 %1084  ;;  %v5163_v3 = vld [vmem:[%s10324_s15 + $0x8] sm:$0xff] }
 0x12a   : > { %v1138_v18 = vmul.f32 %v1085_v26, %v1026_v16  ;;  %3973 = vperm.xlu0 %7111, %v3707_v17   ;;  %6569 = vmatprep.subr.bf16.mxu0 %v8407_v37  ;;  %v3715_v16 = vld [vmem:[%s10322_s13 + $0x1d0] sm:$0xff] }
 0x12b   : > { %v7127_v17 = vld [vmem:[%s10317_s8 + $0x50] sm:$0xff]  }
 0x12c   : > { %v8421_v53 = vpack.c.bf16 %v1139_v15, %v1138_v18  ;;  %6570 = vmatpush3.bf16.msra.mxu0 %v8407_v37  ;;  %3928 = vperm.xlu1 %7112, %v3698_v29   ;;  %v3699_v26 = vld [vmem:[%s10322_s13 + $0x150] sm:$0xff]  ;;  %v7128_v15 = vld [vmem:[%s10317_s8 + $0x58] sm:$0xff]   ;;  %v5167_v18 = vld [vmem:[%s10324_s15 + $0x28] sm:$0xff] }
 0x12d   : > { %v1095_v57 = vpop.permute.xlu0 %1094  ;;  %v3717_v29 = vld [vmem:[%s10322_s13 + $0x1e0] sm:$0xff] }
 0x12e   : > { %v1140_v45 = vmul.f32 %v1095_v57, %v1028_v33  ;;  %3893 = vperm.xlu0 %7111, %v3691_v36   ;;  %6571 = vmatprep.subr.bf16.mxu0 %v8421_v53  ;;  %v7129_v33 = vld [vmem:[%s10317_s8 + $0x60] sm:$0xff]   ;;  %v5171_v57 = vld [vmem:[%s10324_s15 + $0x48] sm:$0xff] }
 0x12f   : > { %v3701_v36 = vld [vmem:[%s10322_s13 + $0x160] sm:$0xff] }
 0x130   : > { %v8435_v30 = vpack.c.bf16 %v1141_v41, %v1140_v45  ;;  %6572 = vmatpush3.bf16.msra.mxu0 %v8421_v53  ;;  %4018 = vperm.xlu1 %7112, %v3716_v44   ;;  %v3719_v41 = vld [vmem:[%s10322_s13 + $0x1f0] sm:$0xff]  ;;  %v5173_v44 = vld [vmem:[%s10324_s15 + $0x58] sm:$0xff] }
 0x131   : > { %v1105_v51 = vpop.permute.xlu0 %1104  ;;  %v7131_v45 = vld [vmem:[%s10317_s8 + $0x70] sm:$0xff]  }
 0x132   : > { %v1142_v63 = vmul.f32 %v1105_v51, %v1030_v46  ;;  %3983 = vperm.xlu0 %7111, %v3709_v49   ;;  %6573 = vmatprep.subr.bf16.mxu0 %v8435_v30  ;;  %v3703_v46 = vld [vmem:[%s10322_s13 + $0x170] sm:$0xff]  ;;  %v7132_v49 = vld [vmem:[%s10317_s8 + $0x78] sm:$0xff]  }
 0x133   : > { %v5177_v51 = vld [vmem:[%s10324_s15 + $0x78] sm:$0xff] }
 0x134   : > { %v8449_v28 = vpack.c.bf16 %v1143_v23, %v1142_v63  ;;  %6574 = vmatpush3.bf16.msra.mxu0 %v8435_v30  ;;  %3938 = vperm.xlu1 %7112, %v3700_v1   ;;  %v5164_v23 = vld [vmem:[%s10324_s15 + $0x10] sm:$0xff]  ;;  %v5166_v63 = vld [vmem:[%s10324_s15 + $0x20] sm:$0xff] }
 0x135   : > { %v1115_v54 = vpop.permute.xlu0 %1114  ;;  %v5168_v1 = vld [vmem:[%s10324_s15 + $0x30] sm:$0xff] }
 0x136   : > { %v1144_v61 = vmul.f32 %v1115_v54, %v1032_v24  ;;  %3903 = vperm.xlu0 %7111, %v3693_v50   ;;  %6575 = vmatprep.subr.bf16.mxu0 %v8449_v28  ;;  %v5170_v24 = vld [vmem:[%s10324_s15 + $0x40] sm:$0xff]  ;;  %v5172_v50 = vld [vmem:[%s10324_s15 + $0x50] sm:$0xff] }
 0x137   : > { %v5176_v54 = vld [vmem:[%s10324_s15 + $0x70] sm:$0xff] }
 0x138   : > { %v8463_v47 = vpack.c.bf16 %v1145_v58, %v1144_v61  ;;  %6576 = vmatpush3.bf16.msra.mxu0 %v8449_v28  ;;  %4028 = vperm.xlu1 %7112, %v3718_v20  }
 0x139   : > { %v1125_v0 = vpop.permute.xlu0 %1124 }
 0x13a   : > { %v1146_v21 = vmul.f32 %v1125_v0, %v1034_v59  ;;  %3993 = vperm.xlu0 %7111, %v3711_v55   ;;  %6577 = vmatprep.subr.bf16.mxu0 %v8463_v47 }
 0x13c   : > { %v8473_v4 = vpack.c.bf16 %v1147_v2, %v1146_v21  ;;  %6578 = vmatpush3.bf16.msra.mxu0 %v8463_v47  ;;  %3948 = vperm.xlu1 %7112, %v3702_v39  }
 0x13e   : > { %3913 = vperm.xlu0 %7111, %v3695_v31   ;;  %6579 = vmatprep.subr.bf16.mxu0 %v8473_v4 }
 0x140   : > { %6580 = vmatpush3.bf16.msra.mxu0 %v8473_v4  ;;  %4038 = vperm.xlu1 %7112, %v3720_v22  }
 0x141   : > { %6619 = vmatprep.subr.bf16.mxu0 %v7589_v38 }
 0x142   : > { %4003 = vperm.xlu0 %7111, %v3713_v5  }
 0x143   : > { %6582 = vmatmul.mubr.bf16.vlgmr.msra.gmra.mrb[4].mxu0 %v7124_v7 }
 0x144   : > { %6620 = vmatpush3.bf16.msra.mxu0 %v7125_v8  ;;  %6635 = vmatprep.mubr.msk.bf16.mxu0 %vm7590_vm0, %v7589_v38 }
 0x145   : > { %3958 = vperm.xlu1 %7112, %v3704_v9   ;;  %6621 = vmatprep.subr.bf16.mxu0 %v7589_v38 }
 0x146   : > { %3923 = vperm.xlu0 %7111, %v3697_v6  }
 0x148   : > { %6622 = vmatpush3.bf16.msra.mxu0 %v7126_v14 }
 0x149   : > { %5185 = vperm.xlu1 %7112, %v5163_v3   ;;  %6623 = vmatprep.subr.bf16.mxu0 %v7589_v38 }
 0x14a   : > { %4013 = vperm.xlu0 %7111, %v3715_v16  }
 0x14c   : > { %6624 = vmatpush3.bf16.msra.mxu0 %v7127_v17 }
 0x14d   : > { %5195 = vperm.xlu1 %7112, %v5165_v25   ;;  %6625 = vmatprep.subr.bf16.mxu0 %v7589_v38 }
 0x14e   : > { %3933 = vperm.xlu0 %7111, %v3699_v26   ;;  %v8606_v26 = vpop.permute.xlu1 %1165 }
 0x14f   : > { %vm1169_vm3 = vcmp.gt.f32.partialorder %v8606_v26, 0.0 }
 0x150   : > { %6626 = vmatpush3.bf16.msra.mxu0 %v7128_v15  ;;  %v8608_v15 = vpop.permute.xlu0 %1160 }
 0x151   : > { %5205 = vperm.xlu1 %7112, %v5167_v18   ;;  %6627 = vmatprep.subr.bf16.mxu0 %v7589_v38  ;;  %vm1168_vm4 = vcmp.gt.f32.partialorder %v8608_v15, 0.0 }
 0x152   : > { %4023 = vperm.xlu0 %7111, %v3717_v29  }
 0x154   : > { %6628 = vmatpush3.bf16.msra.mxu0 %v7129_v33 }
 0x155   : > { %5215 = vperm.xlu1 %7112, %v5169_v35   ;;  %6629 = vmatprep.subr.bf16.mxu0 %v7589_v38 }
 0x156   : > { %3943 = vperm.xlu0 %7111, %v3701_v36  }
 0x158   : > { %6630 = vmatpush3.bf16.msra.mxu0 %v7130_v34 }
 0x159   : > { %5225 = vperm.xlu1 %7112, %v5171_v57   ;;  %6631 = vmatprep.subr.bf16.mxu0 %v7589_v38 }
 0x15a   : > { %4033 = vperm.xlu0 %7111, %v3719_v41  }
 0x15c   : > { %6632 = vmatpush3.bf16.msra.mxu0 %v7131_v45 }
 0x15d   : > { %5235 = vperm.xlu1 %7112, %v5173_v44   ;;  %6633 = vmatprep.subr.bf16.mxu0 %v7589_v38 }
 0x15e   : > { %3953 = vperm.xlu0 %7111, %v3703_v46  }
 0x160   : > { %6634 = vmatpush3.bf16.msra.mxu0 %v7132_v49 }
 0x161   : > { %5245 = vperm.xlu1 %7112, %v5175_v10   ;;  %6659 = vmatprep.subr.bf16.mxu0 %v7589_v38 }
 0x162   : > { %5180 = vperm.xlu0 %7111, %v5162_v52  }
 0x163   : > { %6636 = vmatmul.mubr.bf16.vlgmr.msra.gmra.mrb[8].mxu0 %v8305_v12 }
 0x164   : > { %6663 = vmatprep.mubr.msk.bf16.mxu0 %vm7590_vm0, %v7589_v38 }
 0x165   : > { %5255 = vperm.xlu1 %7112, %v5177_v51  }
 0x166   : > { %5190 = vperm.xlu0 %7111, %v5164_v23  }
 0x16a   : > { %5200 = vperm.xlu0 %7111, %v5166_v63  }
 0x16e   : > { %5210 = vperm.xlu0 %7111, %v5168_v1  }
 0x172   : > { %5220 = vperm.xlu0 %7111, %v5170_v24  }
 0x176   : > { %5230 = vperm.xlu0 %7111, %v5172_v50  }
 0x17a   : > { %5240 = vperm.xlu0 %7111, %v5174_v48  }
 0x17e   : > { %5250 = vperm.xlu0 %7111, %v5176_v54  }
 0x1e4   : > { %v1335_v58 = vpop.f32.mrb[0].mxu1 }
 0x1e5   : > { %v6563_v61 = vpop.f32.mrb[1].mxu1 }
 0x1e6   : > { %v1338_v20 = vpop.f32.mrb[2].mxu1 }
 0x1e7   : > { %v1342_v59 = vpack.c.bf16 %v1338_v20, %v1335_v58  ;;  %v6564_v60 = vpop.f32.mrb[3].mxu1 }
 0x1f5   : > { %v6543_v55 = vpop.f32.mrb[0].mxu0 }
 0x1f6   : > { %v1220_v0 = vpop.f32.mrb[1].mxu0 }
 0x1f7   : > { %v6544_v2 = vpop.f32.mrb[2].mxu0 }
 0x1f8   : > { %v1236_v21 = vpack.c.bf16 %v6544_v2, %v6543_v55  ;;  %v1223_v39 = vpop.f32.mrb[3].mxu0 }
 0x1f9   : > { %v1235_v31 = vpack.c.bf16 %v1223_v39, %v1220_v0  ;;  %v7134_v39 = vld [vmem:[%s10316_s7 + $0x18] sm:$0xff]  }
 0x1fb   : > { %6586 = vmatpush3.bf16.msra.mxu1 %v1235_v31  ;;  %v7135_v31 = vld [vmem:[%s10318_s9 + $0x10] sm:$0xff]  }
 0x1fc   : > { %6587 = vmatprep.subr.bf16.mxu1 %v7589_v38 }
 0x1ff   : > { %6588 = vmatpush3.bf16.msra.mxu1 %v1236_v21  ;;  %v7133_v21 = vld [vmem:[%s10316_s7 + $0x10] sm:$0xff]  }
 0x202   : > { %6590 = vmatmul.mubr.msk.bf16.vlgmr.msra.gmra.mrb[4].mxu1 %vm1410_vm2, %v1342_v59 }
 0x216   : > { %v6583_v22 = vpop.f32.mrb[4].mxu0 }
 0x217   : > { %v1393_v5 = vpop.f32.mrb[5].mxu0 }
 0x218   : > { %v6584_v7 = vpop.f32.mrb[6].mxu0 }
 0x219   : > { %v1409_v8 = vpack.c.bf16 %v6584_v7, %v6583_v22  ;;  %v1396_v9 = vpop.f32.mrb[7].mxu0  ;;  %v7136_v22 = vld [vmem:[%s10318_s9 + $0x18] sm:$0xff]   ;;  %v7138_v7 = vld [vmem:[%s10316_s7 + $0x28] sm:$0xff]  }
 0x21a   : > { %v1408_v6 = vpack.c.bf16 %v1396_v9, %v1393_v5  ;;  %v7137_v5 = vld [vmem:[%s10316_s7 + $0x20] sm:$0xff]   ;;  %v7140_v9 = vld [vmem:[%s10317_s8 + $0x88] sm:$0xff]  }
 0x21c   : > { %6595 = vmatprep.mubr.msk.bf16.mxu1 %vm980_vm1, %v1408_v6  ;;  %v7141_v6 = vld [vmem:[%s10317_s8 + $0x90] sm:$0xff]  }
 0x236   : > { %v8600_v14 = vpop.f32.mrb[8].mxu0 }
 0x237   : > { %v6637_v3 = vpop.f32.mrb[9].mxu0 }
 0x238   : > { %v8602_v16 = vpop.f32.mrb[10].mxu0  ;;  %v7142_v3 = vld [vmem:[%s10317_s8 + $0x98] sm:$0xff]  }
 0x239   : > { %v1730_v17 = vpack.c.bf16 %v8602_v16, %v8600_v14  ;;  %v6638_v25 = vpop.f32.mrb[11].mxu0 }
 0x23a   : > { %v7143_v25 = vld [vmem:[%s10317_s8 + $0xa0] sm:$0xff]  }
 0x2d5   : > { %v1448_v18 = vpop.f32.mrb[4].mxu1 }
 0x2d6   : > { %v6591_v29 = vpop.f32.mrb[5].mxu1  ;;  %v1455_v35 = vsel %vm1168_vm4, %v1448_v18, -3.4028235e+38  ;;  %v7144_v18 = vld [vmem:[%s10317_s8 + $0xa8] sm:$0xff]  }
 0x2d7   : > { %v1451_v33 = vpop.f32.mrb[6].mxu1  ;;  %v7145_v29 = vld [vmem:[%s10317_s8 + $0xb0] sm:$0xff]  }
 0x2d8   : > { %v1456_v36 = vsel %vm1169_vm3, %v1451_v33, -3.4028235e+38  ;;  %v6592_v34 = vpop.f32.mrb[7].mxu1  ;;  %v7146_v33 = vld [vmem:[%s10317_s8 + $0xb8] sm:$0xff]  }
 0x2d9   : > { %v1457_v57 = vmax.f32 %v1455_v35, %v1456_v36 }
 0x2db   : > { %v1458_v41 = vrot.slane %v1457_v57, 4 }
 0x2dd   : > { %v1459_v45 = vmax.f32 %v1457_v57, %v1458_v41 }
 0x2df   : > { %v1460_v44 = vrot.slane %v1459_v45, 2 }
 0x2e1   : > { %v1461_v46 = vmax.f32 %v1459_v45, %v1460_v44 }
 0x2e3   : > { %v1462_v49 = vrot.slane %v1461_v46, 1 }
 0x2e5   : > { %v1463_v10 = vmax.f32 %v1461_v46, %v1462_v49 }
 0x2e7   : > { %v1464_v52 = vsub.f32 %v1455_v35, %v1463_v10  ;;  %v1465_v51 = vsub.f32 %v1456_v36, %v1463_v10 }
 0x2e9   : > { %v1466_v23 = vmul.f32 1.442695, %v1464_v52  ;;  %v1468_v63 = vmul.f32 1.442695, %v1465_v51 }
 0x2eb   : > { %7281 = vpow2.f32 %v1466_v23 }
 0x2ec   : > { %7283 = vpow2.f32 %v1468_v63 }
 0x2f5   : > { %v7282_v1 = vpop.eup %7281 }
 0x2f6   : > { %v7284_v24 = vpop.eup %7283 }
 0x2f7   : > { %v1470_v50 = vadd.f32 %v7284_v24, %v7282_v1 }
 0x2f9   : > { %v1471_v48 = vrot.slane %v1470_v50, 4 }
 0x2fb   : > { %v1472_v54 = vadd.f32 %v1471_v48, %v1470_v50 }
 0x2fd   : > { %v1473_v58 = vrot.slane %v1472_v54, 2 }
 0x2ff   : > { %v1474_v61 = vadd.f32 %v1473_v58, %v1472_v54 }
 0x301   : > { %v1475_v20 = vrot.slane %v1474_v61, 1 }
 0x303   : > { %v1476_v59 = vadd.f32 %v1475_v20, %v1474_v61 }
 0x305   : > { %7285 = vrcp.f32 %v1476_v59 }
 0x30f   : > { %v7286_v60 = vpop.eup %7285 }
 0x310   : > { %v1478_v55 = vmul.f32 %v7286_v60, %v7282_v1  ;;  %v1479_v0 = vmul.f32 %v7286_v60, %v7284_v24 }
 0x312   : > { %1480 = vst [vmem:[%s8617_s18] sm:$0xff] %v1478_v55  ;;  %1481 = vst [vmem:[%s8617_s18 + $0x8] sm:$0xff] %v1479_v0  ;;  %v1482_v2 = vpack.c.bf16 %v1479_v0, %v1478_v55  ;;  %v7147_v55 = vld [vmem:[%s10316_s7 + $0x30] sm:$0xff]  }
 0x314   : > { %6593 = vmatprep.subr.bf16.mxu1 %v1482_v2 }
 0x315   : > { %6594 = vmatpush3.bf16.msra.mxu1 %v1482_v2 }
 0x316   : > { %6599 = vmatprep.subr.bf16.mxu1 %v8140_v11 }
 0x318   : > { %6596 = vmatmul.mubr.msk.bf16.vlgmr.msra.gmra.mrb[8].mxu1 %vm980_vm1, %v1409_v8  ;;  %v7139_v8 = vld [vmem:[%s10317_s8 + $0x80] sm:$0xff]  }
 0x319   : > { %6600 = vmatpush3.bf16.msra.mxu1 %v8140_v11  ;;  %6615 = vmatprep.mubr.bf16.mxu1 %v7133_v21 }
 0x31a   : > { %6601 = vmatprep.subr.bf16.mxu1 %v8212_v13 }
 0x31d   : > { %6602 = vmatpush3.bf16.msra.mxu1 %v8212_v13 }
 0x31e   : > { %6603 = vmatprep.subr.bf16.mxu1 %v8274_v27 }
 0x321   : > { %6604 = vmatpush3.bf16.msra.mxu1 %v8274_v27 }
 0x322   : > { %6605 = vmatprep.subr.bf16.mxu1 %v8293_v56 }
 0x325   : > { %6606 = vmatpush3.bf16.msra.mxu1 %v8293_v56 }
 0x326   : > { %6607 = vmatprep.subr.bf16.mxu1 %v8310_v32 }
 0x329   : > { %6608 = vmatpush3.bf16.msra.mxu1 %v8310_v32 }
 0x32a   : > { %6609 = vmatprep.subr.bf16.mxu1 %v8328_v43 }
 0x32d   : > { %6610 = vmatpush3.bf16.msra.mxu1 %v8328_v43 }
 0x32e   : > { %6611 = vmatprep.subr.bf16.mxu1 %v8345_v40 }
 0x331   : > { %6612 = vmatpush3.bf16.msra.mxu1 %v8345_v40 }
 0x332   : > { %6613 = vmatprep.subr.bf16.mxu1 %v8360_v42 }
 0x335   : > { %6614 = vmatpush3.bf16.msra.mxu1 %v8360_v42 }
 0x336   : > { %6639 = vmatprep.subr.bf16.mxu1 %v8380_v62 }
 0x338   : > { %6616 = vmatmul.mubr.bf16.vlgmr.msra.gmra.mrb[12].mxu1 %v7134_v39 }
 0x339   : > { %6640 = vmatpush3.bf16.msra.mxu1 %v8380_v62  ;;  %6655 = vmatprep.mubr.bf16.mxu1 %v7135_v31 }
 0x33a   : > { %6641 = vmatprep.subr.bf16.mxu1 %v8393_v19 }
 0x33d   : > { %6642 = vmatpush3.bf16.msra.mxu1 %v8393_v19 }
 0x33e   : > { %6643 = vmatprep.subr.bf16.mxu1 %v8407_v37 }
 0x341   : > { %6644 = vmatpush3.bf16.msra.mxu1 %v8407_v37 }
 0x342   : > { %6645 = vmatprep.subr.bf16.mxu1 %v8421_v53 }
 0x345   : > { %6646 = vmatpush3.bf16.msra.mxu1 %v8421_v53 }
 0x346   : > { %6647 = vmatprep.subr.bf16.mxu1 %v8435_v30 }
 0x349   : > { %6648 = vmatpush3.bf16.msra.mxu1 %v8435_v30 }
 0x34a   : > { %6649 = vmatprep.subr.bf16.mxu1 %v8449_v28 }
 0x34d   : > { %6650 = vmatpush3.bf16.msra.mxu1 %v8449_v28 }
 0x34e   : > { %6651 = vmatprep.subr.bf16.mxu1 %v8463_v47 }
 0x351   : > { %6652 = vmatpush3.bf16.msra.mxu1 %v8463_v47 }
 0x352   : > { %6653 = vmatprep.subr.bf16.mxu1 %v8473_v4 }
 0x355   : > { %6654 = vmatpush3.bf16.msra.mxu1 %v8473_v4 }
 0x356   : > { %6713 = vmatprep.subr.bf16.mxu1 %v8140_v11 }
 0x358   : > { %6656 = vmatmul.mubr.bf16.vlgmr.msra.gmra.mrb[16].mxu1 %v7136_v22 }
 0x359   : > { %6714 = vmatpush3.bf16.msra.mxu1 %v8140_v11  ;;  %6729 = vmatprep.mubr.bf16.mxu1 %v7137_v5 }
 0x35a   : > { %6715 = vmatprep.subr.bf16.mxu1 %v8212_v13 }
 0x35d   : > { %6716 = vmatpush3.bf16.msra.mxu1 %v8212_v13 }
 0x35e   : > { %6717 = vmatprep.subr.bf16.mxu1 %v8274_v27 }
 0x361   : > { %6718 = vmatpush3.bf16.msra.mxu1 %v8274_v27 }
 0x362   : > { %6719 = vmatprep.subr.bf16.mxu1 %v8293_v56 }
 0x365   : > { %6720 = vmatpush3.bf16.msra.mxu1 %v8293_v56 }
 0x366   : > { %6721 = vmatprep.subr.bf16.mxu1 %v8310_v32 }
 0x369   : > { %6722 = vmatpush3.bf16.msra.mxu1 %v8310_v32 }
 0x36a   : > { %6723 = vmatprep.subr.bf16.mxu1 %v8328_v43 }
 0x36d   : > { %6724 = vmatpush3.bf16.msra.mxu1 %v8328_v43 }
 0x36e   : > { %6725 = vmatprep.subr.bf16.mxu1 %v8345_v40 }
 0x371   : > { %6726 = vmatpush3.bf16.msra.mxu1 %v8345_v40 }
 0x372   : > { %6727 = vmatprep.subr.bf16.mxu1 %v8360_v42 }
 0x375   : > { %6728 = vmatpush3.bf16.msra.mxu1 %v8360_v42 }
 0x376   : > { %6733 = vmatprep.subr.bf16.mxu1 %v7589_v38 }
 0x378   : > { %6730 = vmatmul.mubr.bf16.vlgmr.msra.gmra.mrb[20].mxu1 %v7138_v7 }
 0x379   : > { %6734 = vmatpush3.bf16.msra.mxu1 %v7139_v8  ;;  %6749 = vmatprep.mubr.msk.bf16.mxu1 %vm7590_vm0, %v7589_v38 }
 0x37a   : > { %6735 = vmatprep.subr.bf16.mxu1 %v7589_v38 }
 0x37d   : > { %6736 = vmatpush3.bf16.msra.mxu1 %v7140_v9 }
 0x37e   : > { %6737 = vmatprep.subr.bf16.mxu1 %v7589_v38 }
 0x381   : > { %6738 = vmatpush3.bf16.msra.mxu1 %v7141_v6 }
 0x382   : > { %6739 = vmatprep.subr.bf16.mxu1 %v7589_v38 }
 0x385   : > { %6740 = vmatpush3.bf16.msra.mxu1 %v7142_v3 }
 0x386   : > { %6741 = vmatprep.subr.bf16.mxu1 %v7589_v38 }
 0x389   : > { %6742 = vmatpush3.bf16.msra.mxu1 %v7143_v25 }
 0x38a   : > { %6743 = vmatprep.subr.bf16.mxu1 %v7589_v38 }
 0x38d   : > { %6744 = vmatpush3.bf16.msra.mxu1 %v7144_v18 }
 0x38e   : > { %6745 = vmatprep.subr.bf16.mxu1 %v7589_v38 }
 0x391   : > { %6746 = vmatpush3.bf16.msra.mxu1 %v7145_v29 }
 0x392   : > { %6747 = vmatprep.subr.bf16.mxu1 %v7589_v38 }
 0x395   : > { %6748 = vmatpush3.bf16.msra.mxu1 %v7146_v33 }
 0x396   : > { %6773 = vmatprep.subr.bf16.mxu1 %v7589_v38 }
 0x398   : > { %6750 = vmatmul.mubr.bf16.vlgmr.msra.gmra.mrb[24].mxu1 %v8305_v12 }
 0x399   : > { %6777 = vmatprep.mubr.msk.bf16.mxu1 %vm7590_vm0, %v7589_v38 }
 0x3eb   : > { %v6597_v35 = vpop.f32.mrb[8].mxu1 }
 0x3ec   : > { %v1523_v36 = vpop.f32.mrb[9].mxu1 }
 0x3ed   : > { %v6598_v34 = vpop.f32.mrb[10].mxu1 }
 0x3ee   : > { %v8726_v57 = vpack.c.bf16 %v6598_v34, %v6597_v35  ;;  %v1526_v41 = vpop.f32.mrb[11].mxu1 }
 0x3ef   : > { %v8728_v45 = vpack.c.bf16 %v1526_v41, %v1523_v36 }
 0x40b   : > { %v6617_v44 = vpop.f32.mrb[12].mxu1 }
 0x40c   : > { %v1607_v46 = vpop.f32.mrb[13].mxu1 }
 0x40d   : > { %v6618_v49 = vpop.f32.mrb[14].mxu1 }
 0x40e   : > { %v1623_v10 = vpack.c.bf16 %v6618_v49, %v6617_v44  ;;  %v1610_v52 = vpop.f32.mrb[15].mxu1 }
 0x40f   : > { %v1622_v51 = vpack.c.bf16 %v1610_v52, %v1607_v46 }
 0x411   : > { %6660 = vmatpush3.bf16.msra.mxu0 %v1622_v51 }
 0x412   : > { %6661 = vmatprep.subr.bf16.mxu0 %v7589_v38 }
 0x415   : > { %6662 = vmatpush3.bf16.msra.mxu0 %v1623_v10 }
 0x418   : > { %6664 = vmatmul.mubr.msk.bf16.vlgmr.msra.gmra.mrb[12].mxu0 %vm1410_vm2, %v1730_v17 }
 0x42b   : > { %v8735_v23 = vpop.f32.mrb[16].mxu1 }
 0x42c   : > { %v1782_v63 = vpop.f32.mrb[17].mxu1 }
 0x42d   : > { %v8737_v1 = vpop.f32.mrb[18].mxu1 }
 0x42e   : > { %v1798_v24 = vpack.c.bf16 %v8737_v1, %v8735_v23  ;;  %v1785_v50 = vpop.f32.mrb[19].mxu1 }
 0x42f   : > { %v1797_v48 = vpack.c.bf16 %v1785_v50, %v1782_v63 }
 0x431   : > { %6669 = vmatprep.mubr.msk.bf16.mxu0 %vm980_vm1, %v1797_v48 }
 0x44b   : > { %v6731_v54 = vpop.f32.mrb[20].mxu1 }
 0x44c   : > { %v2319_v58 = vpop.f32.mrb[21].mxu1 }
 0x44d   : > { %v6732_v61 = vpop.f32.mrb[22].mxu1 }
 0x44e   : > { %v2335_v20 = vpack.c.bf16 %v6732_v61, %v6731_v54  ;;  %v2322_v59 = vpop.f32.mrb[23].mxu1 }
 0x44f   : > { %v2334_v14 = vpack.c.bf16 %v2322_v59, %v2319_v58 }
 0x451   : > { %6774 = vmatpush3.bf16.msra.mxu1 %v2334_v14 }
 0x452   : > { %6775 = vmatprep.subr.bf16.mxu1 %v7589_v38 }
 0x455   : > { %6776 = vmatpush3.bf16.msra.mxu1 %v2335_v20 }
 0x456   : > { %6807 = vmatprep.subr.bf16.mxu1 %v8140_v11 }
 0x46b   : > { %v2435_v16 = vpop.f32.mrb[24].mxu1 }
 0x46c   : > { %v6751_v17 = vpop.f32.mrb[25].mxu1 }
 0x46d   : > { %v2438_v60 = vpop.f32.mrb[26].mxu1 }
 0x46e   : > { %v2442_v0 = vpack.c.bf16 %v2438_v60, %v2435_v16  ;;  %v6752_v2 = vpop.f32.mrb[27].mxu1 }
 0x470   : > { %6778 = vmatmul.mubr.msk.bf16.vlgmr.msra.gmra.mrb[28].mxu1 %vm1410_vm2, %v2442_v0 }
 0x471   : > { %6808 = vmatpush3.bf16.msra.mxu1 %v8140_v11  ;;  %6823 = vmatprep.mubr.bf16.mxu1 %v7147_v55  ;;  %v7148_v11 = vld [vmem:[%s10316_s7 + $0x38] sm:$0xff]  }
 0x472   : > { %6809 = vmatprep.subr.bf16.mxu1 %v8212_v13 }
 0x475   : > { %6810 = vmatpush3.bf16.msra.mxu1 %v8212_v13 }
 0x476   : > { %6811 = vmatprep.subr.bf16.mxu1 %v8274_v27 }
 0x479   : > { %6812 = vmatpush3.bf16.msra.mxu1 %v8274_v27 }
 0x47a   : > { %6813 = vmatprep.subr.bf16.mxu1 %v8293_v56 }
 0x47d   : > { %6814 = vmatpush3.bf16.msra.mxu1 %v8293_v56 }
 0x47e   : > { %6815 = vmatprep.subr.bf16.mxu1 %v8310_v32 }
 0x481   : > { %6816 = vmatpush3.bf16.msra.mxu1 %v8310_v32 }
 0x482   : > { %6817 = vmatprep.subr.bf16.mxu1 %v8328_v43 }
 0x485   : > { %6818 = vmatpush3.bf16.msra.mxu1 %v8328_v43 }
 0x486   : > { %6819 = vmatprep.subr.bf16.mxu1 %v8345_v40 }
 0x489   : > { %6820 = vmatpush3.bf16.msra.mxu1 %v8345_v40 }
 0x48a   : > { %6821 = vmatprep.subr.bf16.mxu1 %v8360_v42 }
 0x48d   : > { %6822 = vmatpush3.bf16.msra.mxu1 %v8360_v42 }
 0x48e   : > { %6847 = vmatprep.subr.bf16.mxu1 %v8380_v62 }
 0x490   : > { %6824 = vmatmul.mubr.bf16.vlgmr.msra.gmra.mrb[32].mxu1 %v7148_v11 }
 0x491   : > { %6848 = vmatpush3.bf16.msra.mxu1 %v8380_v62 }
 0x492   : > { %6849 = vmatprep.subr.bf16.mxu1 %v8393_v19 }
 0x495   : > { %6850 = vmatpush3.bf16.msra.mxu1 %v8393_v19 }
 0x496   : > { %6851 = vmatprep.subr.bf16.mxu1 %v8407_v37 }
 0x499   : > { %6852 = vmatpush3.bf16.msra.mxu1 %v8407_v37 }
 0x49a   : > { %6853 = vmatprep.subr.bf16.mxu1 %v8421_v53 }
 0x49d   : > { %6854 = vmatpush3.bf16.msra.mxu1 %v8421_v53 }
 0x49e   : > { %6855 = vmatprep.subr.bf16.mxu1 %v8435_v30 }
 0x4a1   : > { %6856 = vmatpush3.bf16.msra.mxu1 %v8435_v30 }
 0x4a2   : > { %6857 = vmatprep.subr.bf16.mxu1 %v8449_v28 }
 0x4a5   : > { %6858 = vmatpush3.bf16.msra.mxu1 %v8449_v28 }
 0x4a6   : > { %6859 = vmatprep.subr.bf16.mxu1 %v8463_v47 }
 0x4a9   : > { %6860 = vmatpush3.bf16.msra.mxu1 %v8463_v47 }
 0x4aa   : > { %6861 = vmatprep.subr.bf16.mxu1 %v8473_v4 }
 0x4ad   : > { %6862 = vmatpush3.bf16.msra.mxu1 %v8473_v4 }
 0x4eb   : > { %v1836_v13 = vpop.f32.mrb[12].mxu0 }
 0x4ec   : > { %v6665_v27 = vpop.f32.mrb[13].mxu0  ;;  %v1843_v32 = vsel %vm1168_vm4, %v1836_v13, -3.4028235e+38 }
 0x4ed   : > { %v1839_v56 = vpop.f32.mrb[14].mxu0 }
 0x4ee   : > { %v1844_v43 = vsel %vm1169_vm3, %v1839_v56, -3.4028235e+38  ;;  %v6666_v40 = vpop.f32.mrb[15].mxu0 }
 0x4ef   : > { %v1845_v42 = vmax.f32 %v1843_v32, %v1844_v43 }
 0x4f1   : > { %v1846_v21 = vrot.slane %v1845_v42, 4 }
 0x4f3   : > { %v1847_v39 = vmax.f32 %v1845_v42, %v1846_v21 }
 0x4f5   : > { %v1848_v31 = vrot.slane %v1847_v39, 2 }
 0x4f7   : > { %v1849_v22 = vmax.f32 %v1847_v39, %v1848_v31 }
 0x4f9   : > { %v1850_v5 = vrot.slane %v1849_v22, 1 }
 0x4fb   : > { %v1851_v7 = vmax.f32 %v1849_v22, %v1850_v5  ;;  %v7149_v22 = vld [vmem:[%s10319_s10 + $0x40] sm:$0xff]  }
 0x4fd   : > { %v1852_v8 = vsub.f32 %v1843_v32, %v1851_v7  ;;  %v1853_v9 = vsub.f32 %v1844_v43, %v1851_v7 }
 0x4ff   : > { %v1854_v6 = vmul.f32 1.442695, %v1852_v8  ;;  %v1856_v3 = vmul.f32 1.442695, %v1853_v9 }
 0x501   : > { %7287 = vpow2.f32 %v1854_v6 }
 0x502   : > { %7289 = vpow2.f32 %v1856_v3 }
 0x50b   : > { %v7288_v25 = vpop.eup %7287 }
 0x50c   : > { %v7290_v18 = vpop.eup %7289 }
 0x50d   : > { %v1858_v29 = vadd.f32 %v7290_v18, %v7288_v25 }
 0x50f   : > { %v1859_v33 = vrot.slane %v1858_v29, 4 }
 0x511   : > { %v1860_v35 = vadd.f32 %v1859_v33, %v1858_v29  ;;  %v7152_v29 = vld [vmem:[%s10319_s10 + $0x58] sm:$0xff]   ;;  %v7153_v33 = vld [vmem:[%s10319_s10 + $0x60] sm:$0xff]  }
 0x513   : > { %v1861_v36 = vrot.slane %v1860_v35, 2 }
 0x515   : > { %v1862_v34 = vadd.f32 %v1861_v36, %v1860_v35  ;;  %v7155_v35 = vld [vmem:[%s10319_s10 + $0x70] sm:$0xff]   ;;  %v7157_v36 = vld [vmem:[%s10319_s10] sm:$0xff]  }
 0x517   : > { %v1863_v41 = vrot.slane %v1862_v34, 1 }
 0x519   : > { %v1864_v44 = vadd.f32 %v1863_v41, %v1862_v34  ;;  %v7158_v34 = vld [vmem:[%s10319_s10 + $0x8] sm:$0xff]   ;;  %v7159_v41 = vld [vmem:[%s10319_s10 + $0x10] sm:$0xff]  }
 0x51b   : > { %7291 = vrcp.f32 %v1864_v44  ;;  %v7160_v44 = vld [vmem:[%s10319_s10 + $0x18] sm:$0xff]  }
 0x525   : > { %v7292_v46 = vpop.eup %7291 }
 0x526   : > { %v1866_v49 = vmul.f32 %v7292_v46, %v7288_v25  ;;  %v1867_v10 = vmul.f32 %v7292_v46, %v7290_v18  ;;  %v7150_v25 = vld [vmem:[%s10319_s10 + $0x48] sm:$0xff]   ;;  %v7151_v18 = vld [vmem:[%s10319_s10 + $0x50] sm:$0xff]   ;;  %v7161_v46 = vld [vmem:[%s10319_s10 + $0x20] sm:$0xff]  }
 0x528   : > { %5904 = vst [vmem:[%s8617_s18 + $0x10] sm:$0xff] %v1866_v49  ;;  %5905 = vst [vmem:[%s8617_s18 + $0x18] sm:$0xff] %v1867_v10  ;;  %v1871_v52 = vpack.c.bf16 %v1867_v10, %v1866_v49 }
 0x52a   : > { %6667 = vmatprep.subr.bf16.mxu0 %v1871_v52 }
 0x52b   : > { %6668 = vmatpush3.bf16.msra.mxu0 %v1871_v52 }
 0x52e   : > { %6670 = vmatmul.mubr.msk.bf16.vlgmr.msra.gmra.mrb[16].mxu0 %vm980_vm1, %v1798_v24 }
 0x52f   : > { %6677 = vmatprep.mubr.msk.bf16.mxu0 %vm1410_vm2, %v7149_v22 }
 0x543   : > { %v2548_v51 = vpop.f32.mrb[28].mxu1 }
 0x544   : > { %v6779_v63 = vpop.f32.mrb[29].mxu1  ;;  %v2555_v48 = vsel %vm1168_vm4, %v2548_v51, -3.4028235e+38 }
 0x545   : > { %v2551_v50 = vpop.f32.mrb[30].mxu1  ;;  %v7167_v63 = vld [vmem:[%s10319_s10 + $0x80] sm:$0xff]  }
 0x546   : > { %v2556_v54 = vsel %vm1169_vm3, %v2551_v50, -3.4028235e+38  ;;  %v6780_v58 = vpop.f32.mrb[31].mxu1 }
 0x547   : > { %v2557_v61 = vmax.f32 %v2555_v48, %v2556_v54 }
 0x549   : > { %v2558_v20 = vrot.slane %v2557_v61, 4 }
 0x54b   : > { %v2559_v59 = vmax.f32 %v2557_v61, %v2558_v20 }
 0x54d   : > { %v2560_v14 = vrot.slane %v2559_v59, 2 }
 0x54f   : > { %v2561_v16 = vmax.f32 %v2559_v59, %v2560_v14 }
 0x551   : > { %v2562_v17 = vrot.slane %v2561_v16, 1 }
 0x553   : > { %v2563_v60 = vmax.f32 %v2561_v16, %v2562_v17 }
 0x555   : > { %v2564_v23 = vsub.f32 %v2555_v48, %v2563_v60  ;;  %v2565_v1 = vsub.f32 %v2556_v54, %v2563_v60 }
 0x557   : > { %v2566_v24 = vmul.f32 1.442695, %v2564_v23  ;;  %v2568_v55 = vmul.f32 1.442695, %v2565_v1  ;;  %v7168_v23 = vld [vmem:[%s10319_s10 + $0x88] sm:$0xff]   ;;  %v7169_v1 = vld [vmem:[%s10317_s8 + $0xc0] sm:$0xff]  }
 0x559   : > { %7293 = vpow2.f32 %v2566_v24  ;;  %v7171_v24 = vld [vmem:[%s10319_s10 + $0x90] sm:$0xff]  }
 0x55a   : > { %7295 = vpow2.f32 %v2568_v55  ;;  %v7170_v55 = vld [vmem:[%s10317_s8 + $0xc8] sm:$0xff]  }
 0x563   : > { %v7294_v0 = vpop.eup %7293 }
 0x564   : > { %v7296_v2 = vpop.eup %7295 }
 0x565   : > { %v2570_v11 = vadd.f32 %v7296_v2, %v7294_v0 }
 0x567   : > { %v2571_v13 = vrot.slane %v2570_v11, 4 }
 0x569   : > { %v2572_v27 = vadd.f32 %v2571_v13, %v2570_v11  ;;  %v7175_v11 = vld [vmem:[%s10319_s10 + $0xa0] sm:$0xff]   ;;  %v7174_v13 = vld [vmem:[%s10317_s8 + $0xd8] sm:$0xff]  }
 0x56b   : > { %v2573_v56 = vrot.slane %v2572_v27, 2 }
 0x56d   : > { %v2574_v32 = vadd.f32 %v2573_v56, %v2572_v27  ;;  %v7176_v27 = vld [vmem:[%s10319_s10 + $0xa8] sm:$0xff]   ;;  %v7177_v56 = vld [vmem:[%s10317_s8 + $0xe0] sm:$0xff]  }
 0x56f   : > { %v2575_v43 = vrot.slane %v2574_v32, 1 }
 0x571   : > { %v2576_v40 = vadd.f32 %v2575_v43, %v2574_v32  ;;  %v7179_v32 = vld [vmem:[%s10319_s10 + $0xb0] sm:$0xff]   ;;  %v7178_v43 = vld [vmem:[%s10317_s8 + $0xe8] sm:$0xff]  }
 0x573   : > { %7297 = vrcp.f32 %v2576_v40  ;;  %v7180_v40 = vld [vmem:[%s10319_s10 + $0xb8] sm:$0xff]  }
 0x57d   : > { %v7298_v42 = vpop.eup %7297 }
 0x57e   : > { %v2578_v21 = vmul.f32 %v7298_v42, %v7294_v0  ;;  %v2579_v39 = vmul.f32 %v7298_v42, %v7296_v2  ;;  %v7172_v0 = vld [vmem:[%s10319_s10 + $0x98] sm:$0xff]   ;;  %v7173_v2 = vld [vmem:[%s10317_s8 + $0xd0] sm:$0xff]  }
 0x57f   : > { %v7181_v42 = vld [vmem:[%s10317_s8 + $0xf0] sm:$0xff]  }
 0x580   : > { %5993 = vst [vmem:[%s8617_s18 + $0x20] sm:$0xff] %v2578_v21  ;;  %5994 = vst [vmem:[%s8617_s18 + $0x28] sm:$0xff] %v2579_v39  ;;  %v8798_v31 = vpack.c.bf16 %v2579_v39, %v2578_v21  ;;  %v7182_v21 = vld [vmem:[%s10317_s8 + $0xf8] sm:$0xff]   ;;  %v7183_v39 = vld [vmem:[%s10318_s9 + $0x30] sm:$0xff]  }
 0x581   : > { %6863 = vmatprep.mubr.bf16.mxu1 %v7183_v39  ;;  %v7445_v39 = vld [vmem:[%s7814_s24 + $0x10] sm:$0xff] }
 0x601   : > { %v6671_v5 = vpop.f32.mrb[16].mxu0 }
 0x602   : > { %v1912_v7 = vpop.f32.mrb[17].mxu0 }
 0x603   : > { %v6672_v8 = vpop.f32.mrb[18].mxu0 }
 0x604   : > { %v1945_v9 = vpack.c.bf16 %v6672_v8, %v6671_v5  ;;  %v1915_v6 = vpop.f32.mrb[19].mxu0 }
 0x605   : > { %v1944_v3 = vpack.c.bf16 %v1915_v6, %v1912_v7 }
 0x607   : > { %6673 = vmatprep.subr.bf16.mxu0 %v1944_v3 }
 0x608   : > { %6674 = vmatpush3.bf16.msra.mxu0 %v1944_v3 }
 0x609   : > { %6675 = vmatprep.subr.bf16.mxu0 %v1945_v9 }
 0x60c   : > { %6676 = vmatpush3.bf16.msra.mxu0 %v1945_v9 }
 0x60d   : > { %6693 = vmatprep.subr.bf16.mxu0 %v8728_v45 }
 0x60f   : > { %6678 = vmatmul.mubr.msk.bf16.vlgmr.msra.gmra.mrb[20].mxu0 %vm1410_vm2, %v7150_v25 }
 0x610   : > { %6694 = vmatpush3.bf16.msra.mxu0 %v8728_v45  ;;  %6681 = vmatprep.mubr.msk.bf16.mxu0 %vm1410_vm2, %v7151_v18  ;;  %v7154_v45 = vld [vmem:[%s10319_s10 + $0x68] sm:$0xff]  }
 0x611   : > { %6695 = vmatprep.subr.bf16.mxu0 %v8726_v57 }
 0x614   : > { %6696 = vmatpush3.bf16.msra.mxu0 %v8726_v57  ;;  %v7156_v57 = vld [vmem:[%s10319_s10 + $0x78] sm:$0xff]  }
 0x615   : > { %6753 = vmatprep.subr.bf16.mxu0 %v8380_v62 }
 0x617   : > { %6682 = vmatmul.mubr.msk.bf16.gmra.mrb[24].mxu0 %vm1410_vm2, %v7152_v29 }
 0x618   : > { %6685 = vmatprep.mubr.msk.bf16.mxu0 %vm1410_vm2, %v7153_v33 }
 0x61f   : > { %6686 = vmatmul.mubr.msk.bf16.gmra.mrb[28].mxu0 %vm1410_vm2, %v7154_v45 }
 0x620   : > { %6689 = vmatprep.mubr.msk.bf16.mxu0 %vm1410_vm2, %v7155_v35 }
 0x627   : > { %6690 = vmatmul.mubr.msk.bf16.gmra.mrb[32].mxu0 %vm1410_vm2, %v7156_v57 }
 0x628   : > { %6697 = vmatprep.mubr.msk.bf16.mxu0 %vm1410_vm2, %v7157_v36 }
 0x62f   : > { %6698 = vmatmul.mubr.msk.bf16.vlgmr.msra.gmra.mrb[20].mxu0 %vm1410_vm2, %v7158_v34 }
 0x630   : > { %6754 = vmatpush3.bf16.msra.mxu0 %v8380_v62  ;;  %6701 = vmatprep.mubr.msk.bf16.mxu0 %vm1410_vm2, %v7159_v41  ;;  %v7162_v62 = vld [vmem:[%s10319_s10 + $0x28] sm:$0xff]  }
 0x631   : > { %6755 = vmatprep.subr.bf16.mxu0 %v8393_v19 }
 0x634   : > { %6756 = vmatpush3.bf16.msra.mxu0 %v8393_v19  ;;  %v7163_v19 = vld [vmem:[%s10319_s10 + $0x30] sm:$0xff]  }
 0x635   : > { %6757 = vmatprep.subr.bf16.mxu0 %v8407_v37 }
 0x637   : > { %6702 = vmatmul.mubr.msk.bf16.gmra.mrb[24].mxu0 %vm1410_vm2, %v7160_v44 }
 0x638   : > { %6758 = vmatpush3.bf16.msra.mxu0 %v8407_v37  ;;  %6705 = vmatprep.mubr.msk.bf16.mxu0 %vm1410_vm2, %v7161_v46  ;;  %v7164_v37 = vld [vmem:[%s10319_s10 + $0x38] sm:$0xff]  }
 0x639   : > { %6759 = vmatprep.subr.bf16.mxu0 %v8421_v53 }
 0x63c   : > { %6760 = vmatpush3.bf16.msra.mxu0 %v8421_v53  ;;  %v7165_v53 = vld [vmem:[%s10318_s9 + $0x20] sm:$0xff]  }
 0x63d   : > { %6761 = vmatprep.subr.bf16.mxu0 %v8435_v30 }
 0x63f   : > { %6706 = vmatmul.mubr.msk.bf16.gmra.mrb[28].mxu0 %vm1410_vm2, %v7162_v62 }
 0x640   : > { %6762 = vmatpush3.bf16.msra.mxu0 %v8435_v30  ;;  %6709 = vmatprep.mubr.msk.bf16.mxu0 %vm1410_vm2, %v7163_v19  ;;  %v7166_v30 = vld [vmem:[%s10318_s9 + $0x28] sm:$0xff]  }
 0x641   : > { %6763 = vmatprep.subr.bf16.mxu0 %v8449_v28 }
 0x644   : > { %6764 = vmatpush3.bf16.msra.mxu0 %v8449_v28 }
 0x645   : > { %6765 = vmatprep.subr.bf16.mxu0 %v8463_v47 }
 0x647   : > { %6710 = vmatmul.mubr.msk.bf16.gmra.mrb[32].mxu0 %vm1410_vm2, %v7164_v37 }
 0x648   : > { %6766 = vmatpush3.bf16.msra.mxu0 %v8463_v47  ;;  %6769 = vmatprep.mubr.bf16.mxu0 %v7165_v53 }
 0x649   : > { %6767 = vmatprep.subr.bf16.mxu0 %v8473_v4 }
 0x64c   : > { %6768 = vmatpush3.bf16.msra.mxu0 %v8473_v4  ;;  %v6825_v4 = vpop.f32.mrb[32].mxu1 }
 0x64d   : > { %6781 = vmatprep.subr.bf16.mxu0 %v8798_v31  ;;  %v2886_v50 = vpop.f32.mrb[33].mxu1 }
 0x64e   : > { %v6826_v48 = vpop.f32.mrb[34].mxu1 }
 0x64f   : > { %6770 = vmatmul.mubr.bf16.vlgmr.msra.gmra.mrb[36].mxu0 %v7166_v30  ;;  %v2902_v54 = vpack.c.bf16 %v6826_v48, %v6825_v4  ;;  %v2889_v58 = vpop.f32.mrb[35].mxu1 }
 0x650   : > { %6782 = vmatpush3.bf16.msra.mxu0 %v8798_v31  ;;  %v2901_v61 = vpack.c.bf16 %v2889_v58, %v2886_v50  ;;  %v7184_v31 = vld [vmem:[%s10318_s9 + $0x38] sm:$0xff]  }
 0x651   : > { %6864 = vmatmul.mubr.bf16.vlgmr.msra.gmra.mrb[36].mxu1 %v7184_v31 }
 0x722   : > { %v6771_v28 = vpop.f32.mrb[36].mxu0 }
 0x723   : > { %v2494_v49 = vpop.f32.mrb[37].mxu0 }
 0x724   : > { %v6772_v10 = vpop.f32.mrb[38].mxu0  ;;  %v6865_v9 = vpop.f32.mrb[36].mxu1 }
 0x725   : > { %v2510_v52 = vpack.c.bf16 %v6772_v10, %v6771_v28  ;;  %v2497_v51 = vpop.f32.mrb[39].mxu0 }
 0x726   : > { %v2509_v47 = vpack.c.bf16 %v2497_v51, %v2494_v49 }
 0x728   : > { %6783 = vmatprep.mubr.msk.bf16.mxu0 %vm980_vm1, %v2509_v47 }
 0x729   : > { %6784 = vmatmul.mubr.msk.bf16.vlgmr.msra.gmra.mrb[40].mxu0 %vm980_vm1, %v2510_v52 }
 0x72a   : > { %6791 = vmatprep.mubr.msk.bf16.mxu0 %vm1410_vm2, %v7167_v63 }
 0x7fc   : > { %v6785_v20 = vpop.f32.mrb[40].mxu0 }
 0x7fd   : > { %v2624_v59 = vpop.f32.mrb[41].mxu0 }
 0x7fe   : > { %v6786_v14 = vpop.f32.mrb[42].mxu0 }
 0x7ff   : > { %v2657_v16 = vpack.c.bf16 %v6786_v14, %v6785_v20  ;;  %v2627_v17 = vpop.f32.mrb[43].mxu0  ;;  %v7185_v20 = vld [vmem:[%s10319_s10 + $0xc0] sm:$0xff]  }
 0x800   : > { %v2656_v60 = vpack.c.bf16 %v2627_v17, %v2624_v59 }
 0x802   : > { %6787 = vmatprep.subr.bf16.mxu0 %v2656_v60 }
 0x803   : > { %6788 = vmatpush3.bf16.msra.mxu0 %v2656_v60 }
 0x804   : > { %6789 = vmatprep.subr.bf16.mxu0 %v2657_v16 }
 0x807   : > { %6790 = vmatpush3.bf16.msra.mxu0 %v2657_v16 }
 0x808   : > { %6827 = vmatprep.subr.bf16.mxu0 %v7589_v38 }
 0x80a   : > { %6792 = vmatmul.mubr.msk.bf16.vlgmr.msra.gmra.mrb[20].mxu0 %vm1410_vm2, %v7168_v23 }
 0x80b   : > { %6828 = vmatpush3.bf16.msra.mxu0 %v7169_v1  ;;  %6795 = vmatprep.mubr.msk.bf16.mxu0 %vm1410_vm2, %v7171_v24  ;;  %v7186_v1 = vld [vmem:[%s10319_s10 + $0xc8] sm:$0xff]   ;;  %v7187_v24 = vld [vmem:[%s10319_s10 + $0xd0] sm:$0xff]  }
 0x80c   : > { %6829 = vmatprep.subr.bf16.mxu0 %v7589_v38 }
 0x80f   : > { %6830 = vmatpush3.bf16.msra.mxu0 %v7170_v55  ;;  %v7188_v55 = vld [vmem:[%s10319_s10 + $0xd8] sm:$0xff]  }
 0x810   : > { %6831 = vmatprep.subr.bf16.mxu0 %v7589_v38 }
 0x812   : > { %6796 = vmatmul.mubr.msk.bf16.gmra.mrb[24].mxu0 %vm1410_vm2, %v7172_v0  ;;  %v7189_v0 = vld [vmem:[%s10319_s10 + $0xe0] sm:$0xff]  }
 0x813   : > { %6832 = vmatpush3.bf16.msra.mxu0 %v7173_v2  ;;  %6799 = vmatprep.mubr.msk.bf16.mxu0 %vm1410_vm2, %v7175_v11  ;;  %v7190_v2 = vld [vmem:[%s10319_s10 + $0xe8] sm:$0xff]   ;;  %v7191_v11 = vld [vmem:[%s10319_s10 + $0xf0] sm:$0xff]  }
 0x814   : > { %6833 = vmatprep.subr.bf16.mxu0 %v7589_v38 }
 0x817   : > { %6834 = vmatpush3.bf16.msra.mxu0 %v7174_v13  ;;  %v7192_v13 = vld [vmem:[%s10319_s10 + $0xf8] sm:$0xff]  }
 0x818   : > { %6835 = vmatprep.subr.bf16.mxu0 %v7589_v38 }
 0x81a   : > { %6800 = vmatmul.mubr.msk.bf16.gmra.mrb[28].mxu0 %vm1410_vm2, %v7176_v27  ;;  %v7193_v27 = vld [vmem:[%s10321_s12] sm:$0xff]  }
 0x81b   : > { %6836 = vmatpush3.bf16.msra.mxu0 %v7177_v56  ;;  %6803 = vmatprep.mubr.msk.bf16.mxu0 %vm1410_vm2, %v7179_v32 }
 0x81c   : > { %6837 = vmatprep.subr.bf16.mxu0 %v7589_v38  ;;  %6917 = vmatprep.mubr.bf16.mxu1 %v7193_v27 }
 0x81f   : > { %6838 = vmatpush3.bf16.msra.mxu0 %v7178_v43  ;;  %v7444_v43 = vld [vmem:[%s7814_s24] sm:$0xff] }
 0x820   : > { %6839 = vmatprep.subr.bf16.mxu0 %v7589_v38 }
 0x822   : > { %6804 = vmatmul.mubr.msk.bf16.gmra.mrb[32].mxu0 %vm1410_vm2, %v7180_v40 }
 0x823   : > { %6840 = vmatpush3.bf16.msra.mxu0 %v7181_v42  ;;  %6843 = vmatprep.mubr.msk.bf16.mxu0 %vm7590_vm0, %v7589_v38 }
 0x824   : > { %6841 = vmatprep.subr.bf16.mxu0 %v7589_v38 }
 0x827   : > { %6842 = vmatpush3.bf16.msra.mxu0 %v7182_v21 }
 0x828   : > { %6867 = vmatprep.subr.bf16.mxu0 %v7589_v38 }
 0x82a   : > { %6844 = vmatmul.mubr.bf16.vlgmr.msra.gmra.mrb[44].mxu0 %v8305_v12 }
 0x82b   : > { %6868 = vmatpush3.bf16.msra.mxu0 %v2901_v61  ;;  %6871 = vmatprep.mubr.msk.bf16.mxu0 %vm7590_vm0, %v7589_v38 }
 0x82c   : > { %6869 = vmatprep.subr.bf16.mxu0 %v7589_v38  ;;  %v3061_v38 = vpop.f32.mrb[37].mxu1 }
 0x82d   : > { %v6866_v6 = vpop.f32.mrb[38].mxu1 }
 0x82e   : > { %v3077_v3 = vpack.c.bf16 %v6866_v6, %v6865_v9  ;;  %v3064_v25 = vpop.f32.mrb[39].mxu1 }
 0x82f   : > { %6870 = vmatpush3.bf16.msra.mxu0 %v2902_v54  ;;  %v3076_v18 = vpack.c.bf16 %v3064_v25, %v3061_v38 }
 0x8fd   : > { %v3002_v22 = vpop.f32.mrb[44].mxu0 }
 0x8fe   : > { %v6845_v5 = vpop.f32.mrb[45].mxu0 }
 0x8ff   : > { %v3005_v12 = vpop.f32.mrb[46].mxu0 }
 0x900   : > { %v3009_v7 = vpack.c.bf16 %v3005_v12, %v3002_v22  ;;  %v6846_v8 = vpop.f32.mrb[47].mxu0  ;;  %v7446_v22 = vld [vmem:[%s7814_s24 + $0x8] sm:$0xff] }
 0x902   : > { %6872 = vmatmul.mubr.msk.bf16.vlgmr.msra.gmra.mrb[48].mxu0 %vm1410_vm2, %v3009_v7  ;;  %v7447_v7 = vld [vmem:[%s7814_s24 + $0x18] sm:$0xff] }
 0x903   : > { %6877 = vmatprep.mubr.msk.bf16.mxu0 %vm980_vm1, %v3076_v18 }
 0x9d5   : > { %v3115_v29 = vpop.f32.mrb[48].mxu0 }
 0x9d6   : > { %v6873_v33 = vpop.f32.mrb[49].mxu0  ;;  %v3122_v35 = vsel %vm1168_vm4, %v3115_v29, -3.4028235e+38 }
 0x9d7   : > { %v3118_v45 = vpop.f32.mrb[50].mxu0  ;;  %v7448_v33 = vld [vmem:[%s7814_s24 + $0x20] sm:$0xff] }
 0x9d8   : > { %v3123_v57 = vsel %vm1169_vm3, %v3118_v45, -3.4028235e+38  ;;  %v6874_v36 = vpop.f32.mrb[51].mxu0 }
 0x9d9   : > { %v3124_v34 = vmax.f32 %v3122_v35, %v3123_v57  ;;  %v7449_v36 = vld [vmem:[%s7814_s24 + $0x30] sm:$0xff] }
 0x9db   : > { %v3125_v41 = vrot.slane %v3124_v34, 4 }
 0x9dd   : > { %v3126_v44 = vmax.f32 %v3124_v34, %v3125_v41 }
 0x9df   : > { %v3127_v46 = vrot.slane %v3126_v44, 2 }
 0x9e1   : > { %v3128_v62 = vmax.f32 %v3126_v44, %v3127_v46  ;;  %v7450_v46 = vld [vmem:[%s7814_s24 + $0x28] sm:$0xff] }
 0x9e3   : > { %v3129_v19 = vrot.slane %v3128_v62, 1 }
 0x9e5   : > { %v3130_v37 = vmax.f32 %v3128_v62, %v3129_v19 }
 0x9e7   : > { %v3131_v53 = vsub.f32 %v3122_v35, %v3130_v37  ;;  %v3132_v30 = vsub.f32 %v3123_v57, %v3130_v37  ;;  %v7451_v37 = vld [vmem:[%s7814_s24 + $0x38] sm:$0xff] }
 0x9e9   : > { %v3133_v28 = vmul.f32 1.442695, %v3131_v53  ;;  %v3135_v49 = vmul.f32 1.442695, %v3132_v30 }
 0x9eb   : > { %7299 = vpow2.f32 %v3133_v28 }
 0x9ec   : > { %7301 = vpow2.f32 %v3135_v49 }
 0x9f5   : > { %v7300_v15 = vpop.eup %7299 }
 0x9f6   : > { %v7302_v10 = vpop.eup %7301 }
 0x9f7   : > { %v3137_v26 = vadd.f32 %v7302_v10, %v7300_v15 }
 0x9f9   : > { %v3138_v52 = vrot.slane %v3137_v26, 4 }
 0x9fb   : > { %v3139_v51 = vadd.f32 %v3138_v52, %v3137_v26 }
 0x9fd   : > { %v3140_v47 = vrot.slane %v3139_v51, 2 }
 0x9ff   : > { %v3141_v63 = vadd.f32 %v3140_v47, %v3139_v51  ;;  %v7452_v51 = vld [vmem:[%s7814_s24 + $0x40] sm:$0xff] }
 0xa01   : > { %v3142_v4 = vrot.slane %v3141_v63, 1 }
 0xa03   : > { %v3143_v50 = vadd.f32 %v3142_v4, %v3141_v63 }
 0xa05   : > { %7303 = vrcp.f32 %v3143_v50  ;;  %v7453_v50 = vld [vmem:[%s7814_s24 + $0x50] sm:$0xff] }
 0xa0f   : > { %v7304_v48 = vpop.eup %7303 }
 0xa10   : > { %v3145_v54 = vmul.f32 %v7304_v48, %v7300_v15  ;;  %v3146_v58 = vmul.f32 %v7304_v48, %v7302_v10 }
 0xa12   : > { %6066 = vst [vmem:[%s8617_s18 + $0x30] sm:$0xff] %v3145_v54  ;;  %6067 = vst [vmem:[%s8617_s18 + $0x38] sm:$0xff] %v3146_v58  ;;  %v3150_v61 = vpack.c.bf16 %v3146_v58, %v3145_v54 }
 0xa14   : > { %6875 = vmatprep.subr.bf16.mxu0 %v3150_v61 }
 0xa15   : > { %6876 = vmatpush3.bf16.msra.mxu0 %v3150_v61  ;;  %v7454_v61 = vld [vmem:[%s7814_s24 + $0x48] sm:$0xff] }
 0xa18   : > { %6878 = vmatmul.mubr.msk.bf16.vlgmr.msra.gmra.mrb[52].mxu0 %vm980_vm1, %v3077_v3 }
 0xa19   : > { %6885 = vmatprep.mubr.msk.bf16.mxu0 %vm1410_vm2, %v7185_v20 }
 0xaeb   : > { %v6879_v59 = vpop.f32.mrb[52].mxu0 }
 0xaec   : > { %v3191_v14 = vpop.f32.mrb[53].mxu0 }
 0xaed   : > { %v6880_v16 = vpop.f32.mrb[54].mxu0 }
 0xaee   : > { %v3224_v17 = vpack.c.bf16 %v6880_v16, %v6879_v59  ;;  %v3194_v60 = vpop.f32.mrb[55].mxu0 }
 0xaef   : > { %v3223_v23 = vpack.c.bf16 %v3194_v60, %v3191_v14  ;;  %v7455_v14 = vld [vmem:[%s7814_s24 + $0x58] sm:$0xff] }
 0xaf1   : > { %6881 = vmatprep.subr.bf16.mxu0 %v3223_v23 }
 0xaf2   : > { %6882 = vmatpush3.bf16.msra.mxu0 %v3223_v23 }
 0xaf3   : > { %6883 = vmatprep.subr.bf16.mxu0 %v3224_v17 }
 0xaf6   : > { %6884 = vmatpush3.bf16.msra.mxu0 %v3224_v17 }
 0xaf9   : > { %6886 = vmatmul.mubr.msk.bf16.vlgmr.msra.gmra.mrb[20].mxu0 %vm1410_vm2, %v7186_v1 }
 0xafa   : > { %6889 = vmatprep.mubr.msk.bf16.mxu0 %vm1410_vm2, %v7187_v24 }
 0xb01   : > { %6890 = vmatmul.mubr.msk.bf16.gmra.mrb[24].mxu0 %vm1410_vm2, %v7188_v55 }
 0xb02   : > { %6893 = vmatprep.mubr.msk.bf16.mxu0 %vm1410_vm2, %v7189_v0 }
 0xb09   : > { %6894 = vmatmul.mubr.msk.bf16.gmra.mrb[28].mxu0 %vm1410_vm2, %v7190_v2  ;;  %v7456_v2 = vld [vmem:[%s7814_s24 + $0x60] sm:$0xff] }
 0xb0a   : > { %6897 = vmatprep.mubr.msk.bf16.mxu0 %vm1410_vm2, %v7191_v11 }
 0xb11   : > { %6898 = vmatmul.mubr.msk.bf16.gmra.mrb[32].mxu0 %vm1410_vm2, %v7192_v13 }
 0xbcc   : > { %v6887_v56 = vpop.f32.mrb[20].mxu0 }
 0xbcd   : > { %v3323_v32 = vpop.f32.mrb[21].mxu0  ;;  %v9019_v31 = vadd.f32 %v7445_v39, %v6887_v56  ;;  %v7457_v56 = vld [vmem:[%s7814_s24 + $0x70] sm:$0xff] }
 0xbce   : > { %v9016_v40 = vadd.f32 %v7444_v43, %v3323_v32  ;;  %v6888_v42 = vpop.f32.mrb[22].mxu0 }
 0xbcf   : > { %v3326_v21 = vpop.f32.mrb[23].mxu0  ;;  %10388 = vst [vmem:[#allocation19_spill] sm:$0xff] %v9019_v31  ;;  %v9027_v8 = vadd.f32 %v7447_v7, %v6888_v42  ;;  %v3420_v38 = vmul.f32 %v9019_v31, %v9019_v31 }
 0xbd0   : > { %10387 = vst [vmem:[#allocation18_spill] sm:$0xff] %v9016_v40  ;;  %v9022_v5 = vadd.f32 %v7446_v22, %v3326_v21  ;;  %v3418_v12 = vmul.f32 %v9016_v40, %v9016_v40  ;;  %v7458_v21 = vld [vmem:[%s7814_s24 + $0x68] sm:$0xff] }
 0xbd1   : > { %10390 = vst [vmem:[#allocation21_spill] sm:$0xff] %v9027_v8  ;;  %v3421_v18 = vmul.f32 %v9027_v8, %v9027_v8 }
 0xbd2   : > { %10389 = vst [vmem:[#allocation20_spill] sm:$0xff] %v9022_v5  ;;  %v3419_v9 = vmul.f32 %v9022_v5, %v9022_v5 }
 0xbd4   : > { %v3434_v6 = vadd.f32 %v3419_v9, %v3418_v12  ;;  %v6891_v3 = vpop.f32.mrb[24].mxu0  ;;  %v7459_v12 = vld [vmem:[%s7814_s24 + $0x78] sm:$0xff]  ;;  %s10140_s24 = scalar_lea.hbm %s10448_s19, %s6171_s16 }
 0xbd5   : > { %v3339_v25 = vpop.f32.mrb[25].mxu0  ;;  %v9039_v34 = vadd.f32 %v7449_v36, %v6891_v3  ;;  %v3497_v36 = vpop.permute.xlu1 %3496 }
 0xbd6   : > { %v3435_v29 = vadd.f32 %v3434_v6, %v3420_v38  ;;  %v9036_v45 = vadd.f32 %v7448_v33, %v3339_v25  ;;  %v6892_v35 = vpop.f32.mrb[26].mxu0 }
 0xbd7   : > { %v3342_v57 = vpop.f32.mrb[27].mxu0  ;;  %10392 = vst [vmem:[#allocation23_spill] sm:$0xff] %v9039_v34  ;;  %v9047_v53 = vadd.f32 %v7451_v37, %v6892_v35  ;;  %v3424_v28 = vmul.f32 %v9039_v34, %v9039_v34 }
 0xbd8   : > { %10391 = vst [vmem:[#allocation22_spill] sm:$0xff] %v9036_v45  ;;  %v3422_v41 = vmul.f32 %v9036_v45, %v9036_v45  ;;  %v3436_v44 = vadd.f32 %v3435_v29, %v3421_v18  ;;  %v9044_v62 = vadd.f32 %v7450_v46, %v3342_v57 }
 0xbd9   : > { %10394 = vst [vmem:[#allocation25_spill] sm:$0xff] %v9047_v53  ;;  %v3425_v26 = vmul.f32 %v9047_v53, %v9047_v53  ;;  %v3507_v37 = vpop.permute.xlu1 %3506 }
 0xbda   : > { %10393 = vst [vmem:[#allocation24_spill] sm:$0xff] %v9044_v62  ;;  %v3437_v19 = vadd.f32 %v3436_v44, %v3422_v41  ;;  %v3423_v30 = vmul.f32 %v9044_v62, %v9044_v62  ;;  %v3492_v41 = vpop.permute.xlu0 %3491 }
 0xbdc   : > { %v3438_v49 = vadd.f32 %v3437_v19, %v3423_v30  ;;  %v6895_v15 = vpop.f32.mrb[28].mxu0 }
 0xbdd   : > { %v3355_v10 = vpop.f32.mrb[29].mxu0  ;;  %v9059_v48 = vadd.f32 %v7453_v50, %v6895_v15 }
 0xbde   : > { %v3439_v52 = vadd.f32 %v3438_v49, %v3424_v28  ;;  %v9056_v47 = vadd.f32 %v7452_v51, %v3355_v10  ;;  %v6896_v63 = vpop.f32.mrb[30].mxu0  ;;  %v3502_v30 = vpop.permute.xlu0 %3501 }
 0xbdf   : > { %v3358_v4 = vpop.f32.mrb[31].mxu0  ;;  %10396 = vst [vmem:[#allocation27_spill] sm:$0xff] %v9059_v48  ;;  %v9067_v16 = vadd.f32 %v7455_v14, %v6896_v63  ;;  %v3428_v60 = vmul.f32 %v9059_v48, %v9059_v48  ;;  %v3517_v28 = vpop.permute.xlu1 %3516 }
 0xbe0   : > { %10395 = vst [vmem:[#allocation26_spill] sm:$0xff] %v9056_v47  ;;  %v3426_v54 = vmul.f32 %v9056_v47, %v9056_v47  ;;  %v3440_v58 = vadd.f32 %v3439_v52, %v3425_v26  ;;  %v9064_v20 = vadd.f32 %v7454_v61, %v3358_v4 }
 0xbe1   : > { %10398 = vst [vmem:[#allocation29_spill] sm:$0xff] %v9067_v16  ;;  %v3429_v55 = vmul.f32 %v9067_v16, %v9067_v16 }
 0xbe2   : > { %10397 = vst [vmem:[#allocation28_spill] sm:$0xff] %v9064_v20  ;;  %v3441_v59 = vadd.f32 %v3440_v58, %v3426_v54  ;;  %v3427_v17 = vmul.f32 %v9064_v20, %v9064_v20  ;;  %v3512_v49 = vpop.permute.xlu0 %3511 }
 0xbe3   : > { %v3527_v51 = vpop.permute.xlu1 %3526 }
 0xbe4   : > { %v3442_v23 = vadd.f32 %v3441_v59, %v3427_v17  ;;  %v6899_v1 = vpop.f32.mrb[32].mxu0 }
 0xbe5   : > { %v3371_v24 = vpop.f32.mrb[33].mxu0  ;;  %v9079_v32 = vadd.f32 %v7457_v56, %v6899_v1 }
 0xbe6   : > { %v3443_v0 = vadd.f32 %v3442_v23, %v3428_v60  ;;  %v9076_v11 = vadd.f32 %v7456_v2, %v3371_v24  ;;  %v6900_v13 = vpop.f32.mrb[34].mxu0  ;;  %v3522_v63 = vpop.permute.xlu0 %3521 }
 0xbe7   : > { %v3374_v27 = vpop.f32.mrb[35].mxu0  ;;  %10400 = vst [vmem:[#allocation31_spill] sm:$0xff] %v9079_v32  ;;  %v9087_v7 = vadd.f32 %v7459_v12, %v6900_v13  ;;  %v3432_v38 = vmul.f32 %v9079_v32, %v9079_v32 }
 0xbe8   : > { %10399 = vst [vmem:[#allocation30_spill] sm:$0xff] %v9076_v11  ;;  %v3430_v43 = vmul.f32 %v9076_v11, %v9076_v11  ;;  %v3444_v42 = vadd.f32 %v3443_v0, %v3429_v55  ;;  %v9084_v39 = vadd.f32 %v7458_v21, %v3374_v27  ;;  %v3537_v0 = vpop.permute.xlu1 %3536 }
 0xbe9   : > { %10402 = vst [vmem:[#allocation33_spill] sm:$0xff] %v9087_v7  ;;  %v3433_v3 = vmul.f32 %v9087_v7, %v9087_v7 }
 0xbea   : > { %10401 = vst [vmem:[#allocation32_spill] sm:$0xff] %v9084_v39  ;;  %v3445_v22 = vadd.f32 %v3444_v42, %v3430_v43  ;;  %v3431_v9 = vmul.f32 %v9084_v39, %v9084_v39  ;;  %v3532_v2 = vpop.permute.xlu0 %3531 }
 0xbec   : > { %v3446_v6 = vadd.f32 %v3445_v22, %v3431_v9  ;;  %v3547_v21 = vpop.permute.xlu1 %3546 }
 0xbee   : > { %v3447_v25 = vadd.f32 %v3446_v6, %v3432_v38  ;;  %v3542_v22 = vpop.permute.xlu0 %3541 }
 0xbf0   : > { %v3448_v18 = vadd.f32 %v3447_v25, %v3433_v3 }
 0xbf2   : > { %v3449_v29 = vrot.slane %v3448_v18, 4 }
 0xbf4   : > { %v3450_v33 = vadd.f32 %v3449_v29, %v3448_v18 }
 0xbf6   : > { %v3451_v35 = vrot.slane %v3450_v33, 2 }
 0xbf8   : > { %v3452_v57 = vadd.f32 %v3451_v35, %v3450_v33 }
 0xbfa   : > { %v3453_v44 = vrot.slane %v3452_v57, 1 }
 0xbfc   : > { %v3454_v46 = vadd.f32 %v3453_v44, %v3452_v57  ;;  %v3557_v57 = vpop.permute.xlu1 %3556 }
 0xbfe   : > { %v3455_v19 = vmax.f32 %v3454_v46, 1e-24 }
 0xc00   : > { %7305 = vrsqrt.f32 %v3455_v19 }
 0xc0a   : > { %v7306_v15 = vpop.eup %7305 }
 0xc0b   : > { %v3457_v10 = vmul.f32 %v7306_v15, %v9016_v40  ;;  %v3458_v26 = vmul.f32 %v7306_v15, %v9022_v5  ;;  %v3459_v52 = vmul.f32 %v7306_v15, %v9019_v31  ;;  %v3460_v4 = vmul.f32 %v7306_v15, %v9027_v8 }
 0xc0c   : > { %v3461_v50 = vmul.f32 %v7306_v15, %v9036_v45  ;;  %v3462_v59 = vmul.f32 %v7306_v15, %v9044_v62  ;;  %v3463_v60 = vmul.f32 %v7306_v15, %v9039_v34  ;;  %v3464_v55 = vmul.f32 %v7306_v15, %v9047_v53 }
 0xc0d   : > { %v3569_v54 = vmul.f32 %v3492_v41, %v3457_v10  ;;  %v3570_v58 = vmul.f32 %v3497_v36, %v3458_v26  ;;  %v3571_v61 = vmul.f32 %v3502_v30, %v3459_v52  ;;  %v3572_v14 = vmul.f32 %v3507_v37, %v3460_v4  ;;  %v3552_v36 = vpop.permute.xlu0 %3551  ;;  %v3567_v30 = vpop.permute.xlu1 %3566  ;;  %v7197_v4 = vld [vmem:[%s10321_s12 + $0x20] sm:$0xff]  }
 0xc0e   : > { %v3573_v1 = vmul.f32 %v3512_v49, %v3461_v50  ;;  %v3574_v24 = vmul.f32 %v3517_v28, %v3462_v59  ;;  %v3575_v13 = vmul.f32 %v3522_v63, %v3463_v60  ;;  %v3576_v56 = vmul.f32 %v3527_v51, %v3464_v55  ;;  %v7194_v51 = vld [vmem:[%s10321_s12 + $0x8] sm:$0xff]   ;;  %v7196_v63 = vld [vmem:[%s10321_s12 + $0x18] sm:$0xff]   ;;  %v7205_v60 = vld [vmem:[%s10321_s12 + $0x60] sm:$0xff]  }
 0xc0f   : > { %v3585_v17 = vpack.c.bf16 %v3570_v58, %v3569_v54  ;;  %v3586_v23 = vpack.c.bf16 %v3572_v14, %v3571_v61  ;;  %v3465_v43 = vmul.f32 %v7306_v15, %v9056_v47  ;;  %v3466_v42 = vmul.f32 %v7306_v15, %v9064_v20  ;;  %v7198_v50 = vld [vmem:[%s10321_s12 + $0x28] sm:$0xff]   ;;  %v7199_v54 = vld [vmem:[%s10321_s12 + $0x30] sm:$0xff]   ;;  %v7200_v58 = vld [vmem:[%s10321_s12 + $0x38] sm:$0xff]  }
 0xc10   : > { %v3587_v27 = vpack.c.bf16 %v3574_v24, %v3573_v1  ;;  %v3467_v12 = vmul.f32 %v7306_v15, %v9059_v48  ;;  %v3588_v9 = vpack.c.bf16 %v3576_v56, %v3575_v13  ;;  %v3468_v3 = vmul.f32 %v7306_v15, %v9067_v16  ;;  %v7201_v61 = vld [vmem:[%s10321_s12 + $0x40] sm:$0xff]   ;;  %v7202_v59 = vld [vmem:[%s10321_s12 + $0x48] sm:$0xff]   ;;  %v7203_v14 = vld [vmem:[%s10321_s12 + $0x50] sm:$0xff]  }
 0xc11   : > { %6901 = vmatprep.subr.bf16.mxu1 %v3585_v17  ;;  %v3577_v38 = vmul.f32 %v3532_v2, %v3465_v43  ;;  %v3578_v6 = vmul.f32 %v3537_v0, %v3466_v42  ;;  %v3470_v25 = vmul.f32 %v7306_v15, %v9084_v39  ;;  %v3469_v35 = vmul.f32 %v7306_v15, %v9076_v11  ;;  %v3562_v28 = vpop.permute.xlu0 %3561  ;;  %v7207_v1 = vld [vmem:[%s10321_s12 + $0x70] sm:$0xff]   ;;  %v7208_v24 = vld [vmem:[%s10321_s12 + $0x78] sm:$0xff]   ;;  %v7209_v55 = vld [vmem:[%s10321_s12 + $0x80] sm:$0xff]  }
 0xc12   : > { %6902 = vmatpush3.bf16.msra.mxu1 %v3585_v17  ;;  %v3579_v29 = vmul.f32 %v3542_v22, %v3467_v12  ;;  %v3580_v33 = vmul.f32 %v3547_v21, %v3468_v3  ;;  %v3471_v19 = vmul.f32 %v7306_v15, %v9079_v32  ;;  %v3472_v37 = vmul.f32 %v7306_v15, %v9087_v7  ;;  %v7195_v15 = vld [vmem:[%s10321_s12 + $0x10] sm:$0xff]   ;;  %v7204_v17 = vld [vmem:[%s10321_s12 + $0x58] sm:$0xff]   ;;  %v7210_v0 = vld [vmem:[%s10321_s12 + $0x88] sm:$0xff]  }
 0xc13   : > { %6903 = vmatprep.subr.bf16.mxu1 %v3586_v23  ;;  %v3589_v18 = vpack.c.bf16 %v3578_v6, %v3577_v38  ;;  %v3582_v41 = vmul.f32 %v3557_v57, %v3470_v25  ;;  %v3581_v46 = vmul.f32 %v3552_v36, %v3469_v35  ;;  %v7211_v2 = vld [vmem:[%s10321_s12 + $0x90] sm:$0xff]   ;;  %v7212_v13 = vld [vmem:[%s10321_s12 + $0x98] sm:$0xff]   ;;  %v7214_v56 = vld [vmem:[%s10321_s12 + $0xa8] sm:$0xff]  }
 0xc14   : > { %v3590_v44 = vpack.c.bf16 %v3580_v33, %v3579_v29  ;;  %v3583_v10 = vmul.f32 %v3562_v28, %v3471_v19  ;;  %v3584_v26 = vmul.f32 %v3567_v30, %v3472_v37  ;;  %v7215_v43 = vld [vmem:[%s10321_s12 + $0xb0] sm:$0xff]   ;;  %v7216_v42 = vld [vmem:[%s10321_s12 + $0xb8] sm:$0xff]   ;;  %v7217_v21 = vld [vmem:[%s10321_s12 + $0xc0] sm:$0xff]   ;;  %v9206_v29 = vpop.permute.xlu1 %3808 }
 0xc15   : > { %v3591_v49 = vpack.c.bf16 %v3582_v41, %v3581_v46  ;;  %v7218_v22 = vld [vmem:[%s10321_s12 + $0xc8] sm:$0xff]   ;;  %v7219_v12 = vld [vmem:[%s10321_s12 + $0xd0] sm:$0xff]   ;;  %v7221_v38 = vld [vmem:[%s10321_s12 + $0xe0] sm:$0xff]  }
 0xc16   : > { %6904 = vmatpush3.bf16.msra.mxu1 %v3586_v23  ;;  %v3592_v52 = vpack.c.bf16 %v3584_v26, %v3583_v10  ;;  %v7206_v23 = vld [vmem:[%s10321_s12 + $0x68] sm:$0xff]   ;;  %v7223_v3 = vld [vmem:[%s10321_s12 + $0xf0] sm:$0xff]   ;;  %v7224_v25 = vld [vmem:[%s10321_s12 + $0xf8] sm:$0xff]  }
 0xc17   : > { %6905 = vmatprep.subr.bf16.mxu1 %v3587_v27  ;;  %v7222_v6 = vld [vmem:[%s10321_s12 + $0xe8] sm:$0xff]  }
 0xc18   : > { %v3729_v35 = vpop.permute.xlu1 %3728 }
 0xc1a   : > { %6906 = vmatpush3.bf16.msra.mxu1 %v3587_v27  ;;  %v7213_v27 = vld [vmem:[%s10321_s12 + $0xa0] sm:$0xff]  }
 0xc1b   : > { %6907 = vmatprep.subr.bf16.mxu1 %v3588_v9 }
 0xc1c   : > { %v9210_v36 = vpop.permute.xlu1 %3818 }
 0xc1e   : > { %6908 = vmatpush3.bf16.msra.mxu1 %v3588_v9  ;;  %v7220_v9 = vld [vmem:[%s10321_s12 + $0xd8] sm:$0xff]  }
 0xc1f   : > { %6909 = vmatprep.subr.bf16.mxu1 %v3589_v18 }
 0xc22   : > { %6910 = vmatpush3.bf16.msra.mxu1 %v3589_v18  ;;  %v9204_v18 = vpop.permute.xlu0 %3803 }
 0xc23   : > { %6911 = vmatprep.subr.bf16.mxu1 %v3590_v44 }
 0xc26   : > { %6912 = vmatpush3.bf16.msra.mxu1 %v3590_v44  ;;  %v3724_v33 = vpop.permute.xlu0 %3723  ;;  %v3739_v44 = vpop.permute.xlu1 %3738 }
 0xc27   : > { %6913 = vmatprep.subr.bf16.mxu1 %v3591_v49 }
 0xc2a   : > { %6914 = vmatpush3.bf16.msra.mxu1 %v3591_v49  ;;  %v9208_v57 = vpop.permute.xlu0 %3813  ;;  %v9214_v19 = vpop.permute.xlu1 %3828 }
 0xc2b   : > { %6915 = vmatprep.subr.bf16.mxu1 %v3592_v52 }
 0xc2e   : > { %6916 = vmatpush3.bf16.msra.mxu1 %v3592_v52  ;;  %v3734_v41 = vpop.permute.xlu0 %3733  ;;  %v3749_v30 = vpop.permute.xlu1 %3748 }
 0xc31   : > { %6918 = vmatmul.mubr.bf16.vlgmr.msra.gmra.mrb[40].mxu1 %v7194_v51 }
 0xc32   : > { %6921 = vmatprep.mubr.bf16.mxu1 %v7195_v15  ;;  %v9212_v46 = vpop.permute.xlu0 %3823  ;;  %v9218_v49 = vpop.permute.xlu1 %3838 }
 0xc36   : > { %v3744_v37 = vpop.permute.xlu0 %3743  ;;  %v3759_v26 = vpop.permute.xlu1 %3758 }
 0xc39   : > { %6922 = vmatmul.mubr.bf16.gmra.mrb[44].mxu1 %v7196_v63 }
 0xc3a   : > { %6925 = vmatprep.mubr.bf16.mxu1 %v7197_v4  ;;  %v9216_v28 = vpop.permute.xlu0 %3833  ;;  %v9222_v51 = vpop.permute.xlu1 %3848 }
 0xc3e   : > { %v3754_v10 = vpop.permute.xlu0 %3753  ;;  %v9226_v63 = vpop.permute.xlu1 %3768 }
 0xc41   : > { %6926 = vmatmul.mubr.bf16.gmra.mrb[48].mxu1 %v7198_v50 }
 0xc42   : > { %6929 = vmatprep.mubr.bf16.mxu1 %v7199_v54  ;;  %v9220_v52 = vpop.permute.xlu0 %3843  ;;  %v9230_v50 = vpop.permute.xlu1 %3858 }
 0xc46   : > { %v9224_v15 = vpop.permute.xlu0 %3763 }
 0xc49   : > { %6930 = vmatmul.mubr.bf16.gmra.mrb[52].mxu1 %v7200_v58  ;;  %v9234_v58 = vpop.permute.xlu1 %3778 }
 0xc4a   : > { %6933 = vmatprep.mubr.bf16.mxu1 %v7201_v61  ;;  %v9228_v4 = vpop.permute.xlu0 %3853 }
 0xc4e   : > { %v9232_v54 = vpop.permute.xlu0 %3773 }
 0xc51   : > { %6934 = vmatmul.mubr.bf16.gmra.mrb[56].mxu1 %v7202_v59  ;;  %v9238_v59 = vpop.permute.xlu1 %3868 }
 0xc52   : > { %6937 = vmatprep.mubr.bf16.mxu1 %v7203_v14  ;;  %v9236_v61 = vpop.permute.xlu0 %3863 }
 0xc59   : > { %6938 = vmatmul.mubr.bf16.gmra.mrb[60].mxu1 %v7204_v17 }
 0xc5a   : > { %6941 = vmatprep.mubr.bf16.mxu1 %v7205_v60 }
 0xc61   : > { %6942 = vmatmul.mubr.bf16.gmra.mrb[64].mxu1 %v7206_v23 }
 0xc62   : > { %6945 = vmatprep.mubr.bf16.mxu1 %v7207_v1 }
 0xc69   : > { %6946 = vmatmul.mubr.bf16.gmra.mrb[68].mxu1 %v7208_v24 }
 0xc6a   : > { %6949 = vmatprep.mubr.bf16.mxu1 %v7209_v55 }
 0xc71   : > { %6950 = vmatmul.mubr.bf16.gmra.mrb[72].mxu1 %v7210_v0 }
 0xc72   : > { %6953 = vmatprep.mubr.bf16.mxu1 %v7211_v2  ;;  %v9248_v2 = vpop.permute.xlu0 %3783 }
 0xc79   : > { %6954 = vmatmul.mubr.bf16.gmra.mrb[76].mxu1 %v7212_v13 }
 0xc7a   : > { %6957 = vmatprep.mubr.bf16.mxu1 %v7213_v27 }
 0xc81   : > { %6958 = vmatmul.mubr.bf16.gmra.mrb[80].mxu1 %v7214_v56  ;;  %v9254_v56 = vpop.permute.xlu1 %3788 }
 0xc82   : > { %6961 = vmatprep.mubr.bf16.mxu1 %v7215_v43 }
 0xc89   : > { %6962 = vmatmul.mubr.bf16.gmra.mrb[84].mxu1 %v7216_v42 }
 0xc8a   : > { %6965 = vmatprep.mubr.bf16.mxu1 %v7217_v21 }
 0xc91   : > { %6966 = vmatmul.mubr.bf16.gmra.mrb[88].mxu1 %v7218_v22 }
 0xc92   : > { %6969 = vmatprep.mubr.bf16.mxu1 %v7219_v12 }
 0xc99   : > { %6970 = vmatmul.mubr.bf16.gmra.mrb[92].mxu1 %v7220_v9 }
 0xc9a   : > { %6973 = vmatprep.mubr.bf16.mxu1 %v7221_v38 }
 0xca1   : > { %6974 = vmatmul.mubr.bf16.gmra.mrb[96].mxu1 %v7222_v6 }
 0xca2   : > { %6977 = vmatprep.mubr.bf16.mxu1 %v7223_v3 }
 0xca9   : > { %6978 = vmatmul.mubr.bf16.gmra.mrb[100].mxu1 %v7224_v25 }
 0xd04   : > { %v6919_v14 = vpop.f32.mrb[40].mxu1 }
 0xd05   : > { %v9240_v17 = vadd.f32 %v6919_v14, %v3734_v41  ;;  %v4267_v60 = vpop.f32.mrb[41].mxu1 }
 0xd06   : > { %v9242_v23 = vadd.f32 %v4267_v60, %v3724_v33  ;;  %v6920_v1 = vpop.f32.mrb[42].mxu1 }
 0xd07   : > { %v4524_v24 = vmul.f32 %v9240_v17, %v9240_v17  ;;  %v9246_v55 = vadd.f32 %v6920_v1, %v3739_v44  ;;  %v4270_v0 = vpop.f32.mrb[43].mxu1  ;;  %v9267_v44 = vpop.permute.xlu0 %3873 }
 0xd08   : > { %v4522_v13 = vmul.f32 %v9242_v23, %v9242_v23  ;;  %v9252_v27 = vadd.f32 %v4270_v0, %v3729_v35  ;;  %v9272_v0 = vpop.permute.xlu1 %3878 }
 0xd09   : > { %v4588_v43 = vmul.f32 %v4524_v24, %v9240_v17  ;;  %v4525_v42 = vmul.f32 %v9246_v55, %v9246_v55 }
 0xd0a   : > { %v4586_v21 = vmul.f32 %v4522_v13, %v9242_v23  ;;  %v4523_v22 = vmul.f32 %v9252_v27, %v9252_v27 }
 0xd0b   : > { %v4652_v12 = vmul.f32 0.044715, %v4588_v43  ;;  %v4589_v9 = vmul.f32 %v4525_v42, %v9246_v55 }
 0xd0c   : > { %v4650_v38 = vmul.f32 0.044715, %v4586_v21  ;;  %v4587_v6 = vmul.f32 %v4523_v22, %v9252_v27  ;;  %v6923_v3 = vpop.f32.mrb[44].mxu1 }
 0xd0d   : > { %v4716_v25 = vadd.f32 %v4652_v12, %v9240_v17  ;;  %v4653_v33 = vmul.f32 0.044715, %v4589_v9  ;;  %v9265_v35 = vadd.f32 %v6923_v3, %v3754_v10  ;;  %v4283_v41 = vpop.f32.mrb[45].mxu1 }
 0xd0e   : > { %v4714_v14 = vadd.f32 %v4650_v38, %v9242_v23  ;;  %v4651_v60 = vmul.f32 0.044715, %v4587_v6  ;;  %v9270_v1 = vadd.f32 %v4283_v41, %v3744_v37  ;;  %v6924_v24 = vpop.f32.mrb[46].mxu1 }
 0xd0f   : > { %v4780_v13 = vmul.f32 0.7978846, %v4716_v25  ;;  %v4717_v43 = vadd.f32 %v4653_v33, %v9246_v55  ;;  %v4528_v42 = vmul.f32 %v9265_v35, %v9265_v35  ;;  %v9277_v21 = vadd.f32 %v6924_v24, %v3759_v26  ;;  %v4286_v10 = vpop.f32.mrb[47].mxu1 }
 0xd10   : > { %v4778_v22 = vmul.f32 0.7978846, %v4714_v14  ;;  %v4715_v12 = vadd.f32 %v4651_v60, %v9252_v27  ;;  %v4526_v9 = vmul.f32 %v9270_v1, %v9270_v1  ;;  %v9282_v37 = vadd.f32 %v4286_v10, %v3749_v30  ;;  %v7227_v30 = vld [vmem:[%s10403_s4 + $0x4] ss:$16 sps:$4 sm:$0xff]   ;;  %v3794_v60 = vpop.permute.xlu0 %3793 }
 0xd11   : > { %7307 = vtanh.f32 %v4780_v13  ;;  %v4781_v38 = vmul.f32 0.7978846, %v4717_v43  ;;  %v4592_v6 = vmul.f32 %v4528_v42, %v9265_v35  ;;  %v4529_v3 = vmul.f32 %v9277_v21, %v9277_v21  ;;  %v9295_v42 = vpop.permute.xlu1 %3798  ;;  %5450 = vmatprep.mubr.bf16.mxu0 %v7227_v30 }
 0xd12   : > { %7309 = vtanh.f32 %v4778_v22  ;;  %v4779_v25 = vmul.f32 0.7978846, %v4715_v12  ;;  %v4590_v26 = vmul.f32 %v4526_v9, %v9270_v1  ;;  %v4527_v33 = vmul.f32 %v9282_v37, %v9282_v37 }
 0xd13   : > { %7311 = vtanh.f32 %v4781_v38  ;;  %v4656_v41 = vmul.f32 0.044715, %v4592_v6  ;;  %v4593_v14 = vmul.f32 %v4529_v3, %v9277_v21 }
 0xd14   : > { %7313 = vtanh.f32 %v4779_v25  ;;  %v4654_v24 = vmul.f32 0.044715, %v4590_v26  ;;  %v4591_v13 = vmul.f32 %v4527_v33, %v9282_v37  ;;  %v6927_v43 = vpop.f32.mrb[48].mxu1 }
 0xd15   : > { %v4720_v10 = vadd.f32 %v4656_v41, %v9265_v35  ;;  %v4657_v22 = vmul.f32 0.044715, %v4593_v14  ;;  %v9299_v12 = vadd.f32 %v6927_v43, %v9232_v54  ;;  %v4299_v9 = vpop.f32.mrb[49].mxu1 }
 0xd16   : > { %v4718_v38 = vadd.f32 %v4654_v24, %v9270_v1  ;;  %v4655_v6 = vmul.f32 0.044715, %v4591_v13  ;;  %v9303_v3 = vadd.f32 %v4299_v9, %v9224_v15  ;;  %v6928_v25 = vpop.f32.mrb[50].mxu1 }
 0xd17   : > { %v4784_v26 = vmul.f32 0.7978846, %v4720_v10  ;;  %v4721_v33 = vadd.f32 %v4657_v22, %v9277_v21  ;;  %v4532_v7 = vmul.f32 %v9299_v12, %v9299_v12  ;;  %v9309_v41 = vadd.f32 %v6928_v25, %v9234_v58  ;;  %v4302_v54 = vpop.f32.mrb[51].mxu1  ;;  %v9320_v22 = vpop.permute.xlu0 %3963 }
 0xd18   : > { %v4782_v14 = vmul.f32 0.7978846, %v4718_v38  ;;  %v4719_v30 = vadd.f32 %v4655_v6, %v9282_v37  ;;  %v4530_v24 = vmul.f32 %v9303_v3, %v9303_v3  ;;  %v9315_v15 = vadd.f32 %v4302_v54, %v9226_v63  ;;  %10404 = vst [vmem:[#allocation34_spill] sm:$0xff] %v9320_v22  ;;  %v9325_v25 = vpop.permute.xlu1 %3968 }
 0xd19   : > { %7315 = vtanh.f32 %v4784_v26  ;;  %v4785_v13 = vmul.f32 0.7978846, %v4721_v33  ;;  %v4596_v43 = vmul.f32 %v4532_v7, %v9299_v12  ;;  %v4533_v10 = vmul.f32 %v9309_v41, %v9309_v41  ;;  %10405 = vst [vmem:[#allocation35_spill] sm:$0xff] %v9325_v25 }
 0xd1a   : > { %7317 = vtanh.f32 %v4782_v14  ;;  %v4783_v58 = vmul.f32 0.7978846, %v4719_v30  ;;  %v4594_v9 = vmul.f32 %v4530_v24, %v9303_v3  ;;  %v4531_v38 = vmul.f32 %v9315_v15, %v9315_v15 }
 0xd1b   : > { %v7308_v6 = vpop.eup %7307  ;;  %7319 = vtanh.f32 %v4785_v13  ;;  %v4660_v63 = vmul.f32 0.044715, %v4596_v43  ;;  %v4597_v26 = vmul.f32 %v4533_v10, %v9309_v41 }
 0xd1c   : > { %v7310_v7 = vpop.eup %7309  ;;  %v4908_v33 = vadd.f32 1.0, %v7308_v6  ;;  %7321 = vtanh.f32 %v4783_v58  ;;  %v4658_v54 = vmul.f32 0.044715, %v4594_v9  ;;  %v4595_v32 = vmul.f32 %v4531_v38, %v9315_v15  ;;  %v6931_v14 = vpop.f32.mrb[52].mxu1 }
 0xd1d   : > { %v7312_v30 = vpop.eup %7311  ;;  %v4906_v39 = vadd.f32 1.0, %v7310_v7  ;;  %v4724_v24 = vadd.f32 %v4660_v63, %v9299_v12  ;;  %v4661_v11 = vmul.f32 0.044715, %v4597_v26  ;;  %v9330_v16 = vadd.f32 %v6931_v14, %v3794_v60  ;;  %v4315_v48 = vpop.f32.mrb[53].mxu1 }
 0xd1e   : > { %v7314_v20 = vpop.eup %7313  ;;  %v4972_v13 = vmul.f32 0.5, %v4908_v33  ;;  %v4909_v43 = vadd.f32 1.0, %v7312_v30  ;;  %v4722_v10 = vadd.f32 %v4658_v54, %v9303_v3  ;;  %v4659_v47 = vmul.f32 0.044715, %v4595_v32  ;;  %v6932_v6 = vpop.f32.mrb[54].mxu1 }
 0xd1f   : > { %v4970_v58 = vmul.f32 0.5, %v4906_v39  ;;  %v4907_v9 = vadd.f32 1.0, %v7314_v20  ;;  %v4788_v53 = vmul.f32 0.7978846, %v4724_v24  ;;  %v4725_v38 = vadd.f32 %v4661_v11, %v9309_v41  ;;  %v4318_v34 = vpop.f32.mrb[55].mxu1  ;;  %v9334_v7 = vpop.permute.xlu0 %3883 }
 0xd20   : > { %v9337_v63 = vmul.f32 %v4972_v13, %v9240_v17  ;;  %v4973_v60 = vmul.f32 0.5, %v4909_v43  ;;  %v4786_v26 = vmul.f32 0.7978846, %v4722_v10  ;;  %v4723_v33 = vadd.f32 %v4659_v47, %v9315_v15  ;;  %v9340_v14 = vpop.permute.xlu1 %3888 }
 0xd21   : > { %v9343_v32 = vmul.f32 %v4970_v58, %v9242_v23  ;;  %v4971_v39 = vmul.f32 0.5, %v4907_v9  ;;  %7323 = vtanh.f32 %v4788_v53  ;;  %v4789_v20 = vmul.f32 0.7978846, %v4725_v38 }
 0xd22   : > { %v9346_v11 = vmul.f32 %v4973_v60, %v9246_v55  ;;  %7325 = vtanh.f32 %v4786_v26  ;;  %v4787_v54 = vmul.f32 0.7978846, %v4723_v33  ;;  %v4536_v17 = vmul.f32 %v9330_v16, %v9330_v16 }
 0xd23   : > { %v7316_v30 = vpop.eup %7315  ;;  %v9351_v24 = vmul.f32 %v4971_v39, %v9252_v27  ;;  %7327 = vtanh.f32 %v4789_v20  ;;  %v9354_v47 = vadd.f32 %v4315_v48, %v9248_v2  ;;  %v9357_v23 = vadd.f32 %v6932_v6, %v9295_v42  ;;  %v9370_v38 = vpop.permute.xlu0 %3973 }
 0xd24   : > { %v7318_v53 = vpop.eup %7317  ;;  %v4912_v13 = vadd.f32 1.0, %v7316_v30  ;;  %7329 = vtanh.f32 %v4787_v54  ;;  %v4600_v55 = vmul.f32 %v4536_v17, %v9330_v16  ;;  %v9361_v43 = vadd.f32 %v4318_v34, %v9254_v56  ;;  %v6935_v10 = vpop.f32.mrb[56].mxu1  ;;  %10406 = vst [vmem:[#allocation36_spill] sm:$0xff] %v9370_v38 }
 0xd25   : > { %v7320_v58 = vpop.eup %7319  ;;  %v4910_v9 = vadd.f32 1.0, %v7318_v53  ;;  %v4534_v27 = vmul.f32 %v9354_v47, %v9354_v47  ;;  %v4537_v48 = vmul.f32 %v9357_v23, %v9357_v23  ;;  %v9368_v2 = vadd.f32 %v6935_v10, %v9208_v57  ;;  %v4331_v42 = vpop.f32.mrb[57].mxu1 }
 0xd26   : > { %v7322_v6 = vpop.eup %7321  ;;  %v4976_v60 = vmul.f32 0.5, %v4912_v13  ;;  %v4913_v26 = vadd.f32 1.0, %v7320_v58  ;;  %v4664_v34 = vmul.f32 0.044715, %v4600_v55  ;;  %v4535_v56 = vmul.f32 %v9361_v43, %v9361_v43  ;;  %v6936_v33 = vpop.f32.mrb[58].mxu1 }
 0xd27   : > { %v9374_v39 = vpop.permute.xlu1 %3978  ;;  %v4974_v20 = vmul.f32 0.5, %v4910_v9  ;;  %v4911_v54 = vadd.f32 1.0, %v7322_v6  ;;  %v4598_v17 = vmul.f32 %v4534_v27, %v9354_v47  ;;  %v4601_v57 = vmul.f32 %v4537_v48, %v9357_v23  ;;  %v4334_v30 = vpop.f32.mrb[59].mxu1 }
 0xd28   : > { %10407 = vst [vmem:[#allocation37_spill] sm:$0xff] %v9374_v39  ;;  %v9379_v53 = vmul.f32 %v4976_v60, %v9265_v35  ;;  %v4977_v10 = vmul.f32 0.5, %v4913_v26  ;;  %v4728_v13 = vadd.f32 %v4664_v34, %v9330_v16  ;;  %v4599_v55 = vmul.f32 %v4535_v56, %v9361_v43 }
 0xd29   : > { %v9384_v58 = vmul.f32 %v4974_v20, %v9270_v1  ;;  %v4975_v62 = vmul.f32 0.5, %v4911_v54  ;;  %v4662_v45 = vmul.f32 0.044715, %v4598_v17  ;;  %v4665_v9 = vmul.f32 0.044715, %v4601_v57  ;;  %v9399_v54 = vpop.permute.xlu0 %3893 }
 0xd2a   : > { %v9387_v6 = vmul.f32 %v4977_v10, %v9277_v21  ;;  %v4792_v27 = vmul.f32 0.7978846, %v4728_v13  ;;  %v4663_v48 = vmul.f32 0.044715, %v4599_v55  ;;  %v4540_v35 = vmul.f32 %v9368_v2, %v9368_v2 }
 0xd2b   : > { %v7324_v60 = vpop.eup %7323  ;;  %v9392_v26 = vmul.f32 %v4975_v62, %v9282_v37  ;;  %v4726_v34 = vadd.f32 %v4662_v45, %v9354_v47  ;;  %v4729_v1 = vadd.f32 %v4665_v9, %v9357_v23  ;;  %v9397_v56 = vadd.f32 %v4331_v42, %v9204_v18  ;;  %v9403_v62 = vpop.permute.xlu1 %3898 }
 0xd2c   : > { %v7326_v20 = vpop.eup %7325  ;;  %v4916_v21 = vadd.f32 1.0, %v7324_v60  ;;  %7331 = vtanh.f32 %v4792_v27  ;;  %v4727_v17 = vadd.f32 %v4663_v48, %v9361_v43  ;;  %v4604_v57 = vmul.f32 %v4540_v35, %v9368_v2  ;;  %v6939_v10 = vpop.f32.mrb[60].mxu1 }
 0xd2d   : > { %v7328_v13 = vpop.eup %7327  ;;  %v4914_v37 = vadd.f32 1.0, %v7326_v20  ;;  %v4790_v45 = vmul.f32 0.7978846, %v4726_v34  ;;  %v4793_v55 = vmul.f32 0.7978846, %v4729_v1  ;;  %v4538_v18 = vmul.f32 %v9397_v56, %v9397_v56  ;;  %v4347_v42 = vpop.f32.mrb[61].mxu1 }
 0xd2e   : > { %v7330_v9 = vpop.eup %7329  ;;  %v4980_v8 = vmul.f32 0.5, %v4916_v21  ;;  %v4917_v31 = vadd.f32 1.0, %v7328_v13  ;;  %v4791_v60 = vmul.f32 0.7978846, %v4727_v17  ;;  %v4668_v27 = vmul.f32 0.044715, %v4604_v57  ;;  %v9415_v57 = vpop.permute.xlu0 %3983 }
 0xd2f   : > { %v4978_v5 = vmul.f32 0.5, %v4914_v37  ;;  %v4915_v48 = vadd.f32 1.0, %v7330_v9  ;;  %7333 = vtanh.f32 %v4790_v45  ;;  %v4602_v35 = vmul.f32 %v4538_v18, %v9397_v56  ;;  %v6940_v40 = vpop.f32.mrb[62].mxu1  ;;  %10409 = vst [vmem:[#allocation39_spill] sm:$0xff] %v9415_v57 }
 0xd30   : > { %v9409_v25 = vmul.f32 %v4980_v8, %v9299_v12  ;;  %v4981_v34 = vmul.f32 0.5, %v4917_v31  ;;  %7335 = vtanh.f32 %v4793_v55  ;;  %v4732_v1 = vadd.f32 %v4668_v27, %v9368_v2  ;;  %v4350_v20 = vpop.f32.mrb[63].mxu1  ;;  %v9426_v12 = vpop.permute.xlu1 %3988 }
 0xd31   : > { %v9413_v39 = vmul.f32 %v4978_v5, %v9303_v3  ;;  %v4979_v21 = vmul.f32 0.5, %v4915_v48  ;;  %7337 = vtanh.f32 %v4791_v60  ;;  %v4666_v17 = vmul.f32 0.044715, %v4602_v35  ;;  %10411 = vst [vmem:[#allocation41_spill] sm:$0xff] %v9426_v12 }
 0xd32   : > { %10408 = vst [vmem:[#allocation38_spill] sm:$0xff] %v9409_v25  ;;  %v9418_v13 = vmul.f32 %v4981_v34, %v9309_v41  ;;  %v4796_v37 = vmul.f32 0.7978846, %v4732_v1  ;;  %v9421_v8 = vadd.f32 %v6936_v33, %v9210_v36  ;;  %v9424_v31 = vadd.f32 %v4334_v30, %v9206_v29  ;;  %v9461_v34 = vpop.permute.xlu0 %3903 }
 0xd33   : > { %v9429_v5 = vmul.f32 %v4979_v21, %v9315_v15  ;;  %v4730_v3 = vadd.f32 %v4666_v17, %v9397_v56  ;;  %v9433_v45 = vadd.f32 %v6939_v10, %v9216_v28  ;;  %v9436_v41 = vadd.f32 %v4347_v42, %v9212_v46 }
 0xd34   : > { %10410 = vst [vmem:[#allocation40_spill] sm:$0xff] %v9418_v13  ;;  %7339 = vtanh.f32 %v4796_v37  ;;  %v4541_v36 = vmul.f32 %v9421_v8, %v9421_v8  ;;  %v4539_v29 = vmul.f32 %v9424_v31, %v9424_v31  ;;  %v9443_v33 = vadd.f32 %v6940_v40, %v9218_v49  ;;  %v6943_v15 = vpop.f32.mrb[64].mxu1 }
 0xd35   : > { %10412 = vst [vmem:[#allocation42_spill] sm:$0xff] %v9429_v5  ;;  %v4794_v30 = vmul.f32 0.7978846, %v4730_v3  ;;  %v4544_v55 = vmul.f32 %v9433_v45, %v9433_v45  ;;  %v4542_v28 = vmul.f32 %v9436_v41, %v9436_v41  ;;  %v9450_v46 = vadd.f32 %v4350_v20, %v9214_v19  ;;  %v4363_v10 = vpop.f32.mrb[65].mxu1 }
 0xd36   : > { %v7332_v18 = vpop.eup %7331  ;;  %v4605_v42 = vmul.f32 %v4541_v36, %v9421_v8  ;;  %v4603_v9 = vmul.f32 %v4539_v29, %v9424_v31  ;;  %v4545_v40 = vmul.f32 %v9443_v33, %v9443_v33  ;;  %v9457_v49 = vadd.f32 %v6943_v15, %v9228_v4  ;;  %v6944_v60 = vpop.f32.mrb[66].mxu1 }
 0xd37   : > { %v4920_v27 = vadd.f32 1.0, %v7332_v18  ;;  %7341 = vtanh.f32 %v4794_v30  ;;  %v4608_v48 = vmul.f32 %v4544_v55, %v9433_v45  ;;  %v4606_v19 = vmul.f32 %v4542_v28, %v9436_v41  ;;  %v4366_v35 = vpop.f32.mrb[67].mxu1  ;;  %v9466_v4 = vpop.permute.xlu1 %3908 }
 0xd38   : > { %v4669_v1 = vmul.f32 0.044715, %v4605_v42  ;;  %v4667_v20 = vmul.f32 0.044715, %v4603_v9  ;;  %v4609_v21 = vmul.f32 %v4545_v40, %v9443_v33  ;;  %v4543_v17 = vmul.f32 %v9450_v46, %v9450_v46  ;;  %v9480_v5 = vpop.permute.xlu0 %3993 }
 0xd39   : > { %v7334_v37 = vpop.eup %7333  ;;  %v4984_v3 = vmul.f32 0.5, %v4920_v27  ;;  %v4672_v36 = vmul.f32 0.044715, %v4608_v48  ;;  %v4670_v29 = vmul.f32 0.044715, %v4606_v19  ;;  %v4548_v15 = vmul.f32 %v9457_v49, %v9457_v49  ;;  %10414 = vst [vmem:[#allocation44_spill] sm:$0xff] %v9480_v5 }
 0xd3a   : > { %v7336_v30 = vpop.eup %7335  ;;  %v4918_v55 = vadd.f32 1.0, %v7334_v37  ;;  %v4733_v28 = vadd.f32 %v4669_v1, %v9421_v8  ;;  %v4731_v18 = vadd.f32 %v4667_v20, %v9424_v31  ;;  %v4673_v42 = vmul.f32 0.044715, %v4609_v21 }
 0xd3b   : > { %v7338_v9 = vpop.eup %7337  ;;  %v9473_v40 = vmul.f32 %v4984_v3, %v9330_v16  ;;  %v4921_v12 = vadd.f32 1.0, %v7336_v30  ;;  %v4736_v57 = vadd.f32 %v4672_v36, %v9433_v45  ;;  %v4734_v27 = vadd.f32 %v4670_v29, %v9436_v41  ;;  %v9486_v30 = vpop.permute.xlu1 %3998 }
 0xd3c   : > { %v4982_v48 = vmul.f32 0.5, %v4918_v55  ;;  %v4919_v19 = vadd.f32 1.0, %v7338_v9  ;;  %v4797_v22 = vmul.f32 0.7978846, %v4733_v28  ;;  %v4795_v38 = vmul.f32 0.7978846, %v4731_v18 }
 0xd3d   : > { %10413 = vst [vmem:[#allocation43_spill] sm:$0xff] %v9473_v40  ;;  %v4985_v13 = vmul.f32 0.5, %v4921_v12  ;;  %v4800_v37 = vmul.f32 0.7978846, %v4736_v57  ;;  %v4798_v25 = vmul.f32 0.7978846, %v4734_v27  ;;  %v4737_v1 = vadd.f32 %v4673_v42, %v9443_v33 }
 0xd3e   : > { %v6947_v20 = vpop.f32.mrb[68].mxu1  ;;  %v9478_v21 = vpop.eup %7339  ;;  %v9483_v16 = vmul.f32 %v4982_v48, %v9354_v47  ;;  %v4983_v3 = vmul.f32 0.5, %v4919_v19  ;;  %7343 = vtanh.f32 %v4797_v22  ;;  %v4607_v36 = vmul.f32 %v4543_v17, %v9450_v46  ;;  %10415 = vst [vmem:[#allocation45_spill] sm:$0xff] %v9486_v30 }
 0xd3f   : > { %v4379_v29 = vpop.f32.mrb[69].mxu1  ;;  %v9489_v57 = vmul.f32 %v4985_v13, %v9357_v23  ;;  %7345 = vtanh.f32 %v4795_v38  ;;  %v4801_v12 = vmul.f32 0.7978846, %v4737_v1  ;;  %v4612_v55 = vmul.f32 %v4548_v15, %v9457_v49  ;;  %v9528_v19 = vpop.permute.xlu1 %3918 }
 0xd40   : > { %v6948_v28 = vpop.f32.mrb[70].mxu1  ;;  %v9493_v18 = vmul.f32 %v4983_v3, %v9361_v43  ;;  %7347 = vtanh.f32 %v4800_v37  ;;  %v4671_v47 = vmul.f32 0.044715, %v4607_v36  ;;  %v9496_v22 = vadd.f32 %v4363_v10, %v9220_v52 }
 0xd41   : > { %10416 = vst [vmem:[#allocation46_spill] sm:$0xff] %v9489_v57  ;;  %v4382_v17 = vpop.f32.mrb[71].mxu1  ;;  %v9498_v42 = vpop.eup %7341  ;;  %7349 = vtanh.f32 %v4798_v25  ;;  %v4676_v9 = vmul.f32 0.044715, %v4612_v55  ;;  %v9501_v23 = vadd.f32 %v6944_v60, %v9230_v50  ;;  %v9504_v38 = vadd.f32 %v4366_v35, %v9222_v51 }
 0xd42   : > { %7351 = vtanh.f32 %v4801_v12  ;;  %v4735_v43 = vadd.f32 %v4671_v47, %v9450_v46  ;;  %v4546_v13 = vmul.f32 %v9496_v22, %v9496_v22  ;;  %v9510_v52 = vadd.f32 %v6947_v20, %v9267_v44  ;;  %v9520_v60 = vpop.permute.xlu0 %3913 }
 0xd43   : > { %v4740_v10 = vadd.f32 %v4676_v9, %v9457_v49  ;;  %v4549_v25 = vmul.f32 %v9501_v23, %v9501_v23  ;;  %v4547_v50 = vmul.f32 %v9504_v38, %v9504_v38  ;;  %v9518_v51 = vadd.f32 %v4379_v29, %v9236_v61 }
 0xd44   : > { %10417 = vst [vmem:[#allocation47_spill] sm:$0xff] %v9510_v52  ;;  %v4799_v35 = vmul.f32 0.7978846, %v4735_v43  ;;  %v4610_v15 = vmul.f32 %v4546_v13, %v9496_v22  ;;  %v4552_v44 = vmul.f32 %v9510_v52, %v9510_v52  ;;  %v9526_v27 = vadd.f32 %v6948_v28, %v9272_v0  ;;  %v6951_v48 = vpop.f32.mrb[72].mxu1 }
 0xd45   : > { %10418 = vst [vmem:[#allocation48_spill] sm:$0xff] %v9518_v51  ;;  %v4804_v37 = vmul.f32 0.7978846, %v4740_v10  ;;  %v4613_v1 = vmul.f32 %v4549_v25, %v9501_v23  ;;  %v4611_v61 = vmul.f32 %v4547_v50, %v9504_v38  ;;  %v4550_v20 = vmul.f32 %v9518_v51, %v9518_v51  ;;  %v4395_v3 = vpop.f32.mrb[73].mxu1 }
 0xd46   : > { %10419 = vst [vmem:[#allocation49_spill] sm:$0xff] %v9526_v27  ;;  %7353 = vtanh.f32 %v4799_v35  ;;  %v4674_v36 = vmul.f32 0.044715, %v4610_v15  ;;  %v4616_v29 = vmul.f32 %v4552_v44, %v9510_v52  ;;  %v4553_v0 = vmul.f32 %v9526_v27, %v9526_v27  ;;  %v6952_v12 = vpop.f32.mrb[74].mxu1 }
 0xd47   : > { %7355 = vtanh.f32 %v4804_v37  ;;  %v4677_v55 = vmul.f32 0.044715, %v4613_v1  ;;  %v4675_v28 = vmul.f32 0.044715, %v4611_v61  ;;  %v4614_v47 = vmul.f32 %v4550_v20, %v9518_v51  ;;  %v4398_v9 = vpop.f32.mrb[75].mxu1  ;;  %v9552_v20 = vpop.permute.xlu0 %4003 }
 0xd48   : > { %v9538_v43 = vpop.eup %7343  ;;  %v4738_v13 = vadd.f32 %v4674_v36, %v9496_v22  ;;  %v4680_v10 = vmul.f32 0.044715, %v4616_v29  ;;  %v4617_v25 = vmul.f32 %v4553_v0, %v9526_v27  ;;  %v9543_v50 = vadd.f32 %v4382_v17, %v9238_v59  ;;  %10421 = vst [vmem:[#allocation51_spill] sm:$0xff] %v9552_v20 }
 0xd49   : > { %v7346_v35 = vpop.eup %7345  ;;  %v4741_v15 = vadd.f32 %v4677_v55, %v9501_v23  ;;  %v4739_v44 = vadd.f32 %v4675_v28, %v9504_v38  ;;  %v4678_v37 = vmul.f32 0.044715, %v4614_v47  ;;  %v9548_v1 = vadd.f32 %v6951_v48, %v9399_v54  ;;  %v9559_v55 = vpop.permute.xlu1 %4008 }
 0xd4a   : > { %10420 = vst [vmem:[#allocation50_spill] sm:$0xff] %v9543_v50  ;;  %v9550_v61 = vpop.eup %7347  ;;  %v4802_v36 = vmul.f32 0.7978846, %v4738_v13  ;;  %v4744_v29 = vadd.f32 %v4680_v10, %v9510_v52  ;;  %v4681_v0 = vmul.f32 0.044715, %v4617_v25  ;;  %v4551_v59 = vmul.f32 %v9543_v50, %v9543_v50  ;;  %10422 = vst [vmem:[#allocation52_spill] sm:$0xff] %v9559_v55 }
 0xd4b   : > { %v9557_v17 = vpop.eup %7349  ;;  %v4805_v28 = vmul.f32 0.7978846, %v4741_v15  ;;  %v4803_v47 = vmul.f32 0.7978846, %v4739_v44  ;;  %v4742_v54 = vadd.f32 %v4678_v37, %v9518_v51  ;;  %v4556_v48 = vmul.f32 %v9548_v1, %v9548_v1 }
 0xd4c   : > { %v9564_v30 = vpop.eup %7351  ;;  %7357 = vtanh.f32 %v4802_v36  ;;  %v4808_v13 = vmul.f32 0.7978846, %v4744_v29  ;;  %v4745_v10 = vadd.f32 %v4681_v0, %v9526_v27  ;;  %v4615_v25 = vmul.f32 %v4551_v59, %v9543_v50  ;;  %v6955_v20 = vpop.f32.mrb[76].mxu1 }
 0xd4d   : > { %7359 = vtanh.f32 %v4805_v28  ;;  %v4806_v5 = vmul.f32 0.7978846, %v4742_v54  ;;  %v4620_v55 = vmul.f32 %v4556_v48, %v9548_v1  ;;  %v9570_v15 = vadd.f32 %v4395_v3, %v9334_v7  ;;  %v9572_v44 = vpop.f32.mrb[77].mxu1  ;;  %v9596_v48 = vpop.permute.xlu1 %3928 }
 0xd4e   : > { %7361 = vtanh.f32 %v4803_v47  ;;  %v4809_v37 = vmul.f32 0.7978846, %v4745_v10  ;;  %v4679_v57 = vmul.f32 0.044715, %v4615_v25  ;;  %v9575_v36 = vadd.f32 %v6952_v12, %v9403_v62  ;;  %v9577_v29 = vpop.f32.mrb[78].mxu1  ;;  %v9588_v47 = vpop.permute.xlu0 %3923 }
 0xd4f   : > { %7363 = vtanh.f32 %v4808_v13  ;;  %v4684_v0 = vmul.f32 0.044715, %v4620_v55  ;;  %v4554_v59 = vmul.f32 %v9570_v15, %v9570_v15  ;;  %v9582_v28 = vadd.f32 %v4398_v9, %v9340_v14  ;;  %v9584_v7 = vpop.f32.mrb[79].mxu1 }
 0xd50   : > { %v9586_v3 = vpop.eup %7353  ;;  %7365 = vtanh.f32 %v4806_v5  ;;  %v4743_v62 = vadd.f32 %v4679_v57, %v9543_v50  ;;  %v4557_v12 = vmul.f32 %v9575_v36, %v9575_v36  ;;  %v4922_v55 = vadd.f32 1.0, %v9498_v42 }
 0xd51   : > { %v9594_v54 = vpop.eup %7355  ;;  %7367 = vtanh.f32 %v4809_v37  ;;  %v4748_v14 = vadd.f32 %v4684_v0, %v9548_v1  ;;  %v4618_v9 = vmul.f32 %v4554_v59, %v9570_v15  ;;  %v4555_v13 = vmul.f32 %v9582_v28, %v9582_v28 }
 0xd52   : > { %v4807_v5 = vmul.f32 0.7978846, %v4743_v62  ;;  %v4621_v57 = vmul.f32 %v4557_v12, %v9575_v36  ;;  %v4923_v10 = vadd.f32 1.0, %v7346_v35  ;;  %v4986_v25 = vmul.f32 0.5, %v4922_v55 }
 0xd53   : > { %v4812_v40 = vmul.f32 0.7978846, %v4748_v14  ;;  %v4682_v27 = vmul.f32 0.044715, %v4618_v9  ;;  %v4619_v42 = vmul.f32 %v4555_v13, %v9582_v28  ;;  %v5098_v52 = vpack.c.bf16 %v9351_v24, %v9343_v32  ;;  %v9615_v9 = vpop.permute.xlu0 %4013 }
 0xd54   : > { %7369 = vtanh.f32 %v4807_v5  ;;  %v4685_v37 = vmul.f32 0.044715, %v4621_v57  ;;  %v4987_v0 = vmul.f32 0.5, %v4923_v10  ;;  %v5050_v59 = vmul.f32 %v4986_v25, %v9397_v56  ;;  %v9607_v50 = vpop.f32.mrb[80].mxu1  ;;  %10423 = vst [vmem:[#allocation53_spill] sm:$0xff] %v9615_v9 }
 0xd55   : > { %7371 = vtanh.f32 %v4812_v40  ;;  %v4746_v62 = vadd.f32 %v4682_v27, %v9570_v15  ;;  %v4683_v12 = vmul.f32 0.044715, %v4619_v42  ;;  %v4924_v35 = vadd.f32 1.0, %v9478_v21  ;;  %v9611_v55 = vpop.f32.mrb[81].mxu1  ;;  %v9627_v21 = vpop.permute.xlu1 %4018 }
 0xd56   : > { %v9613_v14 = vpop.eup %7357  ;;  %v4749_v32 = vadd.f32 %v4685_v37, %v9575_v36  ;;  %v5051_v24 = vmul.f32 %v4987_v0, %v9424_v31  ;;  %v4925_v56 = vadd.f32 1.0, %v9538_v43  ;;  %v9621_v13 = vadd.f32 %v6955_v20, %v9520_v60  ;;  %v9623_v40 = vpop.f32.mrb[82].mxu1  ;;  %10424 = vst [vmem:[#allocation54_spill] sm:$0xff] %v9627_v21 }
 0xd57   : > { %v9625_v27 = vpop.eup %7359  ;;  %v4810_v5 = vmul.f32 0.7978846, %v4746_v62  ;;  %v4747_v57 = vadd.f32 %v4683_v12, %v9582_v28  ;;  %v4988_v10 = vmul.f32 0.5, %v4924_v35  ;;  %v5099_v25 = vpack.c.bf16 %v9346_v11, %v9337_v63  ;;  %v9632_v42 = vpop.f32.mrb[83].mxu1 }
 0xd58   : > { %v9634_v31 = vpop.eup %7361  ;;  %v4813_v43 = vmul.f32 0.7978846, %v4749_v32  ;;  %v5106_v60 = vpack.c.bf16 %v5051_v24, %v5050_v59  ;;  %v4989_v20 = vmul.f32 0.5, %v4925_v56  ;;  %v4560_v37 = vmul.f32 %v9621_v13, %v9621_v13 }
 0xd59   : > { %v9638_v0 = vpop.eup %7363  ;;  %7373 = vtanh.f32 %v4810_v5  ;;  %v4811_v62 = vmul.f32 0.7978846, %v4747_v57  ;;  %v5052_v12 = vmul.f32 %v4988_v10, %v9368_v2  ;;  %v9643_v35 = vadd.f32 %v9572_v44, %v9461_v34 }
 0xd5a   : > { %v9645_v63 = vpop.eup %7365  ;;  %7375 = vtanh.f32 %v4813_v43  ;;  %6397 = vmatprep.subr.bf16.mxu0 %v5106_v60  ;;  %v5053_v11 = vmul.f32 %v4989_v20, %v9421_v8  ;;  %v4624_v59 = vmul.f32 %v4560_v37, %v9621_v13  ;;  %v9651_v32 = vadd.f32 %v9577_v29, %v9528_v19  ;;  %v3934_v8 = vpop.permute.xlu0 %3933 }
 0xd5b   : > { %v9653_v24 = vpop.eup %7367  ;;  %7377 = vtanh.f32 %v4811_v62  ;;  %6398 = vmatpush3.bf16.msra.mxu0 %v5098_v52  ;;  %v4558_v2 = vmul.f32 %v9643_v35, %v9643_v35  ;;  %v9659_v34 = vadd.f32 %v9584_v7, %v9466_v4  ;;  %v4926_v44 = vadd.f32 1.0, %v9557_v17  ;;  %v9667_v52 = vpop.permute.xlu1 %3938 }
 0xd5c   : > { %v5107_v56 = vpack.c.bf16 %v5053_v11, %v5052_v12  ;;  %v4688_v5 = vmul.f32 0.044715, %v4624_v59  ;;  %v4561_v19 = vmul.f32 %v9651_v32, %v9651_v32  ;;  %v4927_v29 = vadd.f32 1.0, %v9586_v3  ;;  %v9665_v57 = vpop.f32.mrb[84].mxu1 }
 0xd5d   : > { %v4622_v10 = vmul.f32 %v4558_v2, %v9643_v35  ;;  %v4559_v4 = vmul.f32 %v9659_v34, %v9659_v34  ;;  %v4990_v7 = vmul.f32 0.5, %v4926_v44  ;;  %v5100_v17 = vpack.c.bf16 %v9392_v26, %v9384_v58  ;;  %v9674_v43 = vpop.f32.mrb[85].mxu1 }
 0xd5e   : > { %v9676_v60 = vpop.eup %7369  ;;  %6399 = vmatprep.subr.bf16.mxu0 %v5107_v56  ;;  %v4752_v3 = vadd.f32 %v4688_v5, %v9621_v13  ;;  %v4625_v20 = vmul.f32 %v4561_v19, %v9651_v32  ;;  %v4991_v37 = vmul.f32 0.5, %v4927_v29  ;;  %v4928_v62 = vadd.f32 1.0, %v9550_v61  ;;  %v9681_v12 = vpop.f32.mrb[86].mxu1 }
 0xd5f   : > { %v7372_v11 = vpop.eup %7371  ;;  %6400 = vmatpush3.bf16.msra.mxu0 %v5099_v25  ;;  %v4686_v59 = vmul.f32 0.044715, %v4622_v10  ;;  %v4623_v2 = vmul.f32 %v4559_v4, %v9659_v34  ;;  %v5054_v58 = vmul.f32 %v4990_v7, %v9436_v41  ;;  %v4929_v26 = vadd.f32 1.0, %v9564_v30  ;;  %v9686_v44 = vpop.f32.mrb[87].mxu1 }
 0xd60   : > { %v4940_v56 = vadd.f32 1.0, %v7372_v11  ;;  %v4816_v5 = vmul.f32 0.7978846, %v4752_v3  ;;  %v4689_v21 = vmul.f32 0.044715, %v4625_v20  ;;  %v5055_v19 = vmul.f32 %v4991_v37, %v9450_v46  ;;  %v9690_v25 = vpop.permute.xlu0 %4023  ;;  %v9693_v7 = vpop.permute.xlu1 %4028 }
 0xd61   : > { %v4750_v61 = vadd.f32 %v4686_v59, %v9643_v35  ;;  %v4687_v29 = vmul.f32 0.044715, %v4623_v2  ;;  %v4992_v9 = vmul.f32 0.5, %v4928_v62  ;;  %v4993_v51 = vmul.f32 0.5, %v4929_v26 }
 0xd62   : > { %v5004_v10 = vmul.f32 0.5, %v4940_v56  ;;  %7379 = vtanh.f32 %v4816_v5  ;;  %v4753_v41 = vadd.f32 %v4689_v21, %v9651_v32  ;;  %v5108_v4 = vpack.c.bf16 %v5055_v19, %v5054_v58 }
 0xd63   : > { %v7374_v30 = vpop.eup %7373  ;;  %v4814_v11 = vmul.f32 0.7978846, %v4750_v61  ;;  %v4751_v3 = vadd.f32 %v4687_v29, %v9659_v34  ;;  %v5056_v46 = vmul.f32 %v4992_v9, %v9433_v45  ;;  %v5057_v20 = vmul.f32 %v4993_v51, %v9443_v33 }
 0xd64   : > { %v7376_v37 = vpop.eup %7375  ;;  %v9699_v62 = vmul.f32 %v5004_v10, %v9548_v1  ;;  %v4938_v59 = vadd.f32 1.0, %v7374_v30  ;;  %v4817_v2 = vmul.f32 0.7978846, %v4753_v41  ;;  %6401 = vmatprep.subr.bf16.mxu0 %v5108_v4  ;;  %v9702_v21 = vadd.f32 %v9607_v50, %v3934_v8  ;;  %v9704_v58 = vpop.f32.mrb[88].mxu1 }
 0xd65   : > { %v7378_v26 = vpop.eup %7377  ;;  %v4941_v56 = vadd.f32 1.0, %v7376_v37  ;;  %7381 = vtanh.f32 %v4814_v11  ;;  %v4815_v5 = vmul.f32 0.7978846, %v4751_v3  ;;  %6402 = vmatpush3.bf16.msra.mxu0 %v5100_v17  ;;  %v5109_v45 = vpack.c.bf16 %v5057_v20, %v5056_v46  ;;  %v9706_v9 = vpop.f32.mrb[89].mxu1 }
 0xd66   : > { %v5002_v33 = vmul.f32 0.5, %v4938_v59  ;;  %v4939_v51 = vadd.f32 1.0, %v7378_v26  ;;  %7383 = vtanh.f32 %v4817_v2  ;;  %v4564_v1 = vmul.f32 %v9702_v21, %v9702_v21  ;;  %v9710_v19 = vpop.f32.mrb[90].mxu1  ;;  %v9720_v29 = vpop.permute.xlu0 %3943 }
 0xd67   : > { %v5005_v50 = vmul.f32 0.5, %v4941_v56  ;;  %7385 = vtanh.f32 %v4815_v5  ;;  %6403 = vmatprep.subr.bf16.mxu0 %v5109_v45  ;;  %v5101_v8 = vpack.c.bf16 %v9387_v6, %v9379_v53  ;;  %v9716_v17 = vadd.f32 %v9611_v55, %v9588_v47  ;;  %v9718_v61 = vpop.f32.mrb[91].mxu1  ;;  %v9730_v11 = vpop.permute.xlu1 %3948 }
 0xd68   : > { %v9723_v10 = vmul.f32 %v5002_v33, %v9570_v15  ;;  %v5003_v41 = vmul.f32 0.5, %v4939_v51  ;;  %v4628_v4 = vmul.f32 %v4564_v1, %v9702_v21  ;;  %v9728_v30 = vadd.f32 %v9623_v40, %v9667_v52 }
 0xd69   : > { %v9733_v53 = vmul.f32 %v5005_v50, %v9575_v36  ;;  %6404 = vmatpush3.bf16.msra.mxu0 %v5101_v8  ;;  %v4562_v6 = vmul.f32 %v9716_v17, %v9716_v17  ;;  %v9739_v15 = vadd.f32 %v9632_v42, %v9596_v48  ;;  %v4930_v47 = vadd.f32 1.0, %v9613_v14  ;;  %v10425_v48 = vld [vmem:[#allocation42_spill] sm:$0xff] }
 0xd6a   : > { %v9743_v55 = vmul.f32 %v5003_v41, %v9582_v28  ;;  %v4692_v40 = vmul.f32 0.044715, %v4628_v4  ;;  %v4565_v52 = vmul.f32 %v9728_v30, %v9728_v30  ;;  %v4931_v36 = vadd.f32 1.0, %v9634_v31  ;;  %v9762_v51 = vpop.permute.xlu0 %4033 }
 0xd6b   : > { %v4626_v3 = vmul.f32 %v4562_v6, %v9716_v17  ;;  %v4563_v46 = vmul.f32 %v9739_v15, %v9739_v15  ;;  %v4994_v20 = vmul.f32 0.5, %v4930_v47  ;;  %v5102_v42 = vpack.c.bf16 %v10425_v48, %v9413_v39  ;;  %v9768_v4 = vpop.permute.xlu1 %4038 }
 0xd6c   : > { %v7380_v37 = vpop.eup %7379  ;;  %v4756_v14 = vadd.f32 %v4692_v40, %v9702_v21  ;;  %v4629_v28 = vmul.f32 %v4565_v52, %v9728_v30  ;;  %v4995_v59 = vmul.f32 0.5, %v4931_v36  ;;  %v4932_v2 = vadd.f32 1.0, %v9594_v54  ;;  %v9756_v26 = vpop.f32.mrb[92].mxu1 }
 0xd6d   : > { %v4944_v31 = vadd.f32 1.0, %v7380_v37  ;;  %v4690_v56 = vmul.f32 0.044715, %v4626_v3  ;;  %v4627_v5 = vmul.f32 %v4563_v46, %v9739_v15  ;;  %v5058_v45 = vmul.f32 %v4994_v20, %v9496_v22  ;;  %v9760_v33 = vpop.f32.mrb[93].mxu1 }
 0xd6e   : > { %v4820_v39 = vmul.f32 0.7978846, %v4756_v14  ;;  %v4693_v1 = vmul.f32 0.044715, %v4629_v28  ;;  %v5059_v50 = vmul.f32 %v4995_v59, %v9504_v38  ;;  %v4933_v8 = vadd.f32 1.0, %v9625_v27  ;;  %v9766_v41 = vpop.f32.mrb[94].mxu1 }
 0xd6f   : > { %v7382_v54 = vpop.eup %7381  ;;  %v5008_v6 = vmul.f32 0.5, %v4944_v31  ;;  %v4754_v47 = vadd.f32 %v4690_v56, %v9716_v17  ;;  %v4691_v40 = vmul.f32 0.044715, %v4627_v5  ;;  %v4996_v22 = vmul.f32 0.5, %v4932_v2  ;;  %v9771_v52 = vpop.f32.mrb[95].mxu1 }
 0xd70   : > { %v7384_v36 = vpop.eup %7383  ;;  %v4942_v3 = vadd.f32 1.0, %v7382_v54  ;;  %7387 = vtanh.f32 %v4820_v39  ;;  %v4757_v46 = vadd.f32 %v4693_v1, %v9728_v30  ;;  %v5110_v38 = vpack.c.bf16 %v5059_v50, %v5058_v45  ;;  %v3954_v45 = vpop.permute.xlu0 %3953 }
 0xd71   : > { %v7386_v20 = vpop.eup %7385  ;;  %v9775_v27 = vmul.f32 %v5008_v6, %v9621_v13  ;;  %v4945_v48 = vadd.f32 1.0, %v7384_v36  ;;  %v4818_v37 = vmul.f32 0.7978846, %v4754_v47  ;;  %v4755_v14 = vadd.f32 %v4691_v40, %v9739_v15  ;;  %v3959_v6 = vpop.permute.xlu1 %3958 }
 0xd72   : > { %v5006_v28 = vmul.f32 0.5, %v4942_v3  ;;  %v4943_v59 = vadd.f32 1.0, %v7386_v20  ;;  %v4821_v31 = vmul.f32 0.7978846, %v4757_v46  ;;  %6405 = vmatprep.subr.bf16.mxu0 %v5110_v38  ;;  %v4997_v2 = vmul.f32 0.5, %v4933_v8 }
 0xd73   : > { %v5009_v56 = vmul.f32 0.5, %v4945_v48  ;;  %7389 = vtanh.f32 %v4818_v37  ;;  %v4819_v5 = vmul.f32 0.7978846, %v4755_v14  ;;  %6406 = vmatpush3.bf16.msra.mxu0 %v5102_v42  ;;  %v5060_v39 = vmul.f32 %v4996_v22, %v9457_v49  ;;  %v10426_v42 = vld [vmem:[#allocation38_spill] sm:$0xff]  ;;  %v10427_v49 = vld [vmem:[#allocation40_spill] sm:$0xff] }
 0xd74   : > { %v9780_v1 = vmul.f32 %v5006_v28, %v9643_v35  ;;  %v5007_v13 = vmul.f32 0.5, %v4943_v59  ;;  %7391 = vtanh.f32 %v4821_v31  ;;  %v5061_v50 = vmul.f32 %v4997_v2, %v9501_v23  ;;  %v9783_v54 = vpop.f32.mrb[96].mxu1 }
 0xd75   : > { %v9786_v47 = vmul.f32 %v5009_v56, %v9651_v32  ;;  %7393 = vtanh.f32 %v4819_v5  ;;  %v9789_v8 = vadd.f32 %v9665_v57, %v3954_v45  ;;  %v5103_v40 = vpack.c.bf16 %v10427_v49, %v10426_v42  ;;  %v9793_v22 = vpop.f32.mrb[97].mxu1  ;;  %v10429_v45 = vld [vmem:[#allocation50_spill] sm:$0xff] }
 0xd76   : > { %v9796_v35 = vmul.f32 %v5007_v13, %v9659_v34  ;;  %v5111_v36 = vpack.c.bf16 %v5061_v50, %v5060_v39  ;;  %v9800_v23 = vadd.f32 %v9674_v43, %v9720_v29  ;;  %v9803_v32 = vadd.f32 %v9681_v12, %v3959_v6  ;;  %v9805_v3 = vpop.f32.mrb[98].mxu1 }
 0xd77   : > { %v4568_v57 = vmul.f32 %v9789_v8, %v9789_v8  ;;  %v9811_v46 = vadd.f32 %v9686_v44, %v9730_v11  ;;  %v4934_v34 = vadd.f32 1.0, %v9645_v63  ;;  %v4935_v38 = vadd.f32 1.0, %v9676_v60  ;;  %v9815_v20 = vpop.f32.mrb[99].mxu1 }
 0xd78   : > { %6407 = vmatprep.subr.bf16.mxu0 %v5111_v36  ;;  %v4566_v43 = vmul.f32 %v9800_v23, %v9800_v23  ;;  %v4569_v12 = vmul.f32 %v9803_v32, %v9803_v32  ;;  %v5104_v29 = vpack.c.bf16 %v9493_v18, %v9483_v16  ;;  %v4936_v48 = vadd.f32 1.0, %v9638_v0  ;;  %v10428_v0 = vld [vmem:[#allocation48_spill] sm:$0xff] }
 0xd79   : > { %v4632_v44 = vmul.f32 %v4568_v57, %v9789_v8  ;;  %6408 = vmatpush3.bf16.msra.mxu0 %v5103_v40  ;;  %v4567_v63 = vmul.f32 %v9811_v46, %v9811_v46  ;;  %v4998_v60 = vmul.f32 0.5, %v4934_v34  ;;  %v4999_v11 = vmul.f32 0.5, %v4935_v38 }
 0xd7a   : > { %v7388_v37 = vpop.eup %7387  ;;  %v4630_v14 = vmul.f32 %v4566_v43, %v9800_v23  ;;  %v4633_v28 = vmul.f32 %v4569_v12, %v9803_v32  ;;  %v4937_v59 = vadd.f32 1.0, %v9653_v24  ;;  %v5000_v31 = vmul.f32 0.5, %v4936_v48  ;;  %v10430_v24 = vld [vmem:[#allocation47_spill] sm:$0xff] }
 0xd7b   : > { %v4948_v2 = vadd.f32 1.0, %v7388_v37  ;;  %v4696_v16 = vmul.f32 0.044715, %v4632_v44  ;;  %v4631_v18 = vmul.f32 %v4567_v63, %v9811_v46  ;;  %v5062_v56 = vmul.f32 %v4998_v60, %v10428_v0 }
 0xd7c   : > { %v4694_v5 = vmul.f32 0.044715, %v4630_v14  ;;  %v4697_v39 = vmul.f32 0.044715, %v4633_v28  ;;  %v5063_v13 = vmul.f32 %v4999_v11, %v10429_v45  ;;  %v5001_v50 = vmul.f32 0.5, %v4937_v59  ;;  %v9833_v6 = vpop.f32.mrb[100].mxu1 }
 0xd7d   : > { %v7390_v42 = vpop.eup %7389  ;;  %v5012_v49 = vmul.f32 0.5, %v4948_v2  ;;  %v4760_v40 = vadd.f32 %v4696_v16, %v9789_v8  ;;  %v4695_v36 = vmul.f32 0.044715, %v4631_v18  ;;  %v5064_v57 = vmul.f32 %v5000_v31, %v10430_v24  ;;  %v9837_v34 = vpop.f32.mrb[101].mxu1  ;;  %v10434_v24 = vld [vmem:[#allocation46_spill] sm:$0xff] }
 0xd7e   : > { %v7392_v38 = vpop.eup %7391  ;;  %v4946_v43 = vadd.f32 1.0, %v7390_v42  ;;  %v4758_v12 = vadd.f32 %v4694_v5, %v9800_v23  ;;  %v4761_v48 = vadd.f32 %v4697_v39, %v9803_v32  ;;  %v5112_v44 = vpack.c.bf16 %v5063_v13, %v5062_v56  ;;  %v9841_v63 = vpop.f32.mrb[102].mxu1  ;;  %v10431_v5 = vld [vmem:[#allocation49_spill] sm:$0xff]  ;;  %v10432_v13 = vld [vmem:[#allocation36_spill] sm:$0xff] }
 0xd7f   : > { %v7394_v60 = vpop.eup %7393  ;;  %v9844_v11 = vmul.f32 %v5012_v49, %v9702_v21  ;;  %v4949_v37 = vadd.f32 1.0, %v7392_v38  ;;  %v4824_v14 = vmul.f32 0.7978846, %v4760_v40  ;;  %v4759_v28 = vadd.f32 %v4695_v36, %v9811_v46  ;;  %v9847_v59 = vpop.f32.mrb[103].mxu1  ;;  %v10433_v36 = vld [vmem:[#allocation43_spill] sm:$0xff] }
 0xd80   : > { %v5010_v31 = vmul.f32 0.5, %v4946_v43  ;;  %v4947_v2 = vadd.f32 1.0, %v7394_v60  ;;  %v4822_v16 = vmul.f32 0.7978846, %v4758_v12  ;;  %v4825_v18 = vmul.f32 0.7978846, %v4761_v48  ;;  %6409 = vmatprep.subr.bf16.mxu0 %v5112_v44 }
 0xd81   : > { %v5013_v0 = vmul.f32 0.5, %v4949_v37  ;;  %7395 = vtanh.f32 %v4824_v14  ;;  %v4823_v56 = vmul.f32 0.7978846, %v4759_v28  ;;  %6410 = vmatpush3.bf16.msra.mxu0 %v5104_v29  ;;  %v5065_v39 = vmul.f32 %v5001_v50, %v10431_v5  ;;  %v10435_v50 = vld [vmem:[#allocation34_spill] sm:$0xff]  ;;  %v10437_v12 = vld [vmem:[#allocation35_spill] sm:$0xff]  ;;  %v10438_v48 = vld [vmem:[#allocation44_spill] sm:$0xff] }
 0xd82   : > { %v9851_v21 = vmul.f32 %v5010_v31, %v9716_v17  ;;  %v5011_v45 = vmul.f32 0.5, %v4947_v2  ;;  %7397 = vtanh.f32 %v4822_v16  ;;  %v9855_v42 = vadd.f32 %v9704_v58, %v10432_v13  ;;  %v10436_v58 = vld [vmem:[#allocation37_spill] sm:$0xff]  ;;  %v10439_v60 = vld [vmem:[#allocation39_spill] sm:$0xff] }
 0xd83   : > { %v9858_v49 = vmul.f32 %v5013_v0, %v9728_v30  ;;  %7399 = vtanh.f32 %v4825_v18  ;;  %v5113_v40 = vpack.c.bf16 %v5065_v39, %v5064_v57  ;;  %v5105_v38 = vpack.c.bf16 %v10434_v24, %v10433_v36  ;;  %v7225_v57 = vld [vmem:[%s10403_s4] ss:$16 sps:$4 sm:$0xff]   ;;  %v10440_v14 = vld [vmem:[#allocation45_spill] sm:$0xff] }
 0xd84   : > { %v9863_v29 = vmul.f32 %v5011_v45, %v9739_v15  ;;  %7401 = vtanh.f32 %v4823_v56  ;;  %v4572_v17 = vmul.f32 %v9855_v42, %v9855_v42  ;;  %v9869_v43 = vadd.f32 %v9706_v9, %v10435_v50 }
 0xd85   : > { %6411 = vmatprep.subr.bf16.mxu0 %v5113_v40  ;;  %v9873_v30 = vadd.f32 %v9710_v19, %v10436_v58  ;;  %v9880_v15 = vadd.f32 %v9718_v61, %v10437_v12  ;;  %v9884_v44 = vadd.f32 %v9756_v26, %v10438_v48  ;;  %v9888_v9 = vadd.f32 %v9760_v33, %v10439_v60  ;;  %v7228_v61 = vld [vmem:[%s10403_s4 + $0x24] ss:$16 sps:$4 sm:$0xff]   ;;  %v10441_v26 = vld [vmem:[#allocation41_spill] sm:$0xff] }
 0xd86   : > { %v4636_v37 = vmul.f32 %v4572_v17, %v9855_v42  ;;  %6412 = vmatpush3.bf16.msra.mxu0 %v5105_v38  ;;  %v4570_v19 = vmul.f32 %v9869_v43, %v9869_v43  ;;  %v9895_v28 = vadd.f32 %v9766_v41, %v10440_v14  ;;  %v9902_v31 = vadd.f32 %v9771_v52, %v10441_v26  ;;  %v10442_v48 = vld [vmem:[#allocation53_spill] sm:$0xff] }
 0xd87   : > { %v4573_v33 = vmul.f32 %v9873_v30, %v9873_v30  ;;  %v4571_v2 = vmul.f32 %v9880_v15, %v9880_v15  ;;  %v4576_v16 = vmul.f32 %v9884_v44, %v9884_v44  ;;  %v4574_v41 = vmul.f32 %v9888_v9, %v9888_v9 }
 0xd88   : > { %v4700_v18 = vmul.f32 0.044715, %v4636_v37  ;;  %v4634_v0 = vmul.f32 %v4570_v19, %v9869_v43  ;;  %v4577_v56 = vmul.f32 %v9895_v28, %v9895_v28  ;;  %v4575_v52 = vmul.f32 %v9902_v31, %v9902_v31 }
 0xd89   : > { %v4637_v5 = vmul.f32 %v4573_v33, %v9873_v30  ;;  %v4635_v39 = vmul.f32 %v4571_v2, %v9880_v15  ;;  %5451 = vmatmul.mubr.bf16.vlgmr.msra.gmra.mrb[56].mxu0 %v7225_v57  ;;  %v4640_v45 = vmul.f32 %v4576_v16, %v9884_v44  ;;  %v4638_v13 = vmul.f32 %v4574_v41, %v9888_v9 }
 0xd8a   : > { %v4764_v40 = vadd.f32 %v4700_v18, %v9855_v42  ;;  %v4698_v36 = vmul.f32 0.044715, %v4634_v0  ;;  %v4641_v24 = vmul.f32 %v4577_v56, %v9895_v28  ;;  %5458 = vmatprep.mubr.bf16.mxu0 %v7228_v61  ;;  %v4639_v38 = vmul.f32 %v4575_v52, %v9902_v31  ;;  %v7230_v18 = vld [vmem:[%s10403_s4 + $0x20] ss:$16 sps:$4 sm:$0xff]  }
 0xd8b   : > { %v7396_v17 = vpop.eup %7395  ;;  %v4701_v50 = vmul.f32 0.044715, %v4637_v5  ;;  %v4699_v58 = vmul.f32 0.044715, %v4635_v39  ;;  %v4704_v12 = vmul.f32 0.044715, %v4640_v45  ;;  %v9926_v60 = vadd.f32 %v9783_v54, %v10442_v48 }
 0xd8c   : > { %v7398_v57 = vpop.eup %7397  ;;  %v4952_v37 = vadd.f32 1.0, %v7396_v17  ;;  %v4828_v19 = vmul.f32 0.7978846, %v4764_v40  ;;  %v4762_v14 = vadd.f32 %v4698_v36, %v9869_v43  ;;  %v4702_v26 = vmul.f32 0.044715, %v4638_v13 }
 0xd8d   : > { %v7400_v33 = vpop.eup %7399  ;;  %v4950_v2 = vadd.f32 1.0, %v7398_v57  ;;  %v4765_v61 = vadd.f32 %v4701_v50, %v9873_v30  ;;  %v4763_v16 = vadd.f32 %v4699_v58, %v9880_v15  ;;  %v4768_v41 = vadd.f32 %v4704_v12, %v9884_v44  ;;  %v7231_v5 = vld [vmem:[%s10403_s4 + $0x44] ss:$16 sps:$4 sm:$0xff]  }
 0xd8e   : > { %v7402_v54 = vpop.eup %7401  ;;  %v5016_v0 = vmul.f32 0.5, %v4952_v37  ;;  %v4953_v56 = vadd.f32 1.0, %v7400_v33  ;;  %7403 = vtanh.f32 %v4828_v19  ;;  %v4826_v52 = vmul.f32 0.7978846, %v4762_v14 }
 0xd8f   : > { %v5014_v39 = vmul.f32 0.5, %v4950_v2  ;;  %v4951_v45 = vadd.f32 1.0, %v7402_v54  ;;  %v4829_v13 = vmul.f32 0.7978846, %v4765_v61  ;;  %v4827_v40 = vmul.f32 0.7978846, %v4763_v16 }
 0xd90   : > { %v9939_v36 = vmul.f32 %v5016_v0, %v9789_v8  ;;  %v5017_v17 = vmul.f32 0.5, %v4953_v56  ;;  %7405 = vtanh.f32 %v4826_v52  ;;  %v4832_v50 = vmul.f32 0.7978846, %v4768_v41  ;;  %v10443_v2 = vld [vmem:[#allocation51_spill] sm:$0xff]  ;;  %v10444_v61 = vld [vmem:[#allocation54_spill] sm:$0xff] }
 0xd91   : > { %v9942_v58 = vmul.f32 %v5014_v39, %v9800_v23  ;;  %v5015_v12 = vmul.f32 0.5, %v4951_v45  ;;  %7407 = vtanh.f32 %v4829_v13  ;;  %v4766_v48 = vadd.f32 %v4702_v26, %v9888_v9  ;;  %5459 = vmatmul.mubr.bf16.gmra.mrb[60].mxu0 %v7230_v18  ;;  %v7233_v41 = vld [vmem:[%s10403_s4 + $0x40] ss:$16 sps:$4 sm:$0xff]  }
 0xd92   : > { %v9946_v57 = vmul.f32 %v5017_v17, %v9803_v32  ;;  %7409 = vtanh.f32 %v4827_v40  ;;  %v4705_v37 = vmul.f32 0.044715, %v4641_v24  ;;  %v4703_v19 = vmul.f32 0.044715, %v4639_v38  ;;  %5466 = vmatprep.mubr.bf16.mxu0 %v7231_v5  ;;  %v10445_v38 = vld [vmem:[#allocation52_spill] sm:$0xff] }
 0xd93   : > { %v9949_v8 = vmul.f32 %v5015_v12, %v9811_v46  ;;  %7411 = vtanh.f32 %v4832_v50  ;;  %v4830_v14 = vmul.f32 0.7978846, %v4766_v48  ;;  %v4580_v23 = vmul.f32 %v9926_v60, %v9926_v60 }
 0xd94   : > { %v4769_v33 = vadd.f32 %v4705_v37, %v9895_v28  ;;  %v4767_v26 = vadd.f32 %v4703_v19, %v9902_v31  ;;  %v9957_v32 = vadd.f32 %v9793_v22, %v10443_v2  ;;  %v9961_v24 = vadd.f32 %v9805_v3, %v10444_v61 }
 0xd95   : > { %7413 = vtanh.f32 %v4830_v14  ;;  %v4644_v46 = vmul.f32 %v4580_v23, %v9926_v60  ;;  %v9966_v16 = vadd.f32 %v9815_v20, %v10445_v38  ;;  %v9973_v18 = vadd.f32 %v9833_v6, %v9762_v51  ;;  %v7234_v20 = vld [vmem:[%s10403_s4 + $0x64] ss:$16 sps:$4 sm:$0xff]  }
 0xd96   : > { %v4833_v22 = vmul.f32 0.7978846, %v4769_v33  ;;  %v4831_v54 = vmul.f32 0.7978846, %v4767_v26  ;;  %v4578_v3 = vmul.f32 %v9957_v32, %v9957_v32  ;;  %v4581_v0 = vmul.f32 %v9961_v24, %v9961_v24 }
 0xd97   : > { %v4708_v56 = vmul.f32 0.044715, %v4644_v46  ;;  %v4579_v52 = vmul.f32 %v9966_v16, %v9966_v16  ;;  %v4584_v51 = vmul.f32 %v9973_v18, %v9973_v18  ;;  %v9988_v6 = vadd.f32 %v9837_v34, %v9690_v25 }
 0xd98   : > { %v7404_v5 = vpop.eup %7403  ;;  %7415 = vtanh.f32 %v4833_v22  ;;  %v4642_v39 = vmul.f32 %v4578_v3, %v9957_v32  ;;  %v4645_v45 = vmul.f32 %v4581_v0, %v9961_v24  ;;  %v9994_v13 = vadd.f32 %v9841_v63, %v9768_v4 }
 0xd99   : > { %7417 = vtanh.f32 %v4831_v54  ;;  %v4772_v40 = vadd.f32 %v4708_v56, %v9926_v60  ;;  %v4643_v17 = vmul.f32 %v4579_v52, %v9966_v16  ;;  %5467 = vmatmul.mubr.bf16.gmra.mrb[64].mxu0 %v7233_v41  ;;  %v4648_v50 = vmul.f32 %v4584_v51, %v9973_v18 }
 0xd9a   : > { %v7406_v25 = vpop.eup %7405  ;;  %v4706_v34 = vmul.f32 0.044715, %v4642_v39  ;;  %v4709_v12 = vmul.f32 0.044715, %v4645_v45  ;;  %v4582_v48 = vmul.f32 %v9988_v6, %v9988_v6  ;;  %v4585_v37 = vmul.f32 %v9994_v13, %v9994_v13  ;;  %5474 = vmatprep.mubr.bf16.mxu0 %v7234_v20 }
 0xd9b   : > { %v7408_v4 = vpop.eup %7407  ;;  %v4836_v63 = vmul.f32 0.7978846, %v4772_v40  ;;  %v4707_v19 = vmul.f32 0.044715, %v4643_v17  ;;  %v4712_v14 = vmul.f32 0.044715, %v4648_v50  ;;  %v10005_v23 = vadd.f32 %v9847_v59, %v9693_v7 }
 0xd9c   : > { %v7410_v33 = vpop.eup %7409  ;;  %v4770_v26 = vadd.f32 %v4706_v34, %v9957_v32  ;;  %v4773_v2 = vadd.f32 %v4709_v12, %v9961_v24  ;;  %v4646_v61 = vmul.f32 %v4582_v48, %v9988_v6  ;;  %v4649_v46 = vmul.f32 %v4585_v37, %v9994_v13  ;;  %v7236_v7 = vld [vmem:[%s10403_s4 + $0x60] ss:$16 sps:$4 sm:$0xff]   ;;  %v7237_v59 = vld [vmem:[%s10403_s4 + $0x84] ss:$16 sps:$4 sm:$0xff]  }
 0xd9d   : > { %v7412_v38 = vpop.eup %7411  ;;  %7419 = vtanh.f32 %v4836_v63  ;;  %v4771_v41 = vadd.f32 %v4707_v19, %v9966_v16  ;;  %v4776_v22 = vadd.f32 %v4712_v14, %v9973_v18  ;;  %v4583_v54 = vmul.f32 %v10005_v23, %v10005_v23 }
 0xd9e   : > { %v4834_v3 = vmul.f32 0.7978846, %v4770_v26  ;;  %v4837_v0 = vmul.f32 0.7978846, %v4773_v2  ;;  %v4710_v20 = vmul.f32 0.044715, %v4646_v61  ;;  %v5114_v56 = vpack.c.bf16 %v9743_v55, %v9723_v10 }
 0xd9f   : > { %v7414_v52 = vpop.eup %7413  ;;  %v4835_v51 = vmul.f32 0.7978846, %v4771_v41  ;;  %v4840_v39 = vmul.f32 0.7978846, %v4776_v22  ;;  %v4713_v45 = vmul.f32 0.044715, %v4649_v46  ;;  %v4647_v40 = vmul.f32 %v4583_v54, %v10005_v23 }
 0xda0   : > { %7421 = vtanh.f32 %v4834_v3  ;;  %v4774_v17 = vadd.f32 %v4710_v20, %v9988_v6  ;;  %v4954_v50 = vadd.f32 1.0, %v7406_v25  ;;  %v4955_v34 = vadd.f32 1.0, %v7410_v33  ;;  %v7239_v41 = vld [vmem:[%s10403_s4 + $0x80] ss:$16 sps:$4 sm:$0xff]  }
 0xda1   : > { %7423 = vtanh.f32 %v4837_v0  ;;  %v4777_v12 = vadd.f32 %v4713_v45, %v9994_v13  ;;  %v4711_v48 = vmul.f32 0.044715, %v4647_v40  ;;  %5475 = vmatmul.mubr.bf16.gmra.mrb[68].mxu0 %v7236_v7  ;;  %v4956_v37 = vadd.f32 1.0, %v7404_v5 }
 0xda2   : > { %v7416_v63 = vpop.eup %7415  ;;  %7425 = vtanh.f32 %v4835_v51  ;;  %v4838_v10 = vmul.f32 0.7978846, %v4774_v17  ;;  %5482 = vmatprep.mubr.bf16.mxu0 %v7237_v59  ;;  %v5018_v55 = vmul.f32 0.5, %v4954_v50  ;;  %v5019_v19 = vmul.f32 0.5, %v4955_v34 }
 0xda3   : > { %v7418_v14 = vpop.eup %7417  ;;  %7427 = vtanh.f32 %v4840_v39  ;;  %v4841_v26 = vmul.f32 0.7978846, %v4777_v12  ;;  %v4775_v2 = vadd.f32 %v4711_v48, %v10005_v23  ;;  %v4957_v61 = vadd.f32 1.0, %v7408_v4 }
 0xda4   : > { %7429 = vtanh.f32 %v4838_v10  ;;  %v5082_v25 = vmul.f32 %v5018_v55, %v9869_v43  ;;  %v5083_v33 = vmul.f32 %v5019_v19, %v9880_v15  ;;  %v5020_v46 = vmul.f32 0.5, %v4956_v37  ;;  %v7240_v43 = vld [vmem:[%s10403_s4 + $0xa4] ss:$16 sps:$4 sm:$0xff]  }
 0xda5   : > { %7431 = vtanh.f32 %v4841_v26  ;;  %v4839_v5 = vmul.f32 0.7978846, %v4775_v2  ;;  %v5021_v22 = vmul.f32 0.5, %v4957_v61  ;;  %v5115_v54 = vpack.c.bf16 %v9733_v53, %v9699_v62 }
 0xda6   : > { %v5122_v7 = vpack.c.bf16 %v5083_v33, %v5082_v25  ;;  %v5084_v59 = vmul.f32 %v5020_v46, %v9855_v42  ;;  %v4958_v4 = vadd.f32 1.0, %v7414_v52  ;;  %v4959_v15 = vadd.f32 1.0, %v7418_v14 }
 0xda7   : > { %v7420_v3 = vpop.eup %7419  ;;  %7433 = vtanh.f32 %v4839_v5  ;;  %v5085_v0 = vmul.f32 %v5021_v22, %v9873_v30  ;;  %v5116_v20 = vpack.c.bf16 %v9796_v35, %v9780_v1  ;;  %v4960_v51 = vadd.f32 1.0, %v7412_v38 }
 0xda8   : > { %6461 = vmatprep.subr.bf16.mxu0 %v5122_v7  ;;  %v5022_v39 = vmul.f32 0.5, %v4958_v4  ;;  %v5023_v62 = vmul.f32 0.5, %v4959_v15  ;;  %v4961_v53 = vadd.f32 1.0, %v7416_v63  ;;  %v5117_v42 = vpack.c.bf16 %v9786_v47, %v9775_v27 }
 0xda9   : > { %5483 = vmatmul.mubr.bf16.gmra.mrb[72].mxu0 %v7239_v41  ;;  %v5123_v45 = vpack.c.bf16 %v5085_v0, %v5084_v59  ;;  %v5024_v40 = vmul.f32 0.5, %v4960_v51  ;;  %v5118_v52 = vpack.c.bf16 %v9863_v29, %v9851_v21  ;;  %v4964_v17 = vadd.f32 1.0, %v7420_v3  ;;  %v7245_v59 = vld [vmem:[%s10403_s4 + $0xc0] ss:$16 sps:$4 sm:$0xff]   ;;  %v7254_v3 = vld [vmem:[%s10403_s4 + $0x28] ss:$16 sps:$4 sm:$0xff]  }
 0xdaa   : > { %v7422_v50 = vpop.eup %7421  ;;  %6462 = vmatpush3.bf16.msra.mxu0 %v5114_v56  ;;  %5490 = vmatprep.mubr.bf16.mxu0 %v7240_v43  ;;  %v5086_v1 = vmul.f32 %v5022_v39, %v9888_v9  ;;  %v5087_v35 = vmul.f32 %v5023_v62, %v9902_v31  ;;  %v5025_v30 = vmul.f32 0.5, %v4961_v53  ;;  %v5119_v38 = vpack.c.bf16 %v9858_v49, %v9844_v11  ;;  %v7242_v11 = vld [vmem:[%s10403_s4 + $0xa0] ss:$16 sps:$4 sm:$0xff]   ;;  %v7255_v0 = vld [vmem:[%s10403_s4 + $0x4c] ss:$16 sps:$4 sm:$0xff]  }
 0xdab   : > { %v7424_v34 = vpop.eup %7423  ;;  %6463 = vmatprep.subr.bf16.mxu0 %v5123_v45  ;;  %v5088_v27 = vmul.f32 %v5024_v40, %v9884_v44  ;;  %v4962_v47 = vadd.f32 1.0, %v7422_v50  ;;  %v5028_v12 = vmul.f32 0.5, %v4964_v17  ;;  %v5120_v21 = vpack.c.bf16 %v9949_v8, %v9942_v58  ;;  %v7243_v58 = vld [vmem:[%s10403_s4 + $0xc4] ss:$16 sps:$4 sm:$0xff]   ;;  %v7258_v51 = vld [vmem:[%s10403_s4 + $0x6c] ss:$16 sps:$4 sm:$0xff]  }
 0xdac   : > { %v7426_v29 = vpop.eup %7425  ;;  %v5124_v56 = vpack.c.bf16 %v5087_v35, %v5086_v1  ;;  %v5089_v48 = vmul.f32 %v5025_v30, %v9895_v28  ;;  %v4965_v9 = vadd.f32 1.0, %v7424_v34  ;;  %v5121_v31 = vpack.c.bf16 %v9946_v57, %v9939_v36  ;;  %v7260_v39 = vld [vmem:[%s10403_s4 + $0x68] ss:$16 sps:$4 sm:$0xff]   ;;  %v7261_v62 = vld [vmem:[%s10403_s4 + $0x8c] ss:$16 sps:$4 sm:$0xff]  }
 0xdad   : > { %v7428_v37 = vpop.eup %7427  ;;  %v4963_v49 = vadd.f32 1.0, %v7426_v29  ;;  %v5026_v44 = vmul.f32 0.5, %v4962_v47  ;;  %v5092_v57 = vmul.f32 %v5028_v12, %v9926_v60  ;;  %v7263_v53 = vld [vmem:[%s10403_s4 + $0x88] ss:$16 sps:$4 sm:$0xff]   ;;  %v7267_v40 = vld [vmem:[%s10403_s4 + $0xcc] ss:$16 sps:$4 sm:$0xff]  }
 0xdae   : > { %v7430_v63 = vpop.eup %7429  ;;  %6464 = vmatpush3.bf16.msra.mxu0 %v5115_v54  ;;  %v5125_v10 = vpack.c.bf16 %v5089_v48, %v5088_v27  ;;  %v5029_v8 = vmul.f32 0.5, %v4965_v9  ;;  %v4968_v28 = vadd.f32 1.0, %v7428_v37  ;;  %v7266_v45 = vld [vmem:[%s10403_s4 + $0xa8] ss:$16 sps:$4 sm:$0xff]   ;;  %v7270_v17 = vld [vmem:[%s10403_s4 + $0xec] ss:$16 sps:$4 sm:$0xff]  }
 0xdaf   : > { %v7432_v55 = vpop.eup %7431  ;;  %6465 = vmatprep.subr.bf16.mxu0 %v5124_v56  ;;  %v5027_v19 = vmul.f32 0.5, %v4963_v49  ;;  %v4966_v36 = vadd.f32 1.0, %v7430_v63  ;;  %v5090_v25 = vmul.f32 %v5026_v44, %v9957_v32  ;;  %v7246_v32 = vld [vmem:[%s10403_s4 + $0xe4] ss:$16 sps:$4 sm:$0xff]   ;;  %v7272_v50 = vld [vmem:[%s10403_s4 + $0xe8] ss:$16 sps:$4 sm:$0xff]  }
 0xdb0   : > { %v5093_v14 = vmul.f32 %v5029_v8, %v9961_v24  ;;  %v4969_v26 = vadd.f32 1.0, %v7432_v55  ;;  %v5032_v2 = vmul.f32 0.5, %v4968_v28 }
 0xdb1   : > { %v7434_v61 = vpop.eup %7433  ;;  %5491 = vmatmul.mubr.bf16.gmra.mrb[76].mxu0 %v7242_v11  ;;  %v5091_v33 = vmul.f32 %v5027_v19, %v9966_v16  ;;  %v5030_v41 = vmul.f32 0.5, %v4966_v36 }
 0xdb2   : > { %6466 = vmatpush3.bf16.msra.mxu0 %v5116_v20  ;;  %5498 = vmatprep.mubr.bf16.mxu0 %v7243_v58  ;;  %v5127_v46 = vpack.c.bf16 %v5093_v14, %v5092_v57  ;;  %v4967_v5 = vadd.f32 1.0, %v7434_v61  ;;  %v5033_v22 = vmul.f32 0.5, %v4969_v26  ;;  %v5096_v60 = vmul.f32 %v5032_v2, %v9973_v18  ;;  %v7248_v18 = vld [vmem:[%s10403_s4 + $0xe0] ss:$16 sps:$4 sm:$0xff]   ;;  %v7257_v20 = vld [vmem:[%s10403_s4 + $0x48] ss:$16 sps:$4 sm:$0xff]  }
 0xdb3   : > { %6467 = vmatprep.subr.bf16.mxu0 %v5125_v10  ;;  %v5126_v54 = vpack.c.bf16 %v5091_v33, %v5090_v25  ;;  %v5094_v16 = vmul.f32 %v5030_v41, %v9988_v6  ;;  %v7249_v6 = vld [vmem:[%s10403_s4 + $0x8] ss:$16 sps:$4 sm:$0xff]  }
 0xdb4   : > { %v5031_v7 = vmul.f32 0.5, %v4967_v5  ;;  %v5097_v24 = vmul.f32 %v5033_v22, %v9994_v13  ;;  %v7251_v13 = vld [vmem:[%s10403_s4 + $0xc] ss:$16 sps:$4 sm:$0xff]  }
 0xdb6   : > { %6468 = vmatpush3.bf16.msra.mxu0 %v5117_v42  ;;  %v5095_v43 = vmul.f32 %v5031_v7, %v10005_v23  ;;  %v5129_v4 = vpack.c.bf16 %v5097_v24, %v5096_v60  ;;  %v7252_v23 = vld [vmem:[%s10403_s4 + $0x2c] ss:$16 sps:$4 sm:$0xff]  }
 0xdb7   : > { %6469 = vmatprep.subr.bf16.mxu0 %v5126_v54  ;;  %v7264_v42 = vld [vmem:[%s10403_s4 + $0xac] ss:$16 sps:$4 sm:$0xff]  }
 0xdb8   : > { %v5128_v15 = vpack.c.bf16 %v5095_v43, %v5094_v16 }
 0xdb9   : > { %5499 = vmatmul.mubr.bf16.gmra.mrb[80].mxu0 %v7245_v59 }
 0xdba   : > { %6470 = vmatpush3.bf16.msra.mxu0 %v5118_v52  ;;  %5506 = vmatprep.mubr.bf16.mxu0 %v7246_v32  ;;  %v7269_v52 = vld [vmem:[%s10403_s4 + $0xc8] ss:$16 sps:$4 sm:$0xff]  }
 0xdbb   : > { %6471 = vmatprep.subr.bf16.mxu0 %v5127_v46 }
 0xdbe   : > { %6472 = vmatpush3.bf16.msra.mxu0 %v5119_v38 }
 0xdbf   : > { %6473 = vmatprep.subr.bf16.mxu0 %v5128_v15 }
 0xdc1   : > { %5507 = vmatmul.mubr.bf16.gmra.mrb[84].mxu0 %v7248_v18 }
 0xdc2   : > { %6474 = vmatpush3.bf16.msra.mxu0 %v5120_v21  ;;  %5547 = vmatprep.mubr.bf16.mxu0 %v7251_v13 }
 0xdc3   : > { %6475 = vmatprep.subr.bf16.mxu0 %v5129_v4 }
 0xdc6   : > { %6476 = vmatpush3.bf16.msra.mxu0 %v5121_v31 }
 0xdc9   : > { %5548 = vmatmul.mubr.bf16.vlgmr.msra.gmra.mrb[88].mxu0 %v7249_v6 }
 0xdca   : > { %5555 = vmatprep.mubr.bf16.mxu0 %v7252_v23 }
 0xdd1   : > { %5556 = vmatmul.mubr.bf16.gmra.mrb[92].mxu0 %v7254_v3 }
 0xdd2   : > { %5563 = vmatprep.mubr.bf16.mxu0 %v7255_v0 }
 0xdd9   : > { %5564 = vmatmul.mubr.bf16.gmra.mrb[96].mxu0 %v7257_v20 }
 0xdda   : > { %5571 = vmatprep.mubr.bf16.mxu0 %v7258_v51 }
 0xde1   : > { %5572 = vmatmul.mubr.bf16.gmra.mrb[100].mxu0 %v7260_v39 }
 0xde2   : > { %5579 = vmatprep.mubr.bf16.mxu0 %v7261_v62 }
 0xde9   : > { %5580 = vmatmul.mubr.bf16.gmra.mrb[104].mxu0 %v7263_v53 }
 0xdea   : > { %5587 = vmatprep.mubr.bf16.mxu0 %v7264_v42 }
 0xdf1   : > { %5588 = vmatmul.mubr.bf16.gmra.mrb[108].mxu0 %v7266_v45 }
 0xdf2   : > { %5595 = vmatprep.mubr.bf16.mxu0 %v7267_v40 }
 0xdf9   : > { %5596 = vmatmul.mubr.bf16.gmra.mrb[112].mxu0 %v7269_v52 }
 0xdfa   : > { %5603 = vmatprep.mubr.bf16.mxu0 %v7270_v17 }
 0xe01   : > { %5604 = vmatmul.mubr.bf16.gmra.mrb[116].mxu0 %v7272_v50 }
 0xe5c   : > { %v6413_v1 = vpop.f32.mrb[56].mxu0 }
 0xe5d   : > { %v6414_v35 = vpop.f32.mrb[57].mxu0 }
 0xe5e   : > { %v10126_v30 = vadd.f32 %v6414_v35, %v6413_v1  ;;  %v6416_v38 = vpop.f32.mrb[58].mxu0 }
 0xe5f   : > { %v6417_v34 = vpop.f32.mrb[59].mxu0 }
 0xe60   : > { %v10128_v27 = vadd.f32 %v6417_v34, %v6416_v38 }
 0xe64   : > { %v6419_v47 = vpop.f32.mrb[60].mxu0 }
 0xe65   : > { %v6420_v12 = vpop.f32.mrb[61].mxu0 }
 0xe66   : > { %v10135_v21 = vadd.f32 %v6420_v12, %v6419_v47  ;;  %v6422_v29 = vpop.f32.mrb[62].mxu0 }
 0xe67   : > { %v6423_v56 = vpop.f32.mrb[63].mxu0 }
 0xe68   : > { %7473 = shalt.err (!%p7470_p10)
}
 0xe69   : > { %s7474_s17 = scalar_lea.hbm %s10140_s24, 1024  ;;  %s7478_s29 = scalar_lea.hbm %s10448_s19, 4096 }
 0xe6a   : > { %p7475_p11 = scmp.ne.s32.totalorder %s10140_s24, %s7474_s17  ;;  %p7479_p0 = scmp.lt.u32.totalorder %s10140_s24, %s10448_s19 }
 0xe6b   : > { %p7480_p1 = scmp.lt.u32.totalorder %s7478_s29, %s7474_s17  ;;  %p7482_p3 = scmp.lt.u32.totalorder %s7474_s17, %s10140_s24 }
 0xe6c   : > { %p7476_p12 = pnand %p7475_p11, %p7746_p8 }
 0xe6d   : > { %p7481_p2 = por %p7480_p1, %p7479_p0 }
 0xe6e   : > { %p7477_p13 = pneg %p7476_p12 }
 0xe6f   : > { %p7483_p4 = por %p7482_p3, %p7481_p2 }
 0xe71   : > { %p7484_p5 = pnand %p7483_p4, %p7477_p13 }
 0xe73   : > { %7487 = shalt.err (!%p7484_p5)
}
 0xe74   : > { %s10361_s2 = smov 128   ;;  %s10362_s1 = smov 256   ;;  %v6424_v48 = vadd.f32 %v6423_v56, %v6422_v29  ;;  %v6425_v9 = vpop.f32.mrb[64].mxu0  ;;  %v5181_v6 = vpop.permute.xlu0 %5180  ;;  %v10450_v45 = vld [vmem:[#allocation18_spill] sm:$0xff]  ;;  %v10452_v17 = vld [vmem:[#allocation20_spill] sm:$0xff] }
 0xe75   : > { %s7594_s18 = smov 8   ;;  %s10449_s16 = scalar_lea.sflag [#allocation6], %s7809_s27  ;;  %v6426_v31 = vpop.f32.mrb[65].mxu0  ;;  %v5453_v3 = vadd.f32 %v10126_v30, %v5181_v6  ;;  %v5186_v51 = vpop.permute.xlu1 %5185 }
 0xe76   : > { %7030 = dma.vmem_to_hbm [thread:$0]  (%p7746_p8), %s10133_s20, 1024, %s10140_s24, %s10449_s16, %s10361_s2, %s10362_s1, %s7594_s18   ;;  %v10169_v37 = vadd.f32 %v6426_v31, %v6425_v9  ;;  %v6428_v11 = vpop.f32.mrb[66].mxu0  ;;  %v5456_v62 = vadd.f32 %v10128_v27, %v5186_v51  ;;  %v10453_v31 = vld [vmem:[#allocation19_spill] sm:$0xff] }
 0xe77   : > { %v6429_v49 = vpop.f32.mrb[67].mxu0  ;;  %s10451_s20 = sshll.u32 %s7809_s27, 7  ;;  %s6168_s17 = sshll.u32 %s7574_s28, 5 }
 0xe78   : > { %v10171_v44 = vadd.f32 %v6429_v49, %v6428_v11  ;;  %v6431_v63 = vpop.f32.mrb[68].mxu0  ;;  %s10198_s24 = scalar_lea.vmem [#allocation3], %s10451_s20  ;;  %v5191_v35 = vpop.permute.xlu0 %5190  ;;  %s5661_s23 = sadd.s32 %s10446_s0, %s6168_s17 }
 0xe79   : > { %v6432_v10 = vpop.f32.mrb[69].mxu0  ;;  %v5461_v38 = vadd.f32 %v10135_v21, %v5191_v35  ;;  %v5196_v47 = vpop.permute.xlu1 %5195  ;;  %s6169_s28 = sshll.u32 %s5661_s23, 7  ;;  %s5664_s29 = sshll.u32 %s10198_s24, 4  ;;  %s10251_s29 = int_to_ptr.vmem [resolvable:$true] %s5664_s29 }
 0xe7a   : > { %v10173_v58 = vadd.f32 %v6432_v10, %v6431_v63  ;;  %v6434_v8 = vpop.f32.mrb[70].mxu0  ;;  %v5464_v29 = vadd.f32 %v6424_v48, %v5196_v47  ;;  %v10454_v63 = vld [vmem:[#allocation21_spill] sm:$0xff]  ;;  %v10460_v47 = vld [vmem:[#allocation28_spill] sm:$0xff]  ;;  %s10467_s16 = sld [smem:[#allocation60_spill]]  ;;  %s5645_s0 = scalar_lea.sflag [#allocation4], %s7809_s27 }
 0xe7b   : > { %v6435_v28 = vpop.f32.mrb[71].mxu0  ;;  %s7488_s17 = scalar_lea.vmem %s10251_s29, 2048  ;;  %s7595_s23 = smov [#allocation3]  }
 0xe7c   : > { %v10175_v55 = vadd.f32 %v6435_v28, %v6434_v8  ;;  %v6437_v19 = vpop.f32.mrb[72].mxu0  ;;  %v5201_v28 = vpop.permute.xlu0 %5200  ;;  %p7489_p6 = scmp.ne.s32.totalorder %s10251_s29, %s7488_s17  ;;  %s7492_s2 = sshll.u32 %s7595_s23, 4  ;;  %s7493_s2 = int_to_ptr.vmem [resolvable:$false] %s7492_s2 }
 0xe7d   : > { %v6438_v36 = vpop.f32.mrb[73].mxu0  ;;  %v5469_v21 = vadd.f32 %v10169_v37, %v5201_v28  ;;  %v10461_v28 = vld [vmem:[#allocation27_spill] sm:$0xff]  ;;  %s7494_s1 = scalar_lea.vmem %s7493_s2, 4096  ;;  %p7495_p11 = scmp.lt.s32.totalorder %s10251_s29, %s7493_s2 }
 0xe7e   : > { %v10177_v57 = vadd.f32 %v6438_v36, %v6437_v19  ;;  %v6440_v14 = vpop.f32.mrb[74].mxu0  ;;  %p7490_p7 = pnand %p7489_p6, %p7746_p8  ;;  %p7496_p12 = scmp.lt.s32.totalorder %s7494_s1, %s7488_s17 }
 0xe7f   : > { %v6441_v26 = vpop.f32.mrb[75].mxu0 }
 0xe80   : > { %v10179_v2 = vadd.f32 %v6441_v26, %v6440_v14  ;;  %v5206_v26 = vpop.permute.xlu1 %5205  ;;  %s10249_s20 = scalar_lea.hbm %s10467_s16, %s6169_s28  ;;  %p7491_p10 = pneg %p7490_p7 }
 0xe81   : > { %p7497_p13 = por %p7496_p12, %p7495_p11 }
 0xe83   : > { %p7498_p0 = pnand %p7497_p13, %p7491_p10 }
 0xe84   : > { %v6443_v61 = vpop.f32.mrb[76].mxu0  ;;  %v5216_v6 = vpop.permute.xlu1 %5215 }
 0xe85   : > { %v6444_v25 = vpop.f32.mrb[77].mxu0 }
 0xe86   : > { %v10181_v33 = vadd.f32 %v6444_v25, %v6443_v61  ;;  %v6446_v46 = vpop.f32.mrb[78].mxu0  ;;  %v5472_v61 = vadd.f32 %v10171_v44, %v5206_v26 }
 0xe87   : > { %v6447_v5 = vpop.f32.mrb[79].mxu0 }
 0xe88   : > { %v10183_v41 = vadd.f32 %v6447_v5, %v6446_v46  ;;  %v10455_v5 = vld [vmem:[#allocation22_spill] sm:$0xff] }
 0xe8c   : > { %v6449_v22 = vpop.f32.mrb[80].mxu0 }
 0xe8d   : > { %v6450_v54 = vpop.f32.mrb[81].mxu0 }
 0xe8e   : > { %v10185_v7 = vadd.f32 %v6450_v54, %v6449_v22  ;;  %v6452_v60 = vpop.f32.mrb[82].mxu0 }
 0xe8f   : > { %v6453_v24 = vpop.f32.mrb[83].mxu0 }
 0xe90   : > { %v10187_v59 = vadd.f32 %v6453_v24, %v6452_v60  ;;  %v10456_v60 = vld [vmem:[#allocation24_spill] sm:$0xff] }
 0xe94   : > { %v6455_v32 = vpop.f32.mrb[84].mxu0 }
 0xe95   : > { %v6456_v16 = vpop.f32.mrb[85].mxu0 }
 0xe96   : > { %v10189_v43 = vadd.f32 %v6456_v16, %v6455_v32  ;;  %v6458_v4 = vpop.f32.mrb[86].mxu0  ;;  %v5211_v16 = vpop.permute.xlu0 %5210 }
 0xe97   : > { %v6459_v15 = vpop.f32.mrb[87].mxu0 }
 0xe98   : > { %v10191_v18 = vadd.f32 %v6459_v15, %v6458_v4  ;;  %v5477_v4 = vadd.f32 %v10173_v58, %v5211_v16 }
 0xe9c   : > { %v6477_v13 = vpop.f32.mrb[88].mxu0 }
 0xe9d   : > { %v6478_v23 = vpop.f32.mrb[89].mxu0 }
 0xe9e   : > { %v6479_v0 = vadd.f32 %v6478_v23, %v6477_v13  ;;  %v6480_v20 = vpop.f32.mrb[90].mxu0  ;;  %v5480_v23 = vadd.f32 %v10175_v55, %v5216_v6 }
 0xe9f   : > { %v6481_v39 = vpop.f32.mrb[91].mxu0 }
 0xea0   : > { %v5550_v53 = vadd.f32 %v6479_v0, %v5453_v3  ;;  %v6482_v42 = vadd.f32 %v6481_v39, %v6480_v20  ;;  %v10457_v20 = vld [vmem:[#allocation23_spill] sm:$0xff] }
 0xea2   : > { %v5612_v40 = vadd.f32 %v5550_v53, %v10450_v45  ;;  %v5553_v52 = vadd.f32 %v6482_v42, %v5456_v62  ;;  %v10458_v62 = vld [vmem:[#allocation25_spill] sm:$0xff]  ;;  %v5221_v45 = vpop.permute.xlu0 %5220 }
 0xea4   : > { %5628 = vst [vmem:[%s10198_s24] sm:$0xff] %v5612_v40  ;;  %v5613_v50 = vadd.f32 %v5553_v52, %v10452_v17  ;;  %v6483_v1 = vpop.f32.mrb[92].mxu0  ;;  %v5485_v40 = vadd.f32 %v10177_v57, %v5221_v45 }
 0xea5   : > { %v6484_v30 = vpop.f32.mrb[93].mxu0 }
 0xea6   : > { %5629 = vst [vmem:[%s10198_s24 + $0x8] sm:$0xff] %v5613_v50  ;;  %v6485_v34 = vadd.f32 %v6484_v30, %v6483_v1  ;;  %v6486_v27 = vpop.f32.mrb[94].mxu0  ;;  %v5226_v50 = vpop.permute.xlu1 %5225 }
 0xea7   : > { %v6487_v12 = vpop.f32.mrb[95].mxu0  ;;  %v5488_v1 = vadd.f32 %v10179_v2, %v5226_v50 }
 0xea8   : > { %v5558_v56 = vadd.f32 %v6485_v34, %v5461_v38  ;;  %v6488_v9 = vadd.f32 %v6487_v12, %v6486_v27  ;;  %v10459_v38 = vld [vmem:[#allocation26_spill] sm:$0xff] }
 0xeaa   : > { %v5614_v11 = vadd.f32 %v5558_v56, %v10453_v31  ;;  %v5561_v49 = vadd.f32 %v6488_v9, %v5464_v29  ;;  %v5231_v56 = vpop.permute.xlu0 %5230 }
 0xeab   : > { %v5493_v9 = vadd.f32 %v10181_v33, %v5231_v56 }
 0xeac   : > { %5630 = vst [vmem:[%s10198_s24 + $0x10] sm:$0xff] %v5614_v11  ;;  %v5615_v10 = vadd.f32 %v5561_v49, %v10454_v63  ;;  %v6489_v8 = vpop.f32.mrb[96].mxu0  ;;  %v5236_v49 = vpop.permute.xlu1 %5235 }
 0xead   : > { %v6490_v19 = vpop.f32.mrb[97].mxu0  ;;  %v5496_v63 = vadd.f32 %v10183_v41, %v5236_v49 }
 0xeae   : > { %5631 = vst [vmem:[%s10198_s24 + $0x18] sm:$0xff] %v5615_v10  ;;  %v6491_v36 = vadd.f32 %v6490_v19, %v6489_v8  ;;  %v6492_v14 = vpop.f32.mrb[98].mxu0  ;;  %v5241_v33 = vpop.permute.xlu0 %5240 }
 0xeaf   : > { %v6493_v48 = vpop.f32.mrb[99].mxu0 }
 0xeb0   : > { %v5566_v25 = vadd.f32 %v6491_v36, %v5469_v21  ;;  %v6494_v46 = vadd.f32 %v6493_v48, %v6492_v14  ;;  %v10462_v36 = vld [vmem:[#allocation29_spill] sm:$0xff]  ;;  %v5246_v41 = vpop.permute.xlu1 %5245 }
 0xeb2   : > { %v5616_v22 = vadd.f32 %v5566_v25, %v10455_v5  ;;  %v5569_v54 = vadd.f32 %v6494_v46, %v5472_v61  ;;  %v5501_v61 = vadd.f32 %v10185_v7, %v5241_v33 }
 0xeb4   : > { %5632 = vst [vmem:[%s10198_s24 + $0x20] sm:$0xff] %v5616_v22  ;;  %v5617_v24 = vadd.f32 %v5569_v54, %v10456_v60  ;;  %v6495_v32 = vpop.f32.mrb[100].mxu0  ;;  %v5504_v22 = vadd.f32 %v10187_v59, %v5246_v41 }
 0xeb5   : > { %v6496_v37 = vpop.f32.mrb[101].mxu0 }
 0xeb6   : > { %5633 = vst [vmem:[%s10198_s24 + $0x28] sm:$0xff] %v5617_v24  ;;  %v6497_v15 = vadd.f32 %v6496_v37, %v6495_v32  ;;  %v6498_v13 = vpop.f32.mrb[102].mxu0  ;;  %v10463_v24 = vld [vmem:[#allocation30_spill] sm:$0xff]  ;;  %v10464_v37 = vld [vmem:[#allocation32_spill] sm:$0xff] }
 0xeb7   : > { %v6499_v44 = vpop.f32.mrb[103].mxu0 }
 0xeb8   : > { %v5574_v3 = vadd.f32 %v6497_v15, %v5477_v4  ;;  %v6500_v0 = vadd.f32 %v6499_v44, %v6498_v13  ;;  %v5251_v15 = vpop.permute.xlu0 %5250 }
 0xeb9   : > { %v5509_v6 = vadd.f32 %v10189_v43, %v5251_v15  ;;  %v10466_v43 = vld [vmem:[#allocation33_spill] sm:$0xff] }
 0xeba   : > { %v5618_v51 = vadd.f32 %v5574_v3, %v10457_v20  ;;  %v5577_v39 = vadd.f32 %v6500_v0, %v5480_v23  ;;  %v5256_v23 = vpop.permute.xlu1 %5255 }
 0xebb   : > { %v5512_v0 = vadd.f32 %v10191_v18, %v5256_v23 }
 0xebc   : > { %5634 = vst [vmem:[%s10198_s24 + $0x30] sm:$0xff] %v5618_v51  ;;  %v5619_v53 = vadd.f32 %v5577_v39, %v10458_v62  ;;  %v6501_v42 = vpop.f32.mrb[104].mxu0  ;;  %v10465_v39 = vld [vmem:[#allocation31_spill] sm:$0xff] }
 0xebd   : > { %v6502_v58 = vpop.f32.mrb[105].mxu0 }
 0xebe   : > { %5635 = vst [vmem:[%s10198_s24 + $0x38] sm:$0xff] %v5619_v53  ;;  %v6503_v52 = vadd.f32 %v6502_v58, %v6501_v42  ;;  %v6504_v17 = vpop.f32.mrb[106].mxu0 }
 0xebf   : > { %v6505_v55 = vpop.f32.mrb[107].mxu0 }
 0xec0   : > { %v5582_v35 = vadd.f32 %v6503_v52, %v5485_v40  ;;  %v6506_v30 = vadd.f32 %v6505_v55, %v6504_v17 }
 0xec2   : > { %v5620_v34 = vadd.f32 %v5582_v35, %v10459_v38  ;;  %v5585_v27 = vadd.f32 %v6506_v30, %v5488_v1 }
 0xec4   : > { %5636 = vst [vmem:[%s10198_s24 + $0x40] sm:$0xff] %v5620_v34  ;;  %v5621_v12 = vadd.f32 %v5585_v27, %v10460_v47  ;;  %v6507_v29 = vpop.f32.mrb[108].mxu0 }
 0xec5   : > { %v6508_v57 = vpop.f32.mrb[109].mxu0 }
 0xec6   : > { %5637 = vst [vmem:[%s10198_s24 + $0x48] sm:$0xff] %v5621_v12  ;;  %v6509_v31 = vadd.f32 %v6508_v57, %v6507_v29  ;;  %v6510_v11 = vpop.f32.mrb[110].mxu0 }
 0xec7   : > { %v6511_v2 = vpop.f32.mrb[111].mxu0 }
 0xec8   : > { %v5590_v10 = vadd.f32 %v6509_v31, %v5493_v9  ;;  %v6512_v8 = vadd.f32 %v6511_v2, %v6510_v11 }
 0xeca   : > { %v5622_v19 = vadd.f32 %v5590_v10, %v10461_v28  ;;  %v5593_v21 = vadd.f32 %v6512_v8, %v5496_v63 }
 0xecc   : > { %5638 = vst [vmem:[%s10198_s24 + $0x50] sm:$0xff] %v5622_v19  ;;  %v5623_v14 = vadd.f32 %v5593_v21, %v10462_v36  ;;  %v6513_v26 = vpop.f32.mrb[112].mxu0 }
 0xecd   : > { %v6514_v48 = vpop.f32.mrb[113].mxu0 }
 0xece   : > { %5639 = vst [vmem:[%s10198_s24 + $0x58] sm:$0xff] %v5623_v14  ;;  %v6515_v25 = vadd.f32 %v6514_v48, %v6513_v26  ;;  %v6516_v46 = vpop.f32.mrb[114].mxu0 }
 0xecf   : > { %v6517_v5 = vpop.f32.mrb[115].mxu0 }
 0xed0   : > { %v5598_v54 = vadd.f32 %v6515_v25, %v5501_v61  ;;  %v6518_v60 = vadd.f32 %v6517_v5, %v6516_v46 }
 0xed2   : > { %v5624_v32 = vadd.f32 %v5598_v54, %v10463_v24  ;;  %v5601_v16 = vadd.f32 %v6518_v60, %v5504_v22 }
 0xed4   : > { %5640 = vst [vmem:[%s10198_s24 + $0x60] sm:$0xff] %v5624_v32  ;;  %v5625_v4 = vadd.f32 %v5601_v16, %v10464_v37  ;;  %v6519_v7 = vpop.f32.mrb[116].mxu0 }
 0xed5   : > { %v6520_v13 = vpop.f32.mrb[117].mxu0 }
 0xed6   : > { %5641 = vst [vmem:[%s10198_s24 + $0x68] sm:$0xff] %v5625_v4  ;;  %v6521_v44 = vadd.f32 %v6520_v13, %v6519_v7  ;;  %v6522_v59 = vpop.f32.mrb[118].mxu0 }
 0xed7   : > { %v6523_v3 = vpop.f32.mrb[119].mxu0 }
 0xed8   : > { %v5606_v20 = vadd.f32 %v6521_v44, %v5509_v6  ;;  %v6524_v51 = vadd.f32 %v6523_v3, %v6522_v59 }
 0xeda   : > { %v5626_v62 = vadd.f32 %v5606_v20, %v10465_v39  ;;  %v5609_v53 = vadd.f32 %v6524_v51, %v5512_v0 }
 0xedc   : > { %5642 = vst [vmem:[%s10198_s24 + $0x70] sm:$0xff] %v5626_v62  ;;  %v5627_v42 = vadd.f32 %v5609_v53, %v10466_v43 }
 0xede   : > { %5643 = vst [vmem:[%s10198_s24 + $0x78] sm:$0xff] %v5627_v42 }
 0xedf   : > { %7501 = shalt.err (!%p7498_p0)
}
 0xee0   : > { %s7502_s24 = scalar_lea.hbm %s10249_s20, 2048  ;;  %s7506_s14 = scalar_lea.hbm %s10467_s16, 8192 }
 0xee1   : > { %p7503_p1 = scmp.ne.s32.totalorder %s10249_s20, %s7502_s24  ;;  %p7507_p4 = scmp.lt.u32.totalorder %s10249_s20, %s10467_s16 }
 0xee2   : > { %p7508_p5 = scmp.lt.u32.totalorder %s7506_s14, %s7502_s24  ;;  %p7510_p7 = scmp.lt.u32.totalorder %s7502_s24, %s10249_s20 }
 0xee3   : > { %p7504_p2 = pnand %p7503_p1, %p7746_p8 }
 0xee4   : > { %p7509_p6 = por %p7508_p5, %p7507_p4 }
 0xee5   : > { %p7505_p3 = pneg %p7504_p2 }
 0xee6   : > { %p7511_p10 = por %p7510_p7, %p7509_p6 }
 0xee8   : > { %p7512_p11 = pnand %p7511_p10, %p7505_p3 }
 0xeea   : > { %7515 = shalt.err (!%p7512_p11)
}
 0xeeb   : > { %s10468_s1 = smov 256   ;;  %s10469_s17 = smov 128  }
 0xeec   : > { %7029 = dma.vmem_to_hbm [thread:$0]  (%p7746_p8), %s10251_s29, 2048, %s10249_s20, %s5645_s0, %s10469_s17, %s10468_s1, %s7594_s18  }
 0xeed PF: > { %s10470_s28 = sld [smem:[#allocation9_spill]]  ;;  %p7040_p12 = scmp.ge.s32.totalorder %s7586_s30, 2 }
 0xeef   : > { %p7034_p13 = pnand %p7040_p12, %p7750_p9 }
 0xef3   : > { %s5696_s14 = sand.u32 1, %s10470_s28  }
 0xef4   : > { %s5697_s24 = scalar_lea.sflag [#allocation4], %s5696_s14 }
 0xef5   : > { %7549 = dma.done.wait (!%p7034_p13), %s5697_s24, 2048  }
 0xef6   : > { %7551 = vsyncadd (!%p7034_p13), %s5697_s24, 4294965248  ;;  %s5706_s22 = scalar_lea.sflag [#allocation6], %s5696_s14 }
 0xef7   : > { %7553 = dma.done.wait (!%p7034_p13), %s5706_s22, 1024  }
 0xef8   : > { %7555 = vsyncadd (!%p7034_p13), %s5706_s22, 4294966272  ;;  %s34_s30 = sadd.s32 1, %s7586_s30   ;;  %s10472_s27 = sld [smem:[#allocation17_spill]] }
 0xef9   : > { %p31_p0 = scmp.ge.s32.totalorder %s34_s30, 6   ;;  %s10473_s18 = sld [smem:[#allocation11_spill]] }
 0xefa   : > { %s10474_s28 = sld [smem:[#allocation12_spill]]  ;;  %s10475_s29 = sld [smem:[#allocation13_spill]] }
 0xefb   : > { %s10476_s0 = sld [smem:[#allocation14_spill]]  ;;  %s10477_s24 = smov %s7562_s25 }
 0xefc   : > { %s10478_s25 = smov %s7566_s26  ;;  %33 = sbr.rel (!%p31_p0) target bundleno = 15 (0xf), region = 203 }
 0xefe   : > { %s10479_s26 = smov %s10472_s27 }
 0xeff   : > { %s10480_s27 = smov %s10473_s18 }
 0xf03   :  { %5711 = vsyncpa [#allocation4], 1 }
 0xf04   :  { %5713 = vsyncpa [#allocation4 + $0x1], 1 }
 0xf05   :  { %5714 = vsyncpa [#allocation6], 1 }
 0xf06   :  { %5716 = vsyncpa [#allocation6 + $0x1], 1 }

</bundles_post_ra>
